<compile_context>
chip_gen: v7x
topology: tpu7x:2x2x1
jax: 0.10.0
libtpu: 0.0.40
codegen_flags: <defaults>
</compile_context>

<pallas_src>
import functools

import jax
import jax.numpy as jnp
from jax import lax
from jax.experimental import pallas as pl
from jax.experimental.pallas import tpu as pltpu

_EPS = 1e-5                 # PyTorch BatchNorm2d default eps
_TM_MAX = 1024              # upper bound on the row tile
_VMEM_BUDGET = 20 << 20     # per-step footprint target (safe on v5e/v6e/v7x)
_VMEM_LIMIT = 32 << 20      # explicit scoped-VMEM limit handed to Mosaic


def _round_up(x, m):
    return (x + m - 1) // m * m


def _pick_tm(m, per_row_bytes, resident_bytes):
    """Largest multiple-of-16 row tile whose double-buffered footprint fits."""
    tm = min(_TM_MAX, _round_up(m, 16))
    while tm > 16 and resident_bytes + 2 * tm * per_row_bytes > _VMEM_BUDGET:
        tm = max(16, _round_up(tm // 2, 16))
    return tm


def _mosaic_params(*sem):
    return pltpu.CompilerParams(dimension_semantics=sem,
                                vmem_limit_bytes=_VMEM_LIMIT)


# ----------------------------- Pallas kernels ------------------------------

def _conv1_conv3x3_kernel(x_ref, w1_ref, b1_ref, w2_ref, b2_ref, o_ref,
                          xpad_ref, acc_ref, *, H, W, Cin, Cmid):
    """Fused conv1(1x1)+bn1+relu and conv2(3x3, pad=1, stride=1)+bn2+relu, 1 image.

    conv1 result goes directly into the interior of the zero-padded VMEM scratch;
    conv2 is computed as 9 per-tap MXU dots accumulated in f32.
    """
    # conv1 + bn1 (scale folded into w1) + relu; f32 accumulate, bf16 store.
    x_img = x_ref[0].reshape(H * W, Cin).astype(jnp.bfloat16)
    y1 = jnp.dot(x_img, w1_ref[...], preferred_element_type=jnp.float32)
    y1 = jnp.maximum(y1 + b1_ref[...], 0.0).astype(jnp.bfloat16)

    # Zero only the 1-pixel halo (interior fully overwritten every grid step).
    zrow = jnp.zeros((1, W + 2, Cmid), dtype=xpad_ref.dtype)
    zcol = jnp.zeros((H + 2, 1, Cmid), dtype=xpad_ref.dtype)
    xpad_ref[0:1, :, :] = zrow
    xpad_ref[H + 1:H + 2, :, :] = zrow
    xpad_ref[:, 0:1, :] = zcol
    xpad_ref[:, W + 1:W + 2, :] = zcol
    xpad_ref[1:H + 1, 1:W + 1, :] = y1.reshape(H, W, Cmid)

    # conv2: accumulate 9 windowed-tap dots in f32 (no im2col materialization).
    for dy in range(3):
        for dx in range(3):
            tap = xpad_ref[dy:dy + H, dx:dx + W, :].reshape(H * W, Cmid)
            contrib = jnp.dot(tap, w2_ref[3 * dy + dx],
                              preferred_element_type=jnp.float32)
            if dy == 0 and dx == 0:
                acc_ref[...] = contrib
            else:
                acc_ref[...] += contrib

    o_ref[0] = jnp.maximum(acc_ref[...] + b2_ref[...], 0.0).astype(o_ref.dtype)


def _conv3_sc_kernel(x2_ref, xs_ref, w3_ref, ws_ref, b_ref, o_ref):
    """conv3(1x1)+bn3 + projection-shortcut conv(1x1)+bn + add + relu (fused).

    Two accumulating MXU dots instead of a lane-axis concat; bf16 output.
    """
    y = jnp.dot(x2_ref[...], w3_ref[...], preferred_element_type=jnp.float32)
    y += jnp.dot(xs_ref[...].astype(jnp.bfloat16), ws_ref[...],
                 preferred_element_type=jnp.float32)
    o_ref[...] = jnp.maximum(y + b_ref[...], 0.0).astype(o_ref.dtype)


def _conv3_id_kernel(x2_ref, xs_ref, w3_ref, b_ref, o_ref):
    """conv3(1x1)+bn3 + identity residual (added in f32) + relu; bf16 output."""
    y = jnp.dot(x2_ref[...], w3_ref[...], preferred_element_type=jnp.float32)
    y = y + b_ref[...] + xs_ref[...]
    o_ref[...] = jnp.maximum(y, 0.0).astype(o_ref.dtype)


# ------------------------------ Wrapper glue --------------------------------

def bottleneck_forward_nhwc(x_nhwc, p, in_planes, planes, expansion=4):
    """NHWC-in / NHWC-out (bf16) Bottleneck forward. stride=1, groups=1, eval BN."""
    out_planes = expansion * planes
    N, H, W, Cin = x_nhwc.shape
    assert Cin == in_planes
    M = N * H * W
    x = x_nhwc.astype(jnp.float32)

    # Fold inference-BN scale into the conv weights (bf16 for the MXU), bias f32.
    w1 = (p['w1'] * p['s1']).astype(jnp.bfloat16)              # (Cin, planes)
    b1 = p['b1']
    w2 = (p['w2'] * p['s2']).astype(jnp.bfloat16)              # (9, planes, planes)
    b2 = p['b2']
    w3 = (p['w3'] * p['s3']).astype(jnp.bfloat16)              # (planes, out_planes)
    has_sc_conv = in_planes != out_planes
    if has_sc_conv:
        ws = (p['ws'] * p['ss']).astype(jnp.bfloat16)          # (Cin, out_planes)
        b3 = p['b3'] + p['bs']
    else:
        b3 = p['b3']

    # ---- fused conv1 + conv2 (per image) ----
    out2 = pl.pallas_call(
        functools.partial(_conv1_conv3x3_kernel, H=H, W=W,
                          Cin=in_planes, Cmid=planes),
        grid=(N,),
        in_specs=[pl.BlockSpec((1, H, W, in_planes), lambda n: (n, 0, 0, 0)),
                  pl.BlockSpec((in_planes, planes), lambda n: (0, 0)),
                  pl.BlockSpec((1, planes), lambda n: (0, 0)),
                  pl.BlockSpec((9, planes, planes), lambda n: (0, 0, 0)),
                  pl.BlockSpec((1, planes), lambda n: (0, 0))],
        out_specs=pl.BlockSpec((1, H * W, planes), lambda n: (n, 0, 0)),
        out_shape=jax.ShapeDtypeStruct((N, H * W, planes), jnp.bfloat16),
        scratch_shapes=[pltpu.VMEM((H + 2, W + 2, planes), jnp.bfloat16),
                        pltpu.VMEM((H * W, planes), jnp.float32)],
        compiler_params=_mosaic_params("parallel"),
    )(x, w1, b1, w2, b2)

    # ---- fused conv3 + shortcut + add + relu, row-tiled over M = N*H*W ----
    out2_2d = out2.reshape(M, planes)            # free reshape (contiguous)
    xs2d = x.reshape(M, in_planes)               # f32 view of x (no extra copy)

    per_row = planes * 2 + in_planes * 4 + out_planes * 2        # bf16/f32/bf16
    resident = 2 * planes * out_planes * 2 + out_planes * 4
    if has_sc_conv:
        resident += 2 * in_planes * out_planes * 2
    tm = _pick_tm(M, per_row, resident)
    grid_m = pl.cdiv(M, tm)                      # ragged tail masked by Pallas

    def row_spec(c):
        return pl.BlockSpec((tm, c), lambda i: (i, 0))

    if has_sc_conv:
        kern = _conv3_sc_kernel
        in_specs = [row_spec(planes), row_spec(in_planes),
                    pl.BlockSpec((planes, out_planes), lambda i: (0, 0)),
                    pl.BlockSpec((in_planes, out_planes), lambda i: (0, 0)),
                    pl.BlockSpec((1, out_planes), lambda i: (0, 0))]
        args = (out2_2d, xs2d, w3, ws, b3)
    else:
        kern = _conv3_id_kernel
        in_specs = [row_spec(planes), row_spec(in_planes),
                    pl.BlockSpec((planes, out_planes), lambda i: (0, 0)),
                    pl.BlockSpec((1, out_planes), lambda i: (0, 0))]
        args = (out2_2d, xs2d, w3, b3)

    out = pl.pallas_call(
        kern,
        grid=(grid_m,),
        in_specs=in_specs,
        out_specs=pl.BlockSpec((tm, out_planes), lambda i: (i, 0)),
        out_shape=jax.ShapeDtypeStruct((M, out_planes), jnp.bfloat16),
        compiler_params=_mosaic_params("parallel"),
    )(*args)

    return out.reshape(N, H, W, out_planes)


def bottleneck_forward(x_nchw, p, in_planes, planes, expansion=4):
    """NCHW boundary wrapper.  For stacked blocks call bottleneck_forward_nhwc
    directly and keep activations in bf16 NHWC (avoids per-block transposes)."""
    x = jnp.transpose(x_nchw, (0, 2, 3, 1))
    out = bottleneck_forward_nhwc(x, p, in_planes, planes, expansion)
    return jnp.transpose(out, (0, 3, 1, 2))


# ----------------------- Deterministic parameter init -----------------------

def make_params(key, in_planes, planes, expansion=4):
    keys = jax.random.split(key, 20)
    it = iter(range(20))

    def conv_w(shape, fan_in):
        return jax.random.normal(keys[next(it)], shape, jnp.float32) / jnp.sqrt(
            jnp.float32(fan_in))

    def bn_folded(c):
        gamma = 1.0 + 0.1 * jax.random.normal(keys[next(it)], (c,), jnp.float32)
        beta = 0.1 * jax.random.normal(keys[next(it)], (c,), jnp.float32)
        mean = 0.1 * jax.random.normal(keys[next(it)], (c,), jnp.float32)
        var = 1.0 + 0.5 * jax.random.uniform(keys[next(it)], (c,), jnp.float32)
        scale = gamma / jnp.sqrt(var + _EPS)
        bias = beta - mean * scale
        return scale.reshape(1, c), bias.reshape(1, c)

    out_planes = expansion * planes
    p = {}
    p['w1'] = conv_w((in_planes, planes), in_planes)              # 1x1
    p['s1'], p['b1'] = bn_folded(planes)
    p['w2'] = conv_w((9, planes, planes), 9 * planes)             # 3x3 taps (HWIO)
    p['s2'], p['b2'] = bn_folded(planes)
    p['w3'] = conv_w((planes, out_planes), planes)                # 1x1
    p['s3'], p['b3'] = bn_folded(out_planes)
    if in_planes != out_planes:
        p['ws'] = conv_w((in_planes, out_planes), in_planes)      # shortcut 1x1
        p['ss'], p['bs'] = bn_folded(out_planes)
    return p


# ------------------------- Pure-JAX reference check -------------------------

def reference_forward(x_nchw, p, in_planes, planes, expansion=4):
    x = jnp.transpose(x_nchw, (0, 2, 3, 1)).astype(jnp.float32)

    def bn(y, s, b):
        return y * s.reshape(1, 1, 1, -1) + b.reshape(1, 1, 1, -1)

    out = jnp.einsum('nhwc,co->nhwo', x, p['w1'])
    out = jax.nn.relu(bn(out, p['s1'], p['b1']))
    w2 = p['w2'].reshape(3, 3, planes, planes)
    out = lax.conv_general_dilated(out, w2, window_strides=(1, 1),
                                   padding=((1, 1), (1, 1)),
                                   dimension_numbers=('NHWC', 'HWIO', 'NHWC'))
    out = jax.nn.relu(bn(out, p['s2'], p['b2']))
    out = bn(jnp.einsum('nhwc,co->nhwo', out, p['w3']), p['s3'], p['b3'])
    out_planes = expansion * planes
    if in_planes != out_planes:
        sc = bn(jnp.einsum('nhwc,co->nhwo', x, p['ws']), p['ss'], p['bs'])
    else:
        sc = x
    out = jax.nn.relu(out + sc)
    return jnp.transpose(out, (0, 3, 1, 2))


# ----------------------------------- Main ------------------------------------

if __name__ == "__main__":
    key = jax.random.PRNGKey(0)
    kx1, kp1, kx2, kp2 = jax.random.split(key, 4)

    def check(x, params, in_planes, planes):
        out = jax.block_until_ready(bottleneck_forward(x, params, in_planes, planes))
        ref = jax.block_until_ready(reference_forward(x, params, in_planes, planes))
        assert out.shape == ref.shape, (out.shape, ref.shape)
        # bf16 MXU matmuls + bf16 output vs f32 reference: loose per-element
        # tolerance plus a tight aggregate check (structural bugs give O(1) errors).
        err = jnp.abs(out.astype(jnp.float32) - ref)
        max_err = float(err.max())
        mean_err = float(err.mean())
        assert max_err < 1e-1, max_err
        assert mean_err < 1e-2, mean_err

    N, H, W = 2, 16, 16

    # Case A: projection shortcut (in_planes != expansion*planes).
    in_planes, planes = 4, 4
    xA = jax.random.normal(kx1, (N, in_planes, H, W), jnp.float32)
    check(xA, make_params(kp1, in_planes, planes), in_planes, planes)

    # Case B: identity shortcut (in_planes == expansion*planes), f32 residual add.
    in_planes, planes = 16, 4
    xB = jax.random.normal(kx2, (N, in_planes, H, W), jnp.float32)
    check(xB, make_params(kp2, in_planes, planes), in_planes, planes)

    print("KERNEL_OK")
</pallas_src>

<mosaic_0001>
module attributes {stable_mosaic.version = 11 : i64} {
  func.func @_conv1_conv3x3_kernel(%arg0: i32, %arg1: memref<1x16x16x4xf32, #tpu.memory_space<vmem>>, %arg2: memref<4x4xbf16, #tpu.memory_space<vmem>>, %arg3: memref<1x4xf32, #tpu.memory_space<vmem>>, %arg4: memref<9x4x4xbf16, #tpu.memory_space<vmem>>, %arg5: memref<1x4xf32, #tpu.memory_space<vmem>>, %arg6: memref<1x256x4xbf16, #tpu.memory_space<vmem>>, %arg7: memref<18x18x4xbf16, #tpu.memory_space<vmem>>, %arg8: memref<256x4xf32, #tpu.memory_space<vmem>>) attributes {dimension_semantics = [#tpu.dimension_semantics<parallel>], iteration_bounds = array<i64: 2>, scalar_prefetch = 0 : i64, scratch_operands = 2 : i64, tpu.core_type = #tpu.core_type<tc>, window_params = [{transform_indices = @transform_0, window_bounds = array<i64: 1, 16, 16, 4>}, {pipeline_mode = #tpu.pipeline_mode<synchronous>, transform_indices = @transform_1, window_bounds = array<i64: 4, 4>}, {pipeline_mode = #tpu.pipeline_mode<synchronous>, transform_indices = @transform_2, window_bounds = array<i64: 1, 4>}, {pipeline_mode = #tpu.pipeline_mode<synchronous>, transform_indices = @transform_3, window_bounds = array<i64: 9, 4, 4>}, {pipeline_mode = #tpu.pipeline_mode<synchronous>, transform_indices = @transform_4, window_bounds = array<i64: 1, 4>}, {transform_indices = @transform_5, window_bounds = array<i64: 1, 256, 4>}]} {
    %c0 = arith.constant 0 : index
    %c0_0 = arith.constant 0 : index
    %c0_1 = arith.constant 0 : index
    %c0_2 = arith.constant 0 : index
    %0 = vector.load %arg1[%c0, %c0_0, %c0_1, %c0_2] : memref<1x16x16x4xf32, #tpu.memory_space<vmem>>, vector<1x16x16x4xf32>
    %1 = vector.shape_cast %0 : vector<1x16x16x4xf32> to vector<16x16x4xf32>
    %2 = vector.shape_cast %1 : vector<16x16x4xf32> to vector<256x4xf32>
    %3 = arith.truncf %2 : vector<256x4xf32> to vector<256x4xbf16>
    %c0_3 = arith.constant 0 : index
    %c0_4 = arith.constant 0 : index
    %4 = vector.load %arg2[%c0_3, %c0_4] : memref<4x4xbf16, #tpu.memory_space<vmem>>, vector<4x4xbf16>
    %cst = arith.constant dense<0.000000e+00> : vector<256x4xf32>
    %5 = tpu.matmul %3, %4, %cst {dimension_numbers = #tpu.dot_dimension_numbers<[1], [0], [0], [1], [0, 0, 1, 1], [], []>} : vector<256x4xbf16>, vector<4x4xbf16>, vector<256x4xf32> -> vector<256x4xf32>
    %c0_5 = arith.constant 0 : index
    %c0_6 = arith.constant 0 : index
    %6 = vector.load %arg3[%c0_5, %c0_6] : memref<1x4xf32, #tpu.memory_space<vmem>>, vector<1x4xf32>
    %7 = vector.broadcast %6 : vector<1x4xf32> to vector<256x4xf32>
    %8 = arith.addf %5, %7 : vector<256x4xf32>
    %cst_7 = arith.constant 0.000000e+00 : f32
    %9 = vector.broadcast %cst_7 : f32 to vector<256x4xf32>
    %10 = arith.maximumf %8, %9 : vector<256x4xf32>
    %11 = arith.truncf %10 : vector<256x4xf32> to vector<256x4xbf16>
    %cst_8 = arith.constant 0.000000e+00 : bf16
    %12 = vector.broadcast %cst_8 : bf16 to vector<1x18x4xbf16>
    %cst_9 = arith.constant 0.000000e+00 : bf16
    %13 = vector.broadcast %cst_9 : bf16 to vector<18x1x4xbf16>
    %c0_10 = arith.constant 0 : index
    %c0_11 = arith.constant 0 : index
    %c0_12 = arith.constant 0 : index
    %14 = vector.load %arg7[%c0_10, %c0_11, %c0_12] : memref<18x18x4xbf16, #tpu.memory_space<vmem>>, vector<1x18x4xbf16>
    tpu.vector_store %arg7[%c0_10, %c0_11, %c0_12], %12 {strides = array<i32>} : memref<18x18x4xbf16, #tpu.memory_space<vmem>>, vector<1x18x4xbf16>,
    %c17 = arith.constant 17 : index
    %c0_13 = arith.constant 0 : index
    %c0_14 = arith.constant 0 : index
    %15 = vector.load %arg7[%c17, %c0_13, %c0_14] : memref<18x18x4xbf16, #tpu.memory_space<vmem>>, vector<1x18x4xbf16>
    tpu.vector_store %arg7[%c17, %c0_13, %c0_14], %12 {strides = array<i32>} : memref<18x18x4xbf16, #tpu.memory_space<vmem>>, vector<1x18x4xbf16>,
    %c0_15 = arith.constant 0 : index
    %c0_16 = arith.constant 0 : index
    %c0_17 = arith.constant 0 : index
    %16 = vector.load %arg7[%c0_15, %c0_16, %c0_17] : memref<18x18x4xbf16, #tpu.memory_space<vmem>>, vector<18x1x4xbf16>
    tpu.vector_store %arg7[%c0_15, %c0_16, %c0_17], %13 {strides = array<i32>} : memref<18x18x4xbf16, #tpu.memory_space<vmem>>, vector<18x1x4xbf16>,
    %c0_18 = arith.constant 0 : index
    %c17_19 = arith.constant 17 : index
    %c0_20 = arith.constant 0 : index
    %17 = vector.load %arg7[%c0_18, %c17_19, %c0_20] : memref<18x18x4xbf16, #tpu.memory_space<vmem>>, vector<18x1x4xbf16>
    tpu.vector_store %arg7[%c0_18, %c17_19, %c0_20], %13 {strides = array<i32>} : memref<18x18x4xbf16, #tpu.memory_space<vmem>>, vector<18x1x4xbf16>,
    %18 = vector.shape_cast %11 : vector<256x4xbf16> to vector<16x16x4xbf16>
    %c1 = arith.constant 1 : index
    %c1_21 = arith.constant 1 : index
    %c0_22 = arith.constant 0 : index
    %19 = vector.load %arg7[%c1, %c1_21, %c0_22] : memref<18x18x4xbf16, #tpu.memory_space<vmem>>, vector<16x16x4xbf16>
    tpu.vector_store %arg7[%c1, %c1_21, %c0_22], %18 {strides = array<i32>} : memref<18x18x4xbf16, #tpu.memory_space<vmem>>, vector<16x16x4xbf16>,
    %c0_23 = arith.constant 0 : index
    %c0_24 = arith.constant 0 : index
    %c0_25 = arith.constant 0 : index
    %20 = vector.load %arg7[%c0_23, %c0_24, %c0_25] : memref<18x18x4xbf16, #tpu.memory_space<vmem>>, vector<16x16x4xbf16>
    %21 = vector.shape_cast %20 : vector<16x16x4xbf16> to vector<256x4xbf16>
    %c0_26 = arith.constant 0 : index
    %c0_27 = arith.constant 0 : index
    %c0_28 = arith.constant 0 : index
    %22 = vector.load %arg4[%c0_26, %c0_27, %c0_28] : memref<9x4x4xbf16, #tpu.memory_space<vmem>>, vector<1x4x4xbf16>
    %23 = vector.shape_cast %22 : vector<1x4x4xbf16> to vector<4x4xbf16>
    %cst_29 = arith.constant dense<0.000000e+00> : vector<256x4xf32>
    %24 = tpu.matmul %21, %23, %cst_29 {dimension_numbers = #tpu.dot_dimension_numbers<[1], [0], [0], [1], [0, 0, 1, 1], [], []>} : vector<256x4xbf16>, vector<4x4xbf16>, vector<256x4xf32> -> vector<256x4xf32>
    %c0_30 = arith.constant 0 : index
    %c0_31 = arith.constant 0 : index
    %25 = vector.load %arg8[%c0_30, %c0_31] : memref<256x4xf32, #tpu.memory_space<vmem>>, vector<256x4xf32>
    tpu.vector_store %arg8[%c0_30, %c0_31], %24 {strides = array<i32>} : memref<256x4xf32, #tpu.memory_space<vmem>>, vector<256x4xf32>,
    %c0_32 = arith.constant 0 : index
    %c1_33 = arith.constant 1 : index
    %c0_34 = arith.constant 0 : index
    %26 = vector.load %arg7[%c0_32, %c1_33, %c0_34] : memref<18x18x4xbf16, #tpu.memory_space<vmem>>, vector<16x16x4xbf16>
    %27 = vector.shape_cast %26 : vector<16x16x4xbf16> to vector<256x4xbf16>
    %c1_35 = arith.constant 1 : index
    %c0_36 = arith.constant 0 : index
    %c0_37 = arith.constant 0 : index
    %28 = vector.load %arg4[%c1_35, %c0_36, %c0_37] : memref<9x4x4xbf16, #tpu.memory_space<vmem>>, vector<1x4x4xbf16>
    %29 = vector.shape_cast %28 : vector<1x4x4xbf16> to vector<4x4xbf16>
    %cst_38 = arith.constant dense<0.000000e+00> : vector<256x4xf32>
    %30 = tpu.matmul %27, %29, %cst_38 {dimension_numbers = #tpu.dot_dimension_numbers<[1], [0], [0], [1], [0, 0, 1, 1], [], []>} : vector<256x4xbf16>, vector<4x4xbf16>, vector<256x4xf32> -> vector<256x4xf32>
    %c0_39 = arith.constant 0 : index
    %c0_40 = arith.constant 0 : index
    %31 = vector.load %arg8[%c0_39, %c0_40] : memref<256x4xf32, #tpu.memory_space<vmem>>, vector<256x4xf32>
    %32 = arith.addf %31, %30 : vector<256x4xf32>
    %c0_41 = arith.constant 0 : index
    %c0_42 = arith.constant 0 : index
    %33 = vector.load %arg8[%c0_41, %c0_42] : memref<256x4xf32, #tpu.memory_space<vmem>>, vector<256x4xf32>
    tpu.vector_store %arg8[%c0_41, %c0_42], %32 {strides = array<i32>} : memref<256x4xf32, #tpu.memory_space<vmem>>, vector<256x4xf32>,
    %c0_43 = arith.constant 0 : index
    %c2 = arith.constant 2 : index
    %c0_44 = arith.constant 0 : index
    %34 = vector.load %arg7[%c0_43, %c2, %c0_44] : memref<18x18x4xbf16, #tpu.memory_space<vmem>>, vector<16x16x4xbf16>
    %35 = vector.shape_cast %34 : vector<16x16x4xbf16> to vector<256x4xbf16>
    %c2_45 = arith.constant 2 : index
    %c0_46 = arith.constant 0 : index
    %c0_47 = arith.constant 0 : index
    %36 = vector.load %arg4[%c2_45, %c0_46, %c0_47] : memref<9x4x4xbf16, #tpu.memory_space<vmem>>, vector<1x4x4xbf16>
    %37 = vector.shape_cast %36 : vector<1x4x4xbf16> to vector<4x4xbf16>
    %cst_48 = arith.constant dense<0.000000e+00> : vector<256x4xf32>
    %38 = tpu.matmul %35, %37, %cst_48 {dimension_numbers = #tpu.dot_dimension_numbers<[1], [0], [0], [1], [0, 0, 1, 1], [], []>} : vector<256x4xbf16>, vector<4x4xbf16>, vector<256x4xf32> -> vector<256x4xf32>
    %c0_49 = arith.constant 0 : index
    %c0_50 = arith.constant 0 : index
    %39 = vector.load %arg8[%c0_49, %c0_50] : memref<256x4xf32, #tpu.memory_space<vmem>>, vector<256x4xf32>
    %40 = arith.addf %39, %38 : vector<256x4xf32>
    %c0_51 = arith.constant 0 : index
    %c0_52 = arith.constant 0 : index
    %41 = vector.load %arg8[%c0_51, %c0_52] : memref<256x4xf32, #tpu.memory_space<vmem>>, vector<256x4xf32>
    tpu.vector_store %arg8[%c0_51, %c0_52], %40 {strides = array<i32>} : memref<256x4xf32, #tpu.memory_space<vmem>>, vector<256x4xf32>,
    %c1_53 = arith.constant 1 : index
    %c0_54 = arith.constant 0 : index
    %c0_55 = arith.constant 0 : index
    %42 = vector.load %arg7[%c1_53, %c0_54, %c0_55] : memref<18x18x4xbf16, #tpu.memory_space<vmem>>, vector<16x16x4xbf16>
    %43 = vector.shape_cast %42 : vector<16x16x4xbf16> to vector<256x4xbf16>
    %c3 = arith.constant 3 : index
    %c0_56 = arith.constant 0 : index
    %c0_57 = arith.constant 0 : index
    %44 = vector.load %arg4[%c3, %c0_56, %c0_57] : memref<9x4x4xbf16, #tpu.memory_space<vmem>>, vector<1x4x4xbf16>
    %45 = vector.shape_cast %44 : vector<1x4x4xbf16> to vector<4x4xbf16>
    %cst_58 = arith.constant dense<0.000000e+00> : vector<256x4xf32>
    %46 = tpu.matmul %43, %45, %cst_58 {dimension_numbers = #tpu.dot_dimension_numbers<[1], [0], [0], [1], [0, 0, 1, 1], [], []>} : vector<256x4xbf16>, vector<4x4xbf16>, vector<256x4xf32> -> vector<256x4xf32>
    %c0_59 = arith.constant 0 : index
    %c0_60 = arith.constant 0 : index
    %47 = vector.load %arg8[%c0_59, %c0_60] : memref<256x4xf32, #tpu.memory_space<vmem>>, vector<256x4xf32>
    %48 = arith.addf %47, %46 : vector<256x4xf32>
    %c0_61 = arith.constant 0 : index
    %c0_62 = arith.constant 0 : index
    %49 = vector.load %arg8[%c0_61, %c0_62] : memref<256x4xf32, #tpu.memory_space<vmem>>, vector<256x4xf32>
    tpu.vector_store %arg8[%c0_61, %c0_62], %48 {strides = array<i32>} : memref<256x4xf32, #tpu.memory_space<vmem>>, vector<256x4xf32>,
    %c1_63 = arith.constant 1 : index
    %c1_64 = arith.constant 1 : index
    %c0_65 = arith.constant 0 : index
    %50 = vector.load %arg7[%c1_63, %c1_64, %c0_65] : memref<18x18x4xbf16, #tpu.memory_space<vmem>>, vector<16x16x4xbf16>
    %51 = vector.shape_cast %50 : vector<16x16x4xbf16> to vector<256x4xbf16>
    %c4 = arith.constant 4 : index
    %c0_66 = arith.constant 0 : index
    %c0_67 = arith.constant 0 : index
    %52 = vector.load %arg4[%c4, %c0_66, %c0_67] : memref<9x4x4xbf16, #tpu.memory_space<vmem>>, vector<1x4x4xbf16>
    %53 = vector.shape_cast %52 : vector<1x4x4xbf16> to vector<4x4xbf16>
    %cst_68 = arith.constant dense<0.000000e+00> : vector<256x4xf32>
    %54 = tpu.matmul %51, %53, %cst_68 {dimension_numbers = #tpu.dot_dimension_numbers<[1], [0], [0], [1], [0, 0, 1, 1], [], []>} : vector<256x4xbf16>, vector<4x4xbf16>, vector<256x4xf32> -> vector<256x4xf32>
    %c0_69 = arith.constant 0 : index
    %c0_70 = arith.constant 0 : index
    %55 = vector.load %arg8[%c0_69, %c0_70] : memref<256x4xf32, #tpu.memory_space<vmem>>, vector<256x4xf32>
    %56 = arith.addf %55, %54 : vector<256x4xf32>
    %c0_71 = arith.constant 0 : index
    %c0_72 = arith.constant 0 : index
    %57 = vector.load %arg8[%c0_71, %c0_72] : memref<256x4xf32, #tpu.memory_space<vmem>>, vector<256x4xf32>
    tpu.vector_store %arg8[%c0_71, %c0_72], %56 {strides = array<i32>} : memref<256x4xf32, #tpu.memory_space<vmem>>, vector<256x4xf32>,
    %c1_73 = arith.constant 1 : index
    %c2_74 = arith.constant 2 : index
    %c0_75 = arith.constant 0 : index
    %58 = vector.load %arg7[%c1_73, %c2_74, %c0_75] : memref<18x18x4xbf16, #tpu.memory_space<vmem>>, vector<16x16x4xbf16>
    %59 = vector.shape_cast %58 : vector<16x16x4xbf16> to vector<256x4xbf16>
    %c5 = arith.constant 5 : index
    %c0_76 = arith.constant 0 : index
    %c0_77 = arith.constant 0 : index
    %60 = vector.load %arg4[%c5, %c0_76, %c0_77] : memref<9x4x4xbf16, #tpu.memory_space<vmem>>, vector<1x4x4xbf16>
    %61 = vector.shape_cast %60 : vector<1x4x4xbf16> to vector<4x4xbf16>
    %cst_78 = arith.constant dense<0.000000e+00> : vector<256x4xf32>
    %62 = tpu.matmul %59, %61, %cst_78 {dimension_numbers = #tpu.dot_dimension_numbers<[1], [0], [0], [1], [0, 0, 1, 1], [], []>} : vector<256x4xbf16>, vector<4x4xbf16>, vector<256x4xf32> -> vector<256x4xf32>
    %c0_79 = arith.constant 0 : index
    %c0_80 = arith.constant 0 : index
    %63 = vector.load %arg8[%c0_79, %c0_80] : memref<256x4xf32, #tpu.memory_space<vmem>>, vector<256x4xf32>
    %64 = arith.addf %63, %62 : vector<256x4xf32>
    %c0_81 = arith.constant 0 : index
    %c0_82 = arith.constant 0 : index
    %65 = vector.load %arg8[%c0_81, %c0_82] : memref<256x4xf32, #tpu.memory_space<vmem>>, vector<256x4xf32>
    tpu.vector_store %arg8[%c0_81, %c0_82], %64 {strides = array<i32>} : memref<256x4xf32, #tpu.memory_space<vmem>>, vector<256x4xf32>,
    %c2_83 = arith.constant 2 : index
    %c0_84 = arith.constant 0 : index
    %c0_85 = arith.constant 0 : index
    %66 = vector.load %arg7[%c2_83, %c0_84, %c0_85] : memref<18x18x4xbf16, #tpu.memory_space<vmem>>, vector<16x16x4xbf16>
    %67 = vector.shape_cast %66 : vector<16x16x4xbf16> to vector<256x4xbf16>
    %c6 = arith.constant 6 : index
    %c0_86 = arith.constant 0 : index
    %c0_87 = arith.constant 0 : index
    %68 = vector.load %arg4[%c6, %c0_86, %c0_87] : memref<9x4x4xbf16, #tpu.memory_space<vmem>>, vector<1x4x4xbf16>
    %69 = vector.shape_cast %68 : vector<1x4x4xbf16> to vector<4x4xbf16>
    %cst_88 = arith.constant dense<0.000000e+00> : vector<256x4xf32>
    %70 = tpu.matmul %67, %69, %cst_88 {dimension_numbers = #tpu.dot_dimension_numbers<[1], [0], [0], [1], [0, 0, 1, 1], [], []>} : vector<256x4xbf16>, vector<4x4xbf16>, vector<256x4xf32> -> vector<256x4xf32>
    %c0_89 = arith.constant 0 : index
    %c0_90 = arith.constant 0 : index
    %71 = vector.load %arg8[%c0_89, %c0_90] : memref<256x4xf32, #tpu.memory_space<vmem>>, vector<256x4xf32>
    %72 = arith.addf %71, %70 : vector<256x4xf32>
    %c0_91 = arith.constant 0 : index
    %c0_92 = arith.constant 0 : index
    %73 = vector.load %arg8[%c0_91, %c0_92] : memref<256x4xf32, #tpu.memory_space<vmem>>, vector<256x4xf32>
    tpu.vector_store %arg8[%c0_91, %c0_92], %72 {strides = array<i32>} : memref<256x4xf32, #tpu.memory_space<vmem>>, vector<256x4xf32>,
    %c2_93 = arith.constant 2 : index
    %c1_94 = arith.constant 1 : index
    %c0_95 = arith.constant 0 : index
    %74 = vector.load %arg7[%c2_93, %c1_94, %c0_95] : memref<18x18x4xbf16, #tpu.memory_space<vmem>>, vector<16x16x4xbf16>
    %75 = vector.shape_cast %74 : vector<16x16x4xbf16> to vector<256x4xbf16>
    %c7 = arith.constant 7 : index
    %c0_96 = arith.constant 0 : index
    %c0_97 = arith.constant 0 : index
    %76 = vector.load %arg4[%c7, %c0_96, %c0_97] : memref<9x4x4xbf16, #tpu.memory_space<vmem>>, vector<1x4x4xbf16>
    %77 = vector.shape_cast %76 : vector<1x4x4xbf16> to vector<4x4xbf16>
    %cst_98 = arith.constant dense<0.000000e+00> : vector<256x4xf32>
    %78 = tpu.matmul %75, %77, %cst_98 {dimension_numbers = #tpu.dot_dimension_numbers<[1], [0], [0], [1], [0, 0, 1, 1], [], []>} : vector<256x4xbf16>, vector<4x4xbf16>, vector<256x4xf32> -> vector<256x4xf32>
    %c0_99 = arith.constant 0 : index
    %c0_100 = arith.constant 0 : index
    %79 = vector.load %arg8[%c0_99, %c0_100] : memref<256x4xf32, #tpu.memory_space<vmem>>, vector<256x4xf32>
    %80 = arith.addf %79, %78 : vector<256x4xf32>
    %c0_101 = arith.constant 0 : index
    %c0_102 = arith.constant 0 : index
    %81 = vector.load %arg8[%c0_101, %c0_102] : memref<256x4xf32, #tpu.memory_space<vmem>>, vector<256x4xf32>
    tpu.vector_store %arg8[%c0_101, %c0_102], %80 {strides = array<i32>} : memref<256x4xf32, #tpu.memory_space<vmem>>, vector<256x4xf32>,
    %c2_103 = arith.constant 2 : index
    %c2_104 = arith.constant 2 : index
    %c0_105 = arith.constant 0 : index
    %82 = vector.load %arg7[%c2_103, %c2_104, %c0_105] : memref<18x18x4xbf16, #tpu.memory_space<vmem>>, vector<16x16x4xbf16>
    %83 = vector.shape_cast %82 : vector<16x16x4xbf16> to vector<256x4xbf16>
    %c8 = arith.constant 8 : index
    %c0_106 = arith.constant 0 : index
    %c0_107 = arith.constant 0 : index
    %84 = vector.load %arg4[%c8, %c0_106, %c0_107] : memref<9x4x4xbf16, #tpu.memory_space<vmem>>, vector<1x4x4xbf16>
    %85 = vector.shape_cast %84 : vector<1x4x4xbf16> to vector<4x4xbf16>
    %cst_108 = arith.constant dense<0.000000e+00> : vector<256x4xf32>
    %86 = tpu.matmul %83, %85, %cst_108 {dimension_numbers = #tpu.dot_dimension_numbers<[1], [0], [0], [1], [0, 0, 1, 1], [], []>} : vector<256x4xbf16>, vector<4x4xbf16>, vector<256x4xf32> -> vector<256x4xf32>
    %c0_109 = arith.constant 0 : index
    %c0_110 = arith.constant 0 : index
    %87 = vector.load %arg8[%c0_109, %c0_110] : memref<256x4xf32, #tpu.memory_space<vmem>>, vector<256x4xf32>
    %88 = arith.addf %87, %86 : vector<256x4xf32>
    %c0_111 = arith.constant 0 : index
    %c0_112 = arith.constant 0 : index
    %89 = vector.load %arg8[%c0_111, %c0_112] : memref<256x4xf32, #tpu.memory_space<vmem>>, vector<256x4xf32>
    tpu.vector_store %arg8[%c0_111, %c0_112], %88 {strides = array<i32>} : memref<256x4xf32, #tpu.memory_space<vmem>>, vector<256x4xf32>,
    %c0_113 = arith.constant 0 : index
    %c0_114 = arith.constant 0 : index
    %90 = vector.load %arg8[%c0_113, %c0_114] : memref<256x4xf32, #tpu.memory_space<vmem>>, vector<256x4xf32>
    %c0_115 = arith.constant 0 : index
    %c0_116 = arith.constant 0 : index
    %91 = vector.load %arg5[%c0_115, %c0_116] : memref<1x4xf32, #tpu.memory_space<vmem>>, vector<1x4xf32>
    %92 = vector.broadcast %91 : vector<1x4xf32> to vector<256x4xf32>
    %93 = arith.addf %90, %92 : vector<256x4xf32>
    %cst_117 = arith.constant 0.000000e+00 : f32
    %94 = vector.broadcast %cst_117 : f32 to vector<256x4xf32>
    %95 = arith.maximumf %93, %94 : vector<256x4xf32>
    %96 = arith.truncf %95 : vector<256x4xf32> to vector<256x4xbf16>
    %c0_118 = arith.constant 0 : index
    %c0_119 = arith.constant 0 : index
    %c0_120 = arith.constant 0 : index
    %97 = vector.load %arg6[%c0_118, %c0_119, %c0_120] : memref<1x256x4xbf16, #tpu.memory_space<vmem>>, vector<1x256x4xbf16>
    %98 = vector.shape_cast %97 : vector<1x256x4xbf16> to vector<256x4xbf16>
    %99 = vector.shape_cast %96 : vector<256x4xbf16> to vector<1x256x4xbf16>
    tpu.vector_store %arg6[%c0_118, %c0_119, %c0_120], %99 {strides = array<i32>} : memref<1x256x4xbf16, #tpu.memory_space<vmem>>, vector<1x256x4xbf16>,
    return
  }
  func.func @transform_0(%arg0: i32) -> (i32, i32, i32, i32) {
    %c0_i32 = arith.constant 0 : i32
    %c0_i32_0 = arith.constant 0 : i32
    %c0_i32_1 = arith.constant 0 : i32
    %c0_i32_2 = arith.constant 0 : i32
    return %arg0, %c0_i32, %c0_i32_0, %c0_i32_1 : i32, i32, i32, i32
  }
  func.func @transform_1(%arg0: i32) -> (i32, i32) {
    %c0_i32 = arith.constant 0 : i32
    %c0_i32_0 = arith.constant 0 : i32
    %c0_i32_1 = arith.constant 0 : i32
    return %c0_i32, %c0_i32_0 : i32, i32
  }
  func.func @transform_2(%arg0: i32) -> (i32, i32) {
    %c0_i32 = arith.constant 0 : i32
    %c0_i32_0 = arith.constant 0 : i32
    %c0_i32_1 = arith.constant 0 : i32
    return %c0_i32, %c0_i32_0 : i32, i32
  }
  func.func @transform_3(%arg0: i32) -> (i32, i32, i32) {
    %c0_i32 = arith.constant 0 : i32
    %c0_i32_0 = arith.constant 0 : i32
    %c0_i32_1 = arith.constant 0 : i32
    %c0_i32_2 = arith.constant 0 : i32
    return %c0_i32, %c0_i32_0, %c0_i32_1 : i32, i32, i32
  }
  func.func @transform_4(%arg0: i32) -> (i32, i32) {
    %c0_i32 = arith.constant 0 : i32
    %c0_i32_0 = arith.constant 0 : i32
    %c0_i32_1 = arith.constant 0 : i32
    return %c0_i32, %c0_i32_0 : i32, i32
  }
  func.func @transform_5(%arg0: i32) -> (i32, i32, i32) {
    %c0_i32 = arith.constant 0 : i32
    %c0_i32_0 = arith.constant 0 : i32
    %c0_i32_1 = arith.constant 0 : i32
    return %arg0, %c0_i32, %c0_i32_0 : i32, i32, i32
  }
}

</mosaic_0001>

<bundles_post_ra>
// kernel: tpu_custom_call.1
= control target key start
LH: loop header
LB: loop body
LE: loop exit
PB: predicated region body
PF: predicated region fallthrough
CT: control target
= control target key end

     0   :  { %s7898_s18 = smov 0   ;;  %s9602_s0 = inlined_call_operand.vmem [shape: f32[2,16,16,4], index: 0, kind: input, shape index: {}]   ;;  %s9603_s1 = inlined_call_operand.vmem [shape: bf16[4,4], index: 1, kind: input, shape index: {}]   ;;  %s9604_s2 = inlined_call_operand.vmem [shape: f32[1,4], index: 2, kind: input, shape index: {}]   ;;  %s9605_s3 = inlined_call_operand.vmem [shape: bf16[9,4,4], index: 3, kind: input, shape index: {}]   ;;  %s9606_s4 = inlined_call_operand.vmem [shape: f32[1,4], index: 4, kind: input, shape index: {}]   ;;  %s9607_s5 = inlined_call_operand.vmem [shape: bf16[2,256,4], index: 5, kind: output, shape index: {}]  }
   0x1 LB: > { %s6777_s19 = sadd.s32 4294967295, %s7865_s18   ;;  %p6781_p0 = scmp.ge.s32.totalorder %s7865_s18, 1  ;;  %s7865_s18 = sphi %s7898_s18, %s15_s18  }
   0x2   : > { %p187_p1 = scmp.lt.s32.totalorder %s7865_s18, 3 }
   0x4   : > { %p188_p2 = pnand %p6781_p0, %p187_p1 }
   0x5   : > { %v274_v0 = vld [vmem:[%s9603_s1] sm:$0x3] (!%p188_p2)  ;;  %vm331_vm0 = vcmask (!%p188_p2), 1041408   ;;  %p215_p3 = scmp.lt.s32.totalorder (!%p188_p2), %s6777_s19, 1  ;;  %vm282_vm1 = vcmask (!%p188_p2), 31744   ;;  %vm547_vm2 = vcmask (!%p188_p2), 24576  }
   0x6   : > { %191 = sbr.rel (%p188_p2) target bundleno = 866 (0x362), region = 40  ;;  %7790 = vmatprep.subr.msk.bf16.mxu0 (!%p188_p2), %vm331_vm0, %v274_v0  ;;  %v333_v1 = vsel (!%p188_p2), %vm331_vm0, %v274_v0, 0  ;;  %vm554_vm3 = vsmask.f32 (!%p188_p2), 256  ;;  %v562_v51 = vld [vmem:[#allocation2 + $0x18] sm:$0x1] (!%p188_p2) }
   0x7   : > { %7451 = vmatpush3.bf16.msra.mxu0 (!%p188_p2), %v333_v1  ;;  %vm7969_vm4 = vmand (!%p188_p2), %vm547_vm2, %vm554_vm3  ;;  %vm610_vm5 = vsmask.f32 (!%p188_p2), 7938  ;;  %v559_v54 = vld [vmem:[#allocation2 + $0xc] sm:$0x1] (!%p188_p2)  ;;  %v618_v56 = vld [vmem:[#allocation2 + $0x20] sm:$0x1] (!%p188_p2) }
   0x8   : > { %v563_v52 = vsel (!%p188_p2), %vm7969_vm4, 0, %v562_v51  ;;  %vm7977_vm6 = vmand (!%p188_p2), %vm547_vm2, %vm610_vm5  ;;  %v560_v55 = vsel (!%p188_p2), %vm7969_vm4, 0, %v559_v54  ;;  %v615_v58 = vld [vmem:[#allocation2 + $0x14] sm:$0x1] (!%p188_p2)  ;;  %vm544_vm7 = vcmask (!%p188_p2), 27648   ;;  %v7867_v0 = vmov (!%p188_p2), 0  }
   0x9   : > { %564 = vst [vmem:[#allocation2 + $0x18] sm:$0x1] (!%p188_p2), %v563_v52  ;;  %561 = vst [vmem:[#allocation2 + $0xc] sm:$0x1] (!%p188_p2), %v560_v55  ;;  %v619_v57 = vsel (!%p188_p2), %vm7977_vm6, 0, %v618_v56  ;;  %v616_v59 = vsel (!%p188_p2), %vm7977_vm6, 0, %v615_v58 }
   0xa   : > { %620 = vst [vmem:[#allocation2 + $0x20] sm:$0x1] (!%p188_p2), %v619_v57  ;;  %617 = vst [vmem:[#allocation2 + $0x14] sm:$0x1] (!%p188_p2), %v616_v59  ;;  %v568_v60 = vld [vmem:[#allocation2 + $0x30] sm:$0x1] (!%p188_p2) }
   0xb   : > { %v569_v61 = vsel (!%p188_p2), %vm7969_vm4, 0, %v568_v60  ;;  %v565_v62 = vld [vmem:[#allocation2 + $0x24] sm:$0x1] (!%p188_p2)  ;;  %545 = vst.msk [vmem:[#allocation2] sm:$0xf] (!%p188_p2), %vm544_vm7, %v7867_v0  ;;  %vm8092_vm12 = vmand (!%p188_p2), %vm544_vm7, %vm610_vm5  ;;  %vm2429_vm14 = vcmask (!%p188_p2), 1042432  }
   0xc   : > { %570 = vst [vmem:[#allocation2 + $0x30] sm:$0x1] (!%p188_p2), %v569_v61  ;;  %v566_v63 = vsel (!%p188_p2), %vm7969_vm4, 0, %v565_v62  ;;  %546 = vst.msk [vmem:[#allocation2 + $0x4] sm:$0xf] (!%p188_p2), %vm544_vm7, %v7867_v0  ;;  %vm2430_vm15 = vcmask (!%p188_p2), 1046532  }
   0xd   : > { %s9621_s19 = smov (!%p215_p3, %s6777_s19), 1  ;;  %567 = vst [vmem:[#allocation2 + $0x24] sm:$0x1] %v566_v63  ;;  %548 = vst.msk [vmem:[#allocation2 + $0x8] sm:$0x1] %vm547_vm2, %v7867_v0 }
   0xe   : > { %s7214_s22 = sshll.u32 %s9621_s19, 8  ;;  %550 = vst.msk [vmem:[#allocation2 + $0xcc] sm:$0xf] %vm544_vm7, %v7867_v0  ;;  %551 = vst.msk [vmem:[#allocation2 + $0xd0] sm:$0xf] %vm544_vm7, %v7867_v0  ;;  %s7215_s29 = sshll.u32 %s9621_s19, 7 }
   0xf   : > { %s7917_s25 = scalar_lea.vmem %s9602_s0, %s7214_s22  ;;  %552 = vst.msk [vmem:[#allocation2 + $0xd4] sm:$0x1] %vm547_vm2, %v7867_v0  ;;  %v624_v1 = vld [vmem:[#allocation2 + $0x38] sm:$0x1]  ;;  %vm1588_vm8 = vsmask.f32 3328  ;;  %vm8403_vm2 = vmor %vm2429_vm14, %vm2430_vm15  ;;  %s9475_s6 = scalar_lea.vmem %s9607_s5, %s7215_s29 }
  0x10   : > { %v226_v2 = vld [vmem:[%s7917_s25] sm:$0xff]  ;;  %v227_v3 = vld [vmem:[%s7917_s25 + $0x8] sm:$0xff]  ;;  %v228_v4 = vld [vmem:[%s7917_s25 + $0x10] sm:$0xff]  ;;  %vm1589_vm9 = vsmask.f32 7440 }
  0x11   : > { %v258_v5 = vpack.c.bf16 %v227_v3, %v226_v2  ;;  %v229_v6 = vld [vmem:[%s7917_s25 + $0x18] sm:$0xff]  ;;  %v230_v7 = vld [vmem:[%s7917_s25 + $0x20] sm:$0xff]  ;;  %v231_v8 = vld [vmem:[%s7917_s25 + $0x28] sm:$0xff]  ;;  %v625_v2 = vsel %vm7977_vm6, 0, %v624_v1  ;;  %vm746_vm11 = vsmask.f32 4368 }
  0x12   : > { %v259_v9 = vpack.c.bf16 %v229_v6, %v228_v4  ;;  %v260_v10 = vpack.c.bf16 %v231_v8, %v230_v7  ;;  %v232_v11 = vld [vmem:[%s7917_s25 + $0x30] sm:$0xff]  ;;  %v233_v12 = vld [vmem:[%s7917_s25 + $0x38] sm:$0xff]  ;;  %v234_v13 = vld [vmem:[%s7917_s25 + $0x40] sm:$0xff]  ;;  %626 = vst [vmem:[#allocation2 + $0x38] sm:$0x1] %v625_v2 }
  0x13   : > { %7452 = vmatprep.mubr.msk.bf16.mxu0 %vm282_vm1, %v258_v5  ;;  %v235_v14 = vld [vmem:[%s7917_s25 + $0x48] sm:$0xff]  ;;  %v261_v15 = vpack.c.bf16 %v233_v12, %v232_v11  ;;  %v236_v17 = vld [vmem:[%s7917_s25 + $0x50] sm:$0xff]  ;;  %v237_v18 = vld [vmem:[%s7917_s25 + $0x58] sm:$0xff] }
  0x14   : > { %7453 = vmatmul.mubr.msk.bf16.vlgmr.msra.gmra.mrb[0].mxu0 %vm282_vm1, %v259_v9  ;;  %v262_v16 = vpack.c.bf16 %v235_v14, %v234_v13  ;;  %v238_v19 = vld [vmem:[%s7917_s25 + $0x60] sm:$0xff]  ;;  %v239_v20 = vld [vmem:[%s7917_s25 + $0x68] sm:$0xff]  ;;  %v263_v21 = vpack.c.bf16 %v237_v18, %v236_v17  ;;  %v240_v23 = vld [vmem:[%s7917_s25 + $0x70] sm:$0xff] }
  0x15   : > { %7456 = vmatprep.mubr.msk.bf16.mxu0 %vm282_vm1, %v260_v10  ;;  %v264_v22 = vpack.c.bf16 %v239_v20, %v238_v19  ;;  %v241_v24 = vld [vmem:[%s7917_s25 + $0x78] sm:$0xff]  ;;  %v242_v25 = vld [vmem:[%s7917_s25 + $0x80] sm:$0xff]  ;;  %v243_v26 = vld [vmem:[%s7917_s25 + $0x88] sm:$0xff] }
  0x16   : > { %v265_v27 = vpack.c.bf16 %v241_v24, %v240_v23  ;;  %v266_v28 = vpack.c.bf16 %v243_v26, %v242_v25  ;;  %v244_v29 = vld [vmem:[%s7917_s25 + $0x90] sm:$0xff]  ;;  %v245_v30 = vld [vmem:[%s7917_s25 + $0x98] sm:$0xff]  ;;  %v246_v31 = vld [vmem:[%s7917_s25 + $0xa0] sm:$0xff] }
  0x17   : > { %v247_v32 = vld [vmem:[%s7917_s25 + $0xa8] sm:$0xff]  ;;  %v267_v33 = vpack.c.bf16 %v245_v30, %v244_v29  ;;  %v248_v35 = vld [vmem:[%s7917_s25 + $0xb0] sm:$0xff]  ;;  %v249_v36 = vld [vmem:[%s7917_s25 + $0xb8] sm:$0xff] }
  0x18   : > { %v268_v34 = vpack.c.bf16 %v247_v32, %v246_v31  ;;  %v250_v37 = vld [vmem:[%s7917_s25 + $0xc0] sm:$0xff]  ;;  %v251_v38 = vld [vmem:[%s7917_s25 + $0xc8] sm:$0xff]  ;;  %v269_v39 = vpack.c.bf16 %v249_v36, %v248_v35  ;;  %v252_v41 = vld [vmem:[%s7917_s25 + $0xd0] sm:$0xff] }
  0x19   : > { %v270_v40 = vpack.c.bf16 %v251_v38, %v250_v37  ;;  %v253_v42 = vld [vmem:[%s7917_s25 + $0xd8] sm:$0xff]  ;;  %v254_v43 = vld [vmem:[%s7917_s25 + $0xe0] sm:$0xff]  ;;  %v255_v44 = vld [vmem:[%s7917_s25 + $0xe8] sm:$0xff] }
  0x1a   : > { %v271_v45 = vpack.c.bf16 %v253_v42, %v252_v41  ;;  %v272_v46 = vpack.c.bf16 %v255_v44, %v254_v43  ;;  %v256_v47 = vld [vmem:[%s7917_s25 + $0xf0] sm:$0xff]  ;;  %v257_v48 = vld [vmem:[%s7917_s25 + $0xf8] sm:$0xff]  ;;  %v621_v3 = vld [vmem:[#allocation2 + $0x2c] sm:$0x1] }
  0x1b   : > { %v273_v49 = vpack.c.bf16 %v257_v48, %v256_v47  ;;  %v622_v4 = vsel %vm7977_vm6, 0, %v621_v3  ;;  %v556_v5 = vld [vmem:[#allocation2] sm:$0x1]  ;;  %v574_v7 = vld [vmem:[#allocation2 + $0x48] sm:$0x1]  ;;  %vm8034_vm10 = vmor %vm1588_vm8, %vm1589_vm9 }
  0x1c   : > { %7457 = vmatmul.mubr.msk.bf16.gmra.mrb[4].mxu0 %vm282_vm1, %v261_v15  ;;  %623 = vst [vmem:[#allocation2 + $0x2c] sm:$0x1] %v622_v4  ;;  %v557_v6 = vsel %vm7969_vm4, 0, %v556_v5  ;;  %v575_v8 = vsel %vm7969_vm4, 0, %v574_v7  ;;  %v571_v9 = vld [vmem:[#allocation2 + $0x3c] sm:$0x1]  ;;  %vm8103_vm13 = vmor %vm554_vm3, %vm746_vm11 }
  0x1d   : > { %7460 = vmatprep.mubr.msk.bf16.mxu0 %vm282_vm1, %v262_v16  ;;  %558 = vst [vmem:[#allocation2] sm:$0x1] %v557_v6  ;;  %576 = vst [vmem:[#allocation2 + $0x48] sm:$0x1] %v575_v8  ;;  %v572_v10 = vsel %vm7969_vm4, 0, %v571_v9 }
  0x1e   : > { %v630_v11 = vld [vmem:[#allocation2 + $0x50] sm:$0x1]  ;;  %573 = vst [vmem:[#allocation2 + $0x3c] sm:$0x1] %v572_v10  ;;  %v1215_v13 = vld [vmem:[%s9605_s3] sm:$0x3] }
  0x1f   : > { %v631_v12 = vsel %vm7977_vm6, 0, %v630_v11  ;;  %v627_v14 = vld [vmem:[#allocation2 + $0x44] sm:$0x1]  ;;  %7791 = vmatprep.subr.msk.bf16.mxu1 %vm331_vm0, %v1215_v13  ;;  %v1345_v15 = vsel %vm331_vm0, %v1215_v13, 0  ;;  %v612_v18 = vld [vmem:[#allocation2 + $0x8] sm:$0x1] }
  0x20   : > { %632 = vst [vmem:[#allocation2 + $0x50] sm:$0x1] %v631_v12  ;;  %v628_v16 = vsel %vm7977_vm6, 0, %v627_v14  ;;  %7485 = vmatpush3.bf16.msra.mxu1 %v1345_v15  ;;  %v6867_v19 = vld [vmem:[%s9605_s3 + $0x2] sm:$0x3]  ;;  %v613_v20 = vsel %vm7977_vm6, 0, %v612_v18 }
  0x21   : > { %629 = vst [vmem:[#allocation2 + $0x44] sm:$0x1] %v628_v16  ;;  %7792 = vmatprep.subr.msk.bf16.mxu0 %vm331_vm0, %v6867_v19  ;;  %614 = vst [vmem:[#allocation2 + $0x8] sm:$0x1] %v613_v20  ;;  %v577_v25 = vld [vmem:[#allocation2 + $0x54] sm:$0x1] }
  0x22   : > { %v1541_v29 = vld [vmem:[#allocation2 + $0x4] sm:$0xf]  ;;  %v633_v32 = vld [vmem:[#allocation2 + $0x5c] sm:$0x1]  ;;  %v586_v43 = vld [vmem:[#allocation2 + $0x78] sm:$0x1] }
  0x23   : > { %v1601_v36 = vshll.u32 %v1541_v29, 16  ;;  %v1605_v37 = vshrl.u32 %v1541_v29, 16  ;;  %v587_v47 = vsel %vm7969_vm4, 0, %v586_v43  ;;  %v583_v48 = vld [vmem:[#allocation2 + $0x6c] sm:$0x1] }
  0x24   : > { %7461 = vmatmul.mubr.msk.bf16.gmra.mrb[8].mxu0 %vm282_vm1, %v263_v21  ;;  %v7809_v17 = vld [vmem:[#allocation2] sm:$0xff]   ;;  %v2074_v21 = vsel %vm331_vm0, %v6867_v19, 0  ;;  %588 = vst [vmem:[#allocation2 + $0x78] sm:$0x1] %v587_v47  ;;  %v584_v51 = vsel %vm7969_vm4, 0, %v583_v48 }
  0x25   : > { %7464 = vmatprep.mubr.msk.bf16.mxu0 %vm282_vm1, %v264_v22  ;;  %7486 = vmatprep.mubr.msk.bf16.mxu1 %vm282_vm1, %v7809_v17  ;;  %v580_v22 = vld [vmem:[#allocation2 + $0x60] sm:$0x1]  ;;  %v1607_v41 = vrot.slane %v1605_v37, 4  ;;  %585 = vst [vmem:[#allocation2 + $0x6c] sm:$0x1] %v584_v51 }
  0x26   : > { %7519 = vmatpush3.bf16.msra.mxu0 %v2074_v21  ;;  %v1540_v23 = vld [vmem:[#allocation2] sm:$0xf]  ;;  %v581_v24 = vsel %vm7969_vm4, 0, %v580_v22  ;;  %v8047_v56 = vld [vmem:[%s9605_s3 + $0x4] sm:$0x3] }
  0x27   : > { %v1592_v26 = vshrl.u32 %v1540_v23, 16  ;;  %582 = vst [vmem:[#allocation2 + $0x60] sm:$0x1] %v581_v24  ;;  %v1595_v30 = vshll.u32 %v1540_v23, 16  ;;  %v642_v57 = vld [vmem:[#allocation2 + $0x80] sm:$0x1]  ;;  %7793 = vmatprep.subr.msk.bf16.mxu1 %vm331_vm0, %v8047_v56 }
  0x28   : > { %v1542_v38 = vld [vmem:[#allocation2 + $0x8] sm:$0x1]  ;;  %v643_v59 = vsel %vm7977_vm6, 0, %v642_v57  ;;  %v639_v60 = vld [vmem:[#allocation2 + $0x74] sm:$0x1] }
  0x29   : > { %v1597_v35 = vrot.slane %v1595_v30, 5  ;;  %v1611_v42 = vshll.u32 %v1542_v38, 16  ;;  %644 = vst [vmem:[#allocation2 + $0x80] sm:$0x1] %v643_v59  ;;  %v640_v61 = vsel %vm7977_vm6, 0, %v639_v60 }
  0x2a   : > { %641 = vst [vmem:[#allocation2 + $0x74] sm:$0x1] %v640_v61  ;;  %v592_v62 = vld [vmem:[#allocation2 + $0x90] sm:$0x1]  ;;  %v589_v0 = vld [vmem:[#allocation2 + $0x84] sm:$0x1] }
  0x2b   : > { %v593_v63 = vsel %vm7969_vm4, 0, %v592_v62  ;;  %v648_v1 = vld [vmem:[#allocation2 + $0x98] sm:$0x1]  ;;  %v590_v2 = vsel %vm7969_vm4, 0, %v589_v0  ;;  %v645_v4 = vld [vmem:[#allocation2 + $0x8c] sm:$0x1] }
  0x2c   : > { %7465 = vmatmul.mubr.msk.bf16.gmra.mrb[12].mxu0 %vm282_vm1, %v265_v27  ;;  %v578_v27 = vsel %vm7969_vm4, 0, %v577_v25  ;;  %594 = vst [vmem:[#allocation2 + $0x90] sm:$0x1] %v593_v63  ;;  %v649_v3 = vsel %vm7977_vm6, 0, %v648_v1  ;;  %591 = vst [vmem:[#allocation2 + $0x84] sm:$0x1] %v590_v2 }
  0x2d   : > { %7468 = vmatprep.mubr.msk.bf16.mxu0 %vm282_vm1, %v266_v28  ;;  %v636_v28 = vld [vmem:[#allocation2 + $0x68] sm:$0x1]  ;;  %579 = vst [vmem:[#allocation2 + $0x54] sm:$0x1] %v578_v27  ;;  %650 = vst [vmem:[#allocation2 + $0x98] sm:$0x1] %v649_v3 }
  0x2e   : > { %v637_v31 = vsel %vm7977_vm6, 0, %v636_v28  ;;  %v646_v5 = vsel %vm7977_vm6, 0, %v645_v4  ;;  %v598_v6 = vld [vmem:[#allocation2 + $0xa8] sm:$0x1]  ;;  %v595_v8 = vld [vmem:[#allocation2 + $0x9c] sm:$0x1] }
  0x2f   : > { %638 = vst [vmem:[#allocation2 + $0x68] sm:$0x1] %v637_v31  ;;  %647 = vst [vmem:[#allocation2 + $0x8c] sm:$0x1] %v646_v5  ;;  %v599_v7 = vsel %vm7969_vm4, 0, %v598_v6  ;;  %v596_v10 = vsel %vm7969_vm4, 0, %v595_v8 }
  0x30   : > { %600 = vst [vmem:[#allocation2 + $0xa8] sm:$0x1] %v599_v7  ;;  %v654_v9 = vld [vmem:[#allocation2 + $0xb0] sm:$0x1]  ;;  %597 = vst [vmem:[#allocation2 + $0x9c] sm:$0x1] %v596_v10 }
  0x31   : > { %v655_v11 = vsel %vm7977_vm6, 0, %v654_v9  ;;  %v651_v12 = vld [vmem:[#allocation2 + $0xa4] sm:$0x1]  ;;  %v604_v14 = vld [vmem:[#allocation2 + $0xc0] sm:$0x1] }
  0x32   : > { %656 = vst [vmem:[#allocation2 + $0xb0] sm:$0x1] %v655_v11  ;;  %v652_v13 = vsel %vm7977_vm6, 0, %v651_v12  ;;  %v605_v15 = vsel %vm7969_vm4, 0, %v604_v14  ;;  %v601_v16 = vld [vmem:[#allocation2 + $0xb4] sm:$0x1] }
  0x33   : > { %653 = vst [vmem:[#allocation2 + $0xa4] sm:$0x1] %v652_v13  ;;  %606 = vst [vmem:[#allocation2 + $0xc0] sm:$0x1] %v605_v15  ;;  %v602_v17 = vsel %vm7969_vm4, 0, %v601_v16 }
  0x34   : > { %7469 = vmatmul.mubr.msk.bf16.gmra.mrb[16].mxu0 %vm282_vm1, %v267_v33  ;;  %v1594_v33 = vrot.slane %v1592_v26, 4  ;;  %v660_v18 = vld [vmem:[#allocation2 + $0xc8] sm:$0x1]  ;;  %603 = vst [vmem:[#allocation2 + $0xb4] sm:$0x1] %v602_v17 }
  0x35   : > { %7472 = vmatprep.mubr.msk.bf16.mxu0 %vm282_vm1, %v268_v34  ;;  %v634_v34 = vsel %vm7977_vm6, 0, %v633_v32  ;;  %v661_v19 = vsel %vm7977_vm6, 0, %v660_v18  ;;  %v657_v20 = vld [vmem:[#allocation2 + $0xbc] sm:$0x1]  ;;  %v8083_v22 = vld [vmem:[%s9604_s2] ss:$0 sm:$0xff] }
  0x36   : > { %635 = vst [vmem:[#allocation2 + $0x5c] sm:$0x1] %v634_v34  ;;  %662 = vst [vmem:[#allocation2 + $0xc8] sm:$0x1] %v661_v19  ;;  %v658_v21 = vsel %vm7977_vm6, 0, %v657_v20 }
  0x37   : > { %659 = vst [vmem:[#allocation2 + $0xbc] sm:$0x1] %v658_v21  ;;  %v6949_v60 = vld [vmem:[%s9605_s3 + $0x6] sm:$0x3]  ;;  %v1071_v63 = vld [vmem:[#allocation2 + $0xc] sm:$0xf] }
  0x38   : > { %7794 = vmatprep.subr.msk.bf16.mxu0 %vm331_vm0, %v6949_v60  ;;  %v1082_v6 = vld [vmem:[#allocation2 + $0x20] sm:$0x1]  ;;  %v1075_v12 = vld [vmem:[#allocation2 + $0x14] sm:$0x1]  ;;  %v8117_v21 = vsel %vm331_vm0, %v8047_v56, 0 }
  0x3c   : > { %7473 = vmatmul.mubr.msk.bf16.gmra.mrb[20].mxu0 %vm282_vm1, %v269_v39  ;;  %v1598_v39 = vor.u32 %v1597_v35, %v1594_v33 }
  0x3d   : > { %7476 = vmatprep.mubr.msk.bf16.mxu0 %vm282_vm1, %v270_v40  ;;  %v1603_v40 = vrot.slane %v1601_v36, 5 }
  0x3e   : > { %v1599_v44 = vrot.slane %v1598_v39, 4 }
  0x40   : > { %v1604_v52 = vsel %vm8034_vm10, %v1599_v44, %v1603_v40 }
  0x44   : > { %7477 = vmatmul.mubr.msk.bf16.gmra.mrb[24].mxu0 %vm282_vm1, %v271_v45  ;;  %v1608_v45 = vor.u32 %v1607_v41, %v1603_v40 }
  0x45   : > { %7480 = vmatprep.mubr.msk.bf16.mxu0 %vm282_vm1, %v272_v46  ;;  %v1613_v46 = vrot.slane %v1611_v42, 5 }
  0x46   : > { %v1609_v54 = vrot.slane %v1608_v45, 4  ;;  %v1078_v45 = vld [vmem:[#allocation2 + $0x18] sm:$0xf] }
  0x48   : > { %v1614_v55 = vsel %vm8034_vm10, %v1609_v54, %v1613_v46 }
  0x49   : > { %v6868_v58 = vcombine.low %v1604_v52, %v1614_v55 }
  0x4c   : > { %7481 = vmatmul.mubr.msk.bf16.gmra.mrb[28].mxu0 %vm282_vm1, %v273_v49 }
  0x4d   : > { %7520 = vmatprep.mubr.msk.bf16.mxu0 %vm282_vm1, %v6868_v58 }
  0xe7   : > { %v7454_v23 = vpop.f32.mrb[0].mxu0 }
  0xe8   : > { %v378_v24 = vadd.f32 %v7454_v23, %v8083_v22  ;;  %v369_v25 = vpop.f32.mrb[1].mxu0 }
  0xe9   : > { %v370_v26 = vadd.f32 %v8083_v22, %v369_v25  ;;  %v7455_v27 = vpop.f32.mrb[2].mxu0 }
  0xea   : > { %v498_v28 = vmax.f32 %v378_v24, 0.0  ;;  %v381_v29 = vadd.f32 %v7455_v27, %v8083_v22  ;;  %v372_v30 = vpop.f32.mrb[3].mxu0 }
  0xeb   : > { %v496_v31 = vmax.f32 %v370_v26, 0.0  ;;  %v373_v32 = vadd.f32 %v8083_v22, %v372_v30 }
  0xec   : > { %v7218_v33 = vpack.c.bf16 %v498_v28, %v498_v28  ;;  %v499_v34 = vmax.f32 %v381_v29, 0.0 }
  0xed   : > { %v7216_v35 = vpack.c.bf16 %v496_v31, %v496_v31  ;;  %v497_v36 = vmax.f32 %v373_v32, 0.0  ;;  %v1092_v32 = vld [vmem:[#allocation2 + $0x30] sm:$0xf] }
  0xee   : > { %v766_v37 = vshrl.u32 %v7218_v33, 16  ;;  %v7219_v38 = vpack.c.bf16 %v499_v34, %v499_v34  ;;  %v769_v39 = vshll.u32 %v7218_v33, 16 }
  0xef   : > { %v749_v40 = vshrl.u32 %v7216_v35, 16  ;;  %v752_v41 = vshll.u32 %v7216_v35, 16  ;;  %v7217_v42 = vpack.c.bf16 %v497_v36, %v497_v36  ;;  %v7458_v43 = vpop.f32.mrb[4].mxu0 }
  0xf0   : > { %v768_v44 = vrot.slane %v766_v37, 7  ;;  %v774_v46 = vshrl.u32 %v7219_v38, 16  ;;  %v777_v47 = vshll.u32 %v7219_v38, 16  ;;  %v394_v48 = vadd.f32 %v7458_v43, %v8083_v22  ;;  %v385_v51 = vpop.f32.mrb[5].mxu0 }
  0xf1   : > { %v751_v54 = vrot.slane %v749_v40, 7  ;;  %v757_v55 = vshrl.u32 %v7217_v42, 16  ;;  %v760_v57 = vshll.u32 %v7217_v42, 16  ;;  %v386_v58 = vadd.f32 %v8083_v22, %v385_v51  ;;  %v7459_v59 = vpop.f32.mrb[6].mxu0  ;;  %v1085_v40 = vld [vmem:[#allocation2 + $0x24] sm:$0xf] }
  0xf2   : > { %v771_v61 = vor.u32 %v769_v39, %v768_v44  ;;  %v772_v62 = vrot.slane %v768_v44, 4  ;;  %v776_v0 = vrot.slane %v774_v46, 7  ;;  %v502_v1 = vmax.f32 %v394_v48, 0.0  ;;  %v388_v2 = vpop.f32.mrb[7].mxu0 }
  0xf3   : > { %v754_v3 = vor.u32 %v752_v41, %v751_v54  ;;  %v755_v4 = vrot.slane %v751_v54, 4  ;;  %v759_v7 = vrot.slane %v757_v55, 7  ;;  %v500_v8 = vmax.f32 %v386_v58, 0.0 }
  0xf4   : > { %v1079_v9 = vsel %vm8092_vm12, %v771_v61, %v1078_v45  ;;  %v779_v10 = vor.u32 %v777_v47, %v776_v0  ;;  %v781_v11 = vrot.slane %v776_v0, 4  ;;  %v7222_v13 = vpack.c.bf16 %v502_v1, %v502_v1  ;;  %v6982_v1 = vld [vmem:[%s9605_s3 + $0x8] sm:$0x3] }
  0xf5   : > { %1080 = vst [vmem:[#allocation2 + $0x18] sm:$0xf] %v1079_v9  ;;  %v1072_v14 = vsel %vm8092_vm12, %v754_v3, %v1071_v63  ;;  %v762_v15 = vor.u32 %v760_v57, %v759_v7  ;;  %v764_v16 = vrot.slane %v759_v7, 4  ;;  %v7220_v17 = vpack.c.bf16 %v500_v8, %v500_v8  ;;  %v1089_v3 = vld [vmem:[#allocation2 + $0x2c] sm:$0x1] }
  0xf6   : > { %1073 = vst [vmem:[#allocation2 + $0xc] sm:$0xf] %v1072_v14  ;;  %v780_v18 = vsel %vm8103_vm13, %v772_v62, %v779_v10  ;;  %v1083_v19 = vsel %vm7969_vm4, %v781_v11, %v1082_v6  ;;  %v800_v20 = vshrl.u32 %v7222_v13, 16  ;;  %v803_v25 = vshll.u32 %v7222_v13, 16  ;;  %v1106_v13 = vld [vmem:[#allocation2 + $0x48] sm:$0xf] }
  0xf7   : > { %1081 = vst.msk [vmem:[#allocation2 + $0x1c] sm:$0xf] %vm544_vm7, %v780_v18  ;;  %1084 = vst [vmem:[#allocation2 + $0x20] sm:$0x1] %v1083_v19  ;;  %v763_v23 = vsel %vm8103_vm13, %v755_v4, %v762_v15  ;;  %v1076_v24 = vsel %vm7969_vm4, %v764_v16, %v1075_v12  ;;  %v783_v26 = vshrl.u32 %v7220_v17, 16  ;;  %v7462_v27 = vpop.f32.mrb[8].mxu0  ;;  %v397_v56 = vadd.f32 %v7459_v59, %v8083_v22 }
  0xf8   : > { %1074 = vst.msk [vmem:[#allocation2 + $0x10] sm:$0xf] %vm544_vm7, %v763_v23  ;;  %1077 = vst [vmem:[#allocation2 + $0x14] sm:$0x1] %v1076_v24  ;;  %v8125_v28 = vrot.slane %v800_v20, 7  ;;  %v389_v29 = vadd.f32 %v8083_v22, %v388_v2  ;;  %v410_v30 = vadd.f32 %v7462_v27, %v8083_v22  ;;  %v401_v31 = vpop.f32.mrb[9].mxu0 }
  0xf9   : > { %v8130_v33 = vrot.slane %v783_v26, 7  ;;  %v786_v34 = vshll.u32 %v7220_v17, 16  ;;  %v402_v35 = vadd.f32 %v8083_v22, %v401_v31  ;;  %v7463_v36 = vpop.f32.mrb[10].mxu0  ;;  %v8134_v37 = vsel %vm331_vm0, %v6949_v60, 0  ;;  %v1096_v2 = vld [vmem:[#allocation2 + $0x38] sm:$0x1] }
  0xfa   : > { %v805_v38 = vor.u32 %v803_v25, %v8125_v28  ;;  %v806_v39 = vrot.slane %v8125_v28, 4  ;;  %v503_v41 = vmax.f32 %v397_v56, 0.0  ;;  %v501_v42 = vmax.f32 %v389_v29, 0.0  ;;  %v404_v43 = vpop.f32.mrb[11].mxu0  ;;  %v1099_v56 = vld [vmem:[#allocation2 + $0x3c] sm:$0xf] }
  0xfb   : > { %v788_v44 = vor.u32 %v786_v34, %v8130_v33  ;;  %v789_v45 = vrot.slane %v8130_v33, 4  ;;  %v506_v46 = vmax.f32 %v410_v30, 0.0  ;;  %v504_v47 = vmax.f32 %v402_v35, 0.0 }
  0xfc   : > { %v1093_v48 = vsel %vm8092_vm12, %v805_v38, %v1092_v32  ;;  %v7223_v51 = vpack.c.bf16 %v503_v41, %v503_v41  ;;  %v7221_v54 = vpack.c.bf16 %v501_v42, %v501_v42  ;;  %v413_v55 = vadd.f32 %v7463_v36, %v8083_v22  ;;  %v5893_v50 = vld [vmem:[#allocation2 + $0x18] sm:$0xe] }
  0xfd   : > { %1094 = vst [vmem:[#allocation2 + $0x30] sm:$0xf] %v1093_v48  ;;  %v1086_v57 = vsel %vm8092_vm12, %v788_v44, %v1085_v40  ;;  %v7226_v58 = vpack.c.bf16 %v506_v46, %v506_v46  ;;  %v7224_v59 = vpack.c.bf16 %v504_v47, %v504_v47  ;;  %v405_v60 = vadd.f32 %v8083_v22, %v404_v43 }
  0xfe   : > { %1087 = vst [vmem:[#allocation2 + $0x24] sm:$0xf] %v1086_v57  ;;  %v808_v61 = vshrl.u32 %v7223_v51, 16  ;;  %v811_v62 = vshll.u32 %v7223_v51, 16  ;;  %v791_v63 = vshrl.u32 %v7221_v54, 16  ;;  %v794_v0 = vshll.u32 %v7221_v54, 16 }
  0xff   : > { %v834_v4 = vshrl.u32 %v7226_v58, 16  ;;  %v837_v6 = vshll.u32 %v7226_v58, 16  ;;  %v817_v7 = vshrl.u32 %v7224_v59, 16  ;;  %v820_v8 = vshll.u32 %v7224_v59, 16  ;;  %v7466_v9 = vpop.f32.mrb[12].mxu0  ;;  %v7810_v10 = vld [vmem:[#allocation2 + $0xc] sm:$0xff]  }
 0x100   : > { %v810_v11 = vrot.slane %v808_v61, 7  ;;  %v793_v12 = vrot.slane %v791_v63, 7  ;;  %v507_v14 = vmax.f32 %v413_v55, 0.0  ;;  %v505_v15 = vmax.f32 %v405_v60, 0.0  ;;  %v417_v16 = vpop.f32.mrb[13].mxu0  ;;  %v7811_v17 = vld [vmem:[#allocation2 + $0x18] sm:$0xff]   ;;  %7487 = vmatmul.mubr.msk.bf16.vlgmr.msra.gmra.mrb[0].mxu1 %vm282_vm1, %v7810_v10 }
 0x101   : > { %v8149_v18 = vrot.slane %v834_v4, 7  ;;  %v8151_v19 = vrot.slane %v817_v7, 7  ;;  %v426_v20 = vadd.f32 %v7466_v9, %v8083_v22  ;;  %v418_v23 = vadd.f32 %v8083_v22, %v417_v16  ;;  %v7467_v24 = vpop.f32.mrb[14].mxu0  ;;  %7553 = vmatpush3.bf16.msra.mxu1 %v8117_v21  ;;  %7490 = vmatprep.mubr.msk.bf16.mxu1 %vm282_vm1, %v7811_v17  ;;  %v1110_v55 = vld [vmem:[#allocation2 + $0x50] sm:$0x1] }
 0x102   : > { %v813_v25 = vor.u32 %v811_v62, %v810_v11  ;;  %v815_v26 = vrot.slane %v810_v11, 4  ;;  %v796_v27 = vor.u32 %v794_v0, %v793_v12  ;;  %v798_v28 = vrot.slane %v793_v12, 4  ;;  %v420_v29 = vpop.f32.mrb[15].mxu0  ;;  %7795 = vmatprep.subr.msk.bf16.mxu1 %vm331_vm0, %v6982_v1  ;;  %v1103_v0 = vld [vmem:[#allocation2 + $0x44] sm:$0x1] }
 0x103   : > { %v839_v30 = vor.u32 %v837_v6, %v8149_v18  ;;  %v840_v31 = vrot.slane %v8149_v18, 4  ;;  %v822_v32 = vor.u32 %v820_v8, %v8151_v19  ;;  %v823_v33 = vrot.slane %v8151_v19, 4 }
 0x104   : > { %v814_v34 = vsel %vm8103_vm13, %v806_v39, %v813_v25  ;;  %v1097_v35 = vsel %vm7969_vm4, %v815_v26, %v1096_v2  ;;  %v797_v21 = vsel %vm8103_vm13, %v789_v45, %v796_v27  ;;  %v1090_v36 = vsel %vm7969_vm4, %v798_v28, %v1089_v3 }
 0x105   : > { %1095 = vst.msk [vmem:[#allocation2 + $0x34] sm:$0xf] %vm544_vm7, %v814_v34  ;;  %1098 = vst [vmem:[#allocation2 + $0x38] sm:$0x1] %v1097_v35  ;;  %v1107_v38 = vsel %vm8092_vm12, %v839_v30, %v1106_v13  ;;  %v1100_v39 = vsel %vm8092_vm12, %v822_v32, %v1099_v56  ;;  %v7227_v40 = vpack.c.bf16 %v507_v14, %v507_v14  ;;  %v510_v42 = vmax.f32 %v426_v20, 0.0 }
 0x106   : > { %1088 = vst.msk [vmem:[#allocation2 + $0x28] sm:$0xf] %vm544_vm7, %v797_v21  ;;  %1091 = vst [vmem:[#allocation2 + $0x2c] sm:$0x1] %v1090_v36  ;;  %v7225_v41 = vpack.c.bf16 %v505_v15, %v505_v15  ;;  %v508_v43 = vmax.f32 %v418_v23, 0.0  ;;  %v429_v44 = vadd.f32 %v7467_v24, %v8083_v22  ;;  %v421_v45 = vadd.f32 %v8083_v22, %v420_v29 }
 0x107   : > { %1108 = vst [vmem:[#allocation2 + $0x48] sm:$0xf] %v1107_v38  ;;  %1101 = vst [vmem:[#allocation2 + $0x3c] sm:$0xf] %v1100_v39  ;;  %v842_v46 = vshrl.u32 %v7227_v40, 16  ;;  %v845_v47 = vshll.u32 %v7227_v40, 16  ;;  %v7230_v57 = vpack.c.bf16 %v510_v42, %v510_v42 }
 0x108   : > { %v825_v48 = vshrl.u32 %v7225_v41, 16  ;;  %v828_v51 = vshll.u32 %v7225_v41, 16  ;;  %v7470_v54 = vpop.f32.mrb[16].mxu0  ;;  %v7228_v58 = vpack.c.bf16 %v508_v43, %v508_v43  ;;  %v511_v59 = vmax.f32 %v429_v44, 0.0  ;;  %v1120_v14 = vld [vmem:[#allocation2 + $0x60] sm:$0xf] }
 0x109   : > { %v509_v60 = vmax.f32 %v421_v45, 0.0  ;;  %v433_v61 = vpop.f32.mrb[17].mxu0  ;;  %v844_v62 = vrot.slane %v842_v46, 7  ;;  %v442_v1 = vadd.f32 %v7470_v54, %v8083_v22  ;;  %v868_v4 = vshrl.u32 %v7230_v57, 16  ;;  %v1113_v15 = vld [vmem:[#allocation2 + $0x54] sm:$0xf] }
 0x10a   : > { %v827_v63 = vrot.slane %v825_v48, 7  ;;  %v434_v2 = vadd.f32 %v8083_v22, %v433_v61  ;;  %v7471_v3 = vpop.f32.mrb[18].mxu0  ;;  %v871_v6 = vshll.u32 %v7230_v57, 16  ;;  %v851_v7 = vshrl.u32 %v7228_v58, 16  ;;  %v1124_v43 = vld [vmem:[#allocation2 + $0x68] sm:$0x1] }
 0x10b   : > { %v854_v8 = vshll.u32 %v7228_v58, 16  ;;  %v436_v9 = vpop.f32.mrb[19].mxu0  ;;  %v847_v10 = vor.u32 %v845_v47, %v844_v62  ;;  %v849_v11 = vrot.slane %v844_v62, 4  ;;  %v870_v16 = vrot.slane %v868_v4, 7  ;;  %v1117_v48 = vld [vmem:[#allocation2 + $0x5c] sm:$0x1] }
 0x10c   : > { %v830_v12 = vor.u32 %v828_v51, %v827_v63  ;;  %v832_v13 = vrot.slane %v827_v63, 4  ;;  %v853_v17 = vrot.slane %v851_v7, 7  ;;  %v7231_v18 = vpack.c.bf16 %v511_v59, %v511_v59  ;;  %v7813_v23 = vld [vmem:[#allocation2 + $0x30] sm:$0xff]  }
 0x10d   : > { %v7229_v19 = vpack.c.bf16 %v509_v60, %v509_v60  ;;  %v7812_v20 = vld [vmem:[#allocation2 + $0x24] sm:$0xff]   ;;  %v848_v24 = vsel %vm8103_vm13, %v840_v31, %v847_v10  ;;  %v1111_v25 = vsel %vm7969_vm4, %v849_v11, %v1110_v55  ;;  %v873_v28 = vor.u32 %v871_v6, %v870_v16  ;;  %v1543_v31 = vld [vmem:[#allocation2 + $0xc] sm:$0xf]  ;;  %v1545_v11 = vld [vmem:[#allocation2 + $0x14] sm:$0x1] }
 0x10e   : > { %v831_v26 = vsel %vm8103_vm13, %v823_v33, %v830_v12  ;;  %v1104_v27 = vsel %vm7969_vm4, %v832_v13, %v1103_v0  ;;  %1109 = vst.msk [vmem:[#allocation2 + $0x4c] sm:$0xf] %vm544_vm7, %v848_v24  ;;  %1112 = vst [vmem:[#allocation2 + $0x50] sm:$0x1] %v1111_v25  ;;  %v874_v56 = vrot.slane %v870_v16, 4  ;;  %v856_v29 = vor.u32 %v854_v8, %v853_v17 }
 0x10f   : > { %1102 = vst.msk [vmem:[#allocation2 + $0x40] sm:$0xf] %vm544_vm7, %v831_v26  ;;  %1105 = vst [vmem:[#allocation2 + $0x44] sm:$0x1] %v1104_v27  ;;  %v857_v30 = vrot.slane %v853_v17, 4  ;;  %7491 = vmatmul.mubr.msk.bf16.gmra.mrb[4].mxu1 %vm282_vm1, %v7812_v20  ;;  %v876_v32 = vshrl.u32 %v7231_v18, 16  ;;  %v1121_v36 = vsel %vm8092_vm12, %v873_v28, %v1120_v14  ;;  %v445_v45 = vadd.f32 %v7471_v3, %v8083_v22 }
 0x110   : > { %v879_v34 = vshll.u32 %v7231_v18, 16  ;;  %v859_v35 = vshrl.u32 %v7229_v19, 16  ;;  %v862_v33 = vshll.u32 %v7229_v19, 16  ;;  %7494 = vmatprep.mubr.msk.bf16.mxu1 %vm282_vm1, %v7813_v23  ;;  %v8193_v21 = vpop.f32.mrb[20].mxu0  ;;  %v1114_v38 = vsel %vm8092_vm12, %v856_v29, %v1113_v15  ;;  %1122 = vst [vmem:[#allocation2 + $0x60] sm:$0xf] %v1121_v36 }
 0x111   : > { %v514_v39 = vmax.f32 %v442_v1, 0.0  ;;  %v512_v40 = vmax.f32 %v434_v2, 0.0  ;;  %v8199_v41 = vpop.f32.mrb[21].mxu0  ;;  %1115 = vst [vmem:[#allocation2 + $0x54] sm:$0xf] %v1114_v38  ;;  %v878_v42 = vrot.slane %v876_v32, 7  ;;  %v437_v46 = vadd.f32 %v8083_v22, %v436_v9 }
 0x112   : > { %v861_v44 = vrot.slane %v859_v35, 7  ;;  %v8203_v47 = vpop.f32.mrb[22].mxu0  ;;  %v1616_v55 = vshrl.u32 %v1543_v31, 16  ;;  %v1619_v57 = vshll.u32 %v1543_v31, 16  ;;  %v1544_v3 = vld [vmem:[#allocation2 + $0x10] sm:$0xf] }
 0x113   : > { %v7234_v51 = vpack.c.bf16 %v514_v39, %v514_v39  ;;  %v7232_v54 = vpack.c.bf16 %v512_v40, %v512_v40  ;;  %v8205_v58 = vpop.f32.mrb[23].mxu0  ;;  %v881_v59 = vor.u32 %v879_v34, %v878_v42  ;;  %v883_v60 = vrot.slane %v878_v42, 4  ;;  %v1134_v9 = vld [vmem:[#allocation2 + $0x78] sm:$0xf]  ;;  %v1127_v10 = vld [vmem:[#allocation2 + $0x6c] sm:$0xf] }
 0x114   : > { %v864_v61 = vor.u32 %v862_v33, %v861_v44  ;;  %v866_v62 = vrot.slane %v861_v44, 4  ;;  %v515_v15 = vmax.f32 %v445_v45, 0.0  ;;  %v513_v16 = vmax.f32 %v437_v46, 0.0  ;;  %v1546_v34 = vld [vmem:[#allocation2 + $0x18] sm:$0xf] }
 0x115   : > { %v902_v63 = vshrl.u32 %v7234_v51, 16  ;;  %v905_v0 = vshll.u32 %v7234_v51, 16  ;;  %v885_v1 = vshrl.u32 %v7232_v54, 16  ;;  %v888_v2 = vshll.u32 %v7232_v54, 16  ;;  %v7815_v17 = vld [vmem:[#allocation2 + $0x48] sm:$0xff]  }
 0x116   : > { %v882_v4 = vsel %vm8103_vm13, %v874_v56, %v881_v59  ;;  %v1125_v6 = vsel %vm7969_vm4, %v883_v60, %v1124_v43  ;;  %v865_v7 = vsel %vm8103_vm13, %v857_v30, %v864_v61  ;;  %v1118_v8 = vsel %vm7969_vm4, %v866_v62, %v1117_v48  ;;  %v7814_v12 = vld [vmem:[#allocation2 + $0x3c] sm:$0xff]   ;;  %v1131_v51 = vld [vmem:[#allocation2 + $0x74] sm:$0x1] }
 0x117   : > { %1123 = vst.msk [vmem:[#allocation2 + $0x64] sm:$0xf] %vm544_vm7, %v882_v4  ;;  %1126 = vst [vmem:[#allocation2 + $0x68] sm:$0x1] %v1125_v6  ;;  %v8217_v13 = vrot.slane %v902_v63, 7  ;;  %v8219_v14 = vrot.slane %v885_v1, 7  ;;  %7495 = vmatmul.mubr.msk.bf16.gmra.mrb[8].mxu1 %vm282_vm1, %v7814_v12  ;;  %v7235_v29 = vpack.c.bf16 %v515_v15, %v515_v15  ;;  %v7233_v30 = vpack.c.bf16 %v513_v16, %v513_v16 }
 0x118   : > { %1116 = vst.msk [vmem:[#allocation2 + $0x58] sm:$0xf] %vm544_vm7, %v865_v7  ;;  %1119 = vst [vmem:[#allocation2 + $0x5c] sm:$0x1] %v1118_v8  ;;  %v1618_v18 = vrot.slane %v1616_v55, 4  ;;  %v1621_v19 = vrot.slane %v1619_v57, 5  ;;  %7498 = vmatprep.mubr.msk.bf16.mxu1 %vm282_vm1, %v7815_v17 }
 0x119   : > { %v1625_v20 = vshll.u32 %v1544_v3, 16  ;;  %v1629_v23 = vshrl.u32 %v1544_v3, 16  ;;  %v8222_v24 = vpop.f32.mrb[24].mxu0  ;;  %v907_v25 = vor.u32 %v905_v0, %v8217_v13  ;;  %v908_v26 = vrot.slane %v8217_v13, 4  ;;  %v1547_v40 = vld [vmem:[#allocation2 + $0x1c] sm:$0xf] }
 0x11a   : > { %v890_v27 = vor.u32 %v888_v2, %v8219_v14  ;;  %v891_v28 = vrot.slane %v8219_v14, 4  ;;  %v8229_v56 = vpop.f32.mrb[25].mxu0  ;;  %v1622_v31 = vor.u32 %v1621_v19, %v1618_v18  ;;  %v1635_v39 = vshll.u32 %v1545_v11, 16  ;;  %v1138_v48 = vld [vmem:[#allocation2 + $0x80] sm:$0x1] }
 0x11b   : > { %v1627_v32 = vrot.slane %v1625_v20, 5  ;;  %v8231_v35 = vpop.f32.mrb[26].mxu0  ;;  %v1135_v33 = vsel %vm8092_vm12, %v907_v25, %v1134_v9  ;;  %v1631_v38 = vrot.slane %v1629_v23, 4  ;;  %v910_v43 = vshrl.u32 %v7235_v29, 16  ;;  %v1549_v25 = vld [vmem:[#allocation2 + $0x24] sm:$0xf] }
 0x11c   : > { %v1128_v36 = vsel %vm8092_vm12, %v890_v27, %v1127_v10  ;;  %v8237_v42 = vpop.f32.mrb[27].mxu0  ;;  %1136 = vst [vmem:[#allocation2 + $0x78] sm:$0xf] %v1135_v33  ;;  %v913_v44 = vshll.u32 %v7235_v29, 16  ;;  %v893_v45 = vshrl.u32 %v7233_v30, 16  ;;  %v896_v46 = vshll.u32 %v7233_v30, 16 }
 0x11d   : > { %1129 = vst [vmem:[#allocation2 + $0x6c] sm:$0xf] %v1128_v36  ;;  %v1623_v54 = vrot.slane %v1622_v31, 4  ;;  %v1632_v55 = vor.u32 %v1631_v38, %v1627_v32  ;;  %v1637_v57 = vrot.slane %v1635_v39, 5  ;;  %v1640_v59 = vshrl.u32 %v1546_v34, 16 }
 0x11e   : > { %v912_v60 = vrot.slane %v910_v43, 7  ;;  %v895_v61 = vrot.slane %v893_v45, 7  ;;  %v1643_v62 = vshll.u32 %v1546_v34, 16  ;;  %v1649_v63 = vshll.u32 %v1547_v40, 16  ;;  %v1548_v10 = vld [vmem:[#allocation2 + $0x20] sm:$0x1] }
 0x11f   : > { %v1628_v0 = vsel %vm8034_vm10, %v1623_v54, %v1627_v32  ;;  %v1633_v1 = vrot.slane %v1632_v55, 4  ;;  %v1642_v2 = vrot.slane %v1640_v59, 4  ;;  %v1653_v3 = vshrl.u32 %v1547_v40, 16  ;;  %v7816_v4 = vld [vmem:[#allocation2 + $0x54] sm:$0xff]   ;;  %v7817_v11 = vld [vmem:[#allocation2 + $0x60] sm:$0xff]   ;;  %v8241_v12 = vpop.f32.mrb[28].mxu0 }
 0x120   : > { %v915_v6 = vor.u32 %v913_v44, %v912_v60  ;;  %v917_v7 = vrot.slane %v912_v60, 4  ;;  %v898_v8 = vor.u32 %v896_v46, %v895_v61  ;;  %v900_v9 = vrot.slane %v895_v61, 4  ;;  %7499 = vmatmul.mubr.msk.bf16.gmra.mrb[12].mxu1 %vm282_vm1, %v7816_v4  ;;  %v8246_v17 = vpop.f32.mrb[29].mxu0  ;;  %v1551_v60 = vld [vmem:[#allocation2 + $0x2c] sm:$0x1] }
 0x121   : > { %v1638_v13 = vsel %vm8034_vm10, %v1633_v1, %v1637_v57  ;;  %v1645_v14 = vrot.slane %v1643_v62, 5  ;;  %v1651_v15 = vrot.slane %v1649_v63, 5  ;;  %v1655_v16 = vrot.slane %v1653_v3, 4  ;;  %7502 = vmatprep.mubr.msk.bf16.mxu1 %vm282_vm1, %v7817_v11  ;;  %v8257_v27 = vpop.f32.mrb[30].mxu0  ;;  %v1148_v4 = vld [vmem:[#allocation2 + $0x90] sm:$0xf] }
 0x122   : > { %v916_v18 = vsel %vm8103_vm13, %v908_v26, %v915_v6  ;;  %v1139_v19 = vsel %vm7969_vm4, %v917_v7, %v1138_v48  ;;  %v899_v20 = vsel %vm8103_vm13, %v891_v28, %v898_v8  ;;  %v1132_v23 = vsel %vm7969_vm4, %v900_v9, %v1131_v51  ;;  %v8261_v32 = vpop.f32.mrb[31].mxu0  ;;  %v1141_v6 = vld [vmem:[#allocation2 + $0x84] sm:$0xf] }
 0x123   : > { %1137 = vst.msk [vmem:[#allocation2 + $0x7c] sm:$0xf] %vm544_vm7, %v916_v18  ;;  %1140 = vst [vmem:[#allocation2 + $0x80] sm:$0x1] %v1139_v19  ;;  %v6869_v26 = vcombine.low %v1628_v0, %v1638_v13  ;;  %v1646_v29 = vor.u32 %v1645_v14, %v1642_v2  ;;  %v1656_v30 = vor.u32 %v1655_v16, %v1651_v15  ;;  %v1659_v31 = vshll.u32 %v1548_v10, 16 }
 0x124   : > { %1130 = vst.msk [vmem:[#allocation2 + $0x70] sm:$0xf] %vm544_vm7, %v899_v20  ;;  %1133 = vst [vmem:[#allocation2 + $0x74] sm:$0x1] %v1132_v23  ;;  %v458_v28 = vadd.f32 %v8193_v21, %v8083_v22  ;;  %v450_v34 = vadd.f32 %v8083_v22, %v8199_v41  ;;  %v461_v33 = vadd.f32 %v8203_v47, %v8083_v22  ;;  %v1664_v43 = vshrl.u32 %v1549_v25, 16 }
 0x125   : > { %v453_v36 = vadd.f32 %v8083_v22, %v8205_v58  ;;  %7521 = vmatmul.mubr.msk.bf16.vlgmr.msra.gmra.mrb[32].mxu0 %vm282_vm1, %v6869_v26  ;;  %v1647_v38 = vrot.slane %v1646_v29, 4  ;;  %v1657_v39 = vrot.slane %v1656_v30, 4  ;;  %v1661_v40 = vrot.slane %v1659_v31, 5  ;;  %v1550_v21 = vld [vmem:[#allocation2 + $0x28] sm:$0xf] }
 0x126   : > { %v518_v44 = vmax.f32 %v458_v28, 0.0  ;;  %v516_v45 = vmax.f32 %v450_v34, 0.0  ;;  %v519_v46 = vmax.f32 %v461_v33, 0.0  ;;  %7587 = vmatpush3.bf16.msra.mxu0 %v8134_v37  ;;  %v1666_v58 = vrot.slane %v1664_v43, 4  ;;  %v1152_v20 = vld [vmem:[#allocation2 + $0x98] sm:$0x1] }
 0x127   : > { %v517_v48 = vmax.f32 %v453_v36, 0.0  ;;  %v1652_v41 = vsel %vm8034_vm10, %v1647_v38, %v1651_v15  ;;  %v1662_v47 = vsel %vm8034_vm10, %v1657_v39, %v1661_v40  ;;  %v1667_v51 = vshll.u32 %v1549_v25, 16  ;;  %v1145_v34 = vld [vmem:[#allocation2 + $0x8c] sm:$0x1]  ;;  %v1552_v33 = vld [vmem:[#allocation2 + $0x30] sm:$0xf] }
 0x128   : > { %v6870_v54 = vcombine.low %v1652_v41, %v1662_v47  ;;  %v7238_v55 = vpack.c.bf16 %v518_v44, %v518_v44  ;;  %v7236_v57 = vpack.c.bf16 %v516_v45, %v516_v45  ;;  %v7239_v59 = vpack.c.bf16 %v519_v46, %v519_v46  ;;  %v1553_v43 = vld [vmem:[#allocation2 + $0x34] sm:$0xf] }
 0x129   : > { %v7237_v61 = vpack.c.bf16 %v517_v48, %v517_v48  ;;  %v1669_v62 = vrot.slane %v1667_v51, 5  ;;  %v1673_v63 = vshll.u32 %v1550_v21, 16  ;;  %v1677_v0 = vshrl.u32 %v1550_v21, 16  ;;  %v1554_v21 = vld [vmem:[#allocation2 + $0x38] sm:$0x1] }
 0x12a   : > { %7524 = vmatprep.mubr.msk.bf16.mxu0 %vm282_vm1, %v6870_v54  ;;  %v936_v37 = vshrl.u32 %v7238_v55, 16  ;;  %v939_v1 = vshll.u32 %v7238_v55, 16  ;;  %v919_v2 = vshrl.u32 %v7236_v57, 16  ;;  %v922_v3 = vshll.u32 %v7236_v57, 16  ;;  %v7819_v18 = vld [vmem:[#allocation2 + $0x78] sm:$0xff]  }
 0x12b   : > { %v944_v7 = vshrl.u32 %v7239_v59, 16  ;;  %v947_v8 = vshll.u32 %v7239_v59, 16  ;;  %v927_v9 = vshrl.u32 %v7237_v61, 16  ;;  %v930_v10 = vshll.u32 %v7237_v61, 16  ;;  %v7818_v11 = vld [vmem:[#allocation2 + $0x6c] sm:$0xff]  }
 0x12c   : > { %v938_v13 = vrot.slane %v936_v37, 7  ;;  %v921_v14 = vrot.slane %v919_v2, 7  ;;  %v1670_v15 = vor.u32 %v1669_v62, %v1666_v58  ;;  %v1675_v16 = vrot.slane %v1673_v63, 5  ;;  %7503 = vmatmul.mubr.msk.bf16.gmra.mrb[16].mxu1 %vm282_vm1, %v7818_v11 }
 0x12d   : > { %v946_v19 = vrot.slane %v944_v7, 7  ;;  %v929_v23 = vrot.slane %v927_v9, 7  ;;  %v1679_v25 = vrot.slane %v1677_v0, 4  ;;  %v1683_v26 = vshll.u32 %v1551_v60, 16  ;;  %7506 = vmatprep.mubr.msk.bf16.mxu1 %vm282_vm1, %v7819_v18  ;;  %v1555_v0 = vld [vmem:[#allocation2 + $0x3c] sm:$0xf] }
 0x12e   : > { %v941_v29 = vor.u32 %v939_v1, %v938_v13  ;;  %v942_v30 = vrot.slane %v938_v13, 4  ;;  %v924_v31 = vor.u32 %v922_v3, %v921_v14  ;;  %v925_v28 = vrot.slane %v921_v14, 4 }
 0x12f   : > { %v949_v36 = vor.u32 %v947_v8, %v946_v19  ;;  %v951_v38 = vrot.slane %v946_v19, 4  ;;  %v932_v39 = vor.u32 %v930_v10, %v929_v23  ;;  %v934_v40 = vrot.slane %v929_v23, 4 }
 0x130   : > { %v1149_v44 = vsel %vm8092_vm12, %v941_v29, %v1148_v4  ;;  %v1142_v45 = vsel %vm8092_vm12, %v924_v31, %v1141_v6  ;;  %v1671_v46 = vrot.slane %v1670_v15, 4  ;;  %v1680_v48 = vor.u32 %v1679_v25, %v1675_v16 }
 0x131   : > { %1150 = vst [vmem:[#allocation2 + $0x90] sm:$0xf] %v1149_v44  ;;  %1143 = vst [vmem:[#allocation2 + $0x84] sm:$0xf] %v1142_v45  ;;  %v950_v41 = vsel %vm8103_vm13, %v942_v30, %v949_v36  ;;  %v1153_v47 = vsel %vm7969_vm4, %v951_v38, %v1152_v20  ;;  %v933_v58 = vsel %vm8103_vm13, %v925_v28, %v932_v39  ;;  %v1685_v57 = vrot.slane %v1683_v26, 5 }
 0x132   : > { %v1146_v51 = vsel %vm7969_vm4, %v934_v40, %v1145_v34  ;;  %1151 = vst.msk [vmem:[#allocation2 + $0x94] sm:$0xf] %vm544_vm7, %v950_v41  ;;  %1154 = vst [vmem:[#allocation2 + $0x98] sm:$0x1] %v1153_v47  ;;  %v1676_v54 = vsel %vm8034_vm10, %v1671_v46, %v1675_v16  ;;  %v1681_v55 = vrot.slane %v1680_v48, 4  ;;  %v1688_v59 = vshrl.u32 %v1552_v33, 16 }
 0x133   : > { %1144 = vst.msk [vmem:[#allocation2 + $0x88] sm:$0xf] %vm544_vm7, %v933_v58  ;;  %1147 = vst [vmem:[#allocation2 + $0x8c] sm:$0x1] %v1146_v51  ;;  %v1691_v60 = vshll.u32 %v1552_v33, 16  ;;  %v1697_v61 = vshll.u32 %v1553_v43, 16  ;;  %v474_v2 = vadd.f32 %v8222_v24, %v8083_v22  ;;  %v466_v3 = vadd.f32 %v8083_v22, %v8229_v56 }
 0x134   : > { %v1701_v62 = vshrl.u32 %v1553_v43, 16  ;;  %v1707_v63 = vshll.u32 %v1554_v21, 16  ;;  %v1686_v37 = vsel %vm8034_vm10, %v1681_v55, %v1685_v57  ;;  %v1690_v1 = vrot.slane %v1688_v59, 4  ;;  %v1155_v36 = vld [vmem:[#allocation2 + $0x9c] sm:$0xf] }
 0x135   : > { %v6871_v4 = vcombine.low %v1676_v54, %v1686_v37  ;;  %v1693_v6 = vrot.slane %v1691_v60, 5  ;;  %v1699_v7 = vrot.slane %v1697_v61, 5  ;;  %v522_v10 = vmax.f32 %v474_v2, 0.0  ;;  %v1556_v46 = vld [vmem:[#allocation2 + $0x40] sm:$0xf] }
 0x136   : > { %v1703_v8 = vrot.slane %v1701_v62, 4  ;;  %v1709_v9 = vrot.slane %v1707_v63, 5  ;;  %v520_v11 = vmax.f32 %v466_v3, 0.0  ;;  %v477_v13 = vadd.f32 %v8231_v35, %v8083_v22  ;;  %v1557_v51 = vld [vmem:[#allocation2 + $0x44] sm:$0x1] }
 0x137   : > { %7525 = vmatmul.mubr.msk.bf16.gmra.mrb[36].mxu0 %vm282_vm1, %v6871_v4  ;;  %v1694_v14 = vor.u32 %v1693_v6, %v1690_v1  ;;  %v469_v24 = vadd.f32 %v8083_v22, %v8237_v42  ;;  %v1712_v16 = vshrl.u32 %v1555_v0, 16  ;;  %v7242_v18 = vpack.c.bf16 %v522_v10, %v522_v10  ;;  %v1162_v42 = vld [vmem:[#allocation2 + $0xa8] sm:$0xf]  ;;  %v1166_v60 = vld [vmem:[#allocation2 + $0xb0] sm:$0x1] }
 0x138   : > { %v1704_v15 = vor.u32 %v1703_v8, %v1699_v7  ;;  %v7240_v56 = vpack.c.bf16 %v520_v11, %v520_v11  ;;  %v523_v19 = vmax.f32 %v477_v13, 0.0  ;;  %v1715_v20 = vshll.u32 %v1555_v0, 16  ;;  %v1159_v63 = vld [vmem:[#allocation2 + $0xa4] sm:$0x1]  ;;  %v1558_v6 = vld [vmem:[#allocation2 + $0x48] sm:$0xf] }
 0x139   : > { %v1695_v23 = vrot.slane %v1694_v14, 4  ;;  %v521_v26 = vmax.f32 %v469_v24, 0.0  ;;  %v1714_v29 = vrot.slane %v1712_v16, 4  ;;  %v970_v30 = vshrl.u32 %v7242_v18, 16  ;;  %v7821_v40 = vld [vmem:[#allocation2 + $0x90] sm:$0xff]  }
 0x13a   : > { %v1705_v25 = vrot.slane %v1704_v15, 4  ;;  %v973_v31 = vshll.u32 %v7242_v18, 16  ;;  %v953_v28 = vshrl.u32 %v7240_v56, 16  ;;  %v956_v35 = vshll.u32 %v7240_v56, 16  ;;  %v7820_v34 = vld [vmem:[#allocation2 + $0x84] sm:$0xff]  }
 0x13b   : > { %v1700_v33 = vsel %vm8034_vm10, %v1695_v23, %v1699_v7  ;;  %v7243_v38 = vpack.c.bf16 %v523_v19, %v523_v19  ;;  %v7241_v39 = vpack.c.bf16 %v521_v26, %v521_v26  ;;  %v972_v44 = vrot.slane %v970_v30, 7  ;;  %7507 = vmatmul.mubr.msk.bf16.gmra.mrb[20].mxu1 %vm282_vm1, %v7820_v34  ;;  %v1559_v7 = vld [vmem:[#allocation2 + $0x4c] sm:$0xf]  ;;  %v1560_v13 = vld [vmem:[#allocation2 + $0x50] sm:$0x1] }
 0x13c   : > { %v1710_v22 = vsel %vm8034_vm10, %v1705_v25, %v1709_v9  ;;  %v955_v45 = vrot.slane %v953_v28, 7  ;;  %v1717_v48 = vrot.slane %v1715_v20, 5  ;;  %7510 = vmatprep.mubr.msk.bf16.mxu1 %vm282_vm1, %v7821_v40  ;;  %v1721_v37 = vshll.u32 %v1556_v46, 16 }
 0x13d   : > { %v6872_v43 = vcombine.low %v1700_v33, %v1710_v22  ;;  %v978_v21 = vshrl.u32 %v7243_v38, 16  ;;  %v981_v41 = vshll.u32 %v7243_v38, 16  ;;  %v961_v47 = vshrl.u32 %v7241_v39, 16 }
 0x13e   : > { %v964_v58 = vshll.u32 %v7241_v39, 16  ;;  %v975_v54 = vor.u32 %v973_v31, %v972_v44  ;;  %v976_v55 = vrot.slane %v972_v44, 4  ;;  %v958_v57 = vor.u32 %v956_v35, %v955_v45  ;;  %v7857_v35 = vld [vmem:[%s9604_s2] ss:$0 sm:$0xff]  ;;  %v1561_v44 = vld [vmem:[#allocation2 + $0x54] sm:$0xf] }
 0x13f   : > { %7528 = vmatprep.mubr.msk.bf16.mxu0 %vm282_vm1, %v6872_v43  ;;  %v959_v59 = vrot.slane %v955_v45, 4  ;;  %v980_v61 = vrot.slane %v978_v21, 7  ;;  %v963_v62 = vrot.slane %v961_v47, 7  ;;  %v1718_v0 = vor.u32 %v1717_v48, %v1714_v29 }
 0x140   : > { %v1163_v1 = vsel %vm8092_vm12, %v975_v54, %v1162_v42  ;;  %v1156_v2 = vsel %vm8092_vm12, %v958_v57, %v1155_v36  ;;  %v1725_v3 = vshrl.u32 %v1556_v46, 16  ;;  %v1731_v4 = vshll.u32 %v1557_v51, 16 }
 0x141   : > { %1164 = vst [vmem:[#allocation2 + $0xa8] sm:$0xf] %v1163_v1  ;;  %1157 = vst [vmem:[#allocation2 + $0x9c] sm:$0xf] %v1156_v2  ;;  %v983_v8 = vor.u32 %v981_v41, %v980_v61  ;;  %v985_v9 = vrot.slane %v980_v61, 4  ;;  %v966_v10 = vor.u32 %v964_v58, %v963_v62  ;;  %v968_v11 = vrot.slane %v963_v62, 4 }
 0x142   : > { %v1719_v14 = vrot.slane %v1718_v0, 4  ;;  %v1723_v15 = vrot.slane %v1721_v37, 5  ;;  %v1727_v24 = vrot.slane %v1725_v3, 4  ;;  %v1733_v16 = vrot.slane %v1731_v4, 5  ;;  %v1169_v3 = vld [vmem:[#allocation2 + $0xb4] sm:$0xf] }
 0x143   : > { %v984_v18 = vsel %vm8103_vm13, %v976_v55, %v983_v8  ;;  %v1167_v56 = vsel %vm7969_vm4, %v985_v9, %v1166_v60  ;;  %v967_v19 = vsel %vm8103_vm13, %v959_v59, %v966_v10  ;;  %v1160_v20 = vsel %vm7969_vm4, %v968_v11, %v1159_v63  ;;  %v1176_v63 = vld [vmem:[#allocation2 + $0xc0] sm:$0xf] }
 0x144   : > { %1165 = vst.msk [vmem:[#allocation2 + $0xac] sm:$0xf] %vm544_vm7, %v984_v18  ;;  %1168 = vst [vmem:[#allocation2 + $0xb0] sm:$0x1] %v1167_v56  ;;  %v1724_v23 = vsel %vm8034_vm10, %v1719_v14, %v1723_v15  ;;  %v1728_v25 = vor.u32 %v1727_v24, %v1723_v15  ;;  %v1736_v26 = vshrl.u32 %v1558_v6, 16  ;;  %v1739_v29 = vshll.u32 %v1558_v6, 16 }
 0x145   : > { %1158 = vst.msk [vmem:[#allocation2 + $0xa0] sm:$0xf] %vm544_vm7, %v967_v19  ;;  %1161 = vst [vmem:[#allocation2 + $0xa4] sm:$0x1] %v1160_v20  ;;  %v1745_v30 = vshll.u32 %v1559_v7, 16  ;;  %v1749_v31 = vshrl.u32 %v1559_v7, 16  ;;  %v490_v34 = vadd.f32 %v7857_v35, %v8241_v12  ;;  %v482_v36 = vadd.f32 %v7857_v35, %v8246_v17 }
 0x146   : > { %v1755_v28 = vshll.u32 %v1560_v13, 16  ;;  %v1729_v33 = vrot.slane %v1728_v25, 4  ;;  %v1738_v22 = vrot.slane %v1736_v26, 4  ;;  %v1741_v42 = vrot.slane %v1739_v29, 5  ;;  %v1562_v13 = vld [vmem:[#allocation2 + $0x58] sm:$0xf] }
 0x147   : > { %v1747_v38 = vrot.slane %v1745_v30, 5  ;;  %v1751_v39 = vrot.slane %v1749_v31, 4  ;;  %v526_v43 = vmax.f32 %v490_v34, 0.0  ;;  %v524_v48 = vmax.f32 %v482_v36, 0.0  ;;  %v1180_v24 = vld [vmem:[#allocation2 + $0xc8] sm:$0x1] }
 0x148   : > { %v1757_v40 = vrot.slane %v1755_v28, 5  ;;  %v1734_v45 = vsel %vm8034_vm10, %v1729_v33, %v1733_v16  ;;  %v1742_v46 = vor.u32 %v1741_v42, %v1738_v22  ;;  %v493_v21 = vadd.f32 %v7857_v35, %v8257_v27  ;;  %v1563_v56 = vld [vmem:[#allocation2 + $0x5c] sm:$0x1]  ;;  %v1564_v42 = vld [vmem:[#allocation2 + $0x60] sm:$0xf] }
 0x149   : > { %v6873_v41 = vcombine.low %v1724_v23, %v1734_v45  ;;  %v1752_v47 = vor.u32 %v1751_v39, %v1747_v38  ;;  %v7246_v12 = vpack.c.bf16 %v526_v43, %v526_v43  ;;  %v485_v58 = vadd.f32 %v7857_v35, %v8261_v32  ;;  %v1173_v33 = vld [vmem:[#allocation2 + $0xbc] sm:$0x1]  ;;  %v1565_v43 = vld [vmem:[#allocation2 + $0x64] sm:$0xf] }
 0x14a   : > { %v1743_v51 = vrot.slane %v1742_v46, 4  ;;  %v7244_v54 = vpack.c.bf16 %v524_v48, %v524_v48  ;;  %v527_v17 = vmax.f32 %v493_v21, 0.0  ;;  %v1760_v55 = vshrl.u32 %v1561_v44, 16  ;;  %v1566_v48 = vld [vmem:[#allocation2 + $0x68] sm:$0x1] }
 0x14b   : > { %7529 = vmatmul.mubr.msk.bf16.gmra.mrb[40].mxu0 %vm282_vm1, %v6873_v41  ;;  %v1753_v57 = vrot.slane %v1752_v47, 4  ;;  %v1004_v59 = vshrl.u32 %v7246_v12, 16  ;;  %v1007_v60 = vshll.u32 %v7246_v12, 16  ;;  %v525_v61 = vmax.f32 %v485_v58, 0.0  ;;  %v7823_v7 = vld [vmem:[#allocation2 + $0xa8] sm:$0xff]  }
 0x14c   : > { %v1748_v62 = vsel %vm8034_vm10, %v1743_v51, %v1747_v38  ;;  %v987_v27 = vshrl.u32 %v7244_v54, 16  ;;  %v990_v0 = vshll.u32 %v7244_v54, 16  ;;  %v7247_v37 = vpack.c.bf16 %v527_v17, %v527_v17  ;;  %v7822_v1 = vld [vmem:[#allocation2 + $0x9c] sm:$0xff]   ;;  %v1567_v21 = vld [vmem:[#allocation2 + $0x6c] sm:$0xf] }
 0x14d   : > { %v1758_v32 = vsel %vm8034_vm10, %v1753_v57, %v1757_v40  ;;  %v1006_v2 = vrot.slane %v1004_v59, 7  ;;  %v7245_v4 = vpack.c.bf16 %v525_v61, %v525_v61  ;;  %v1762_v6 = vrot.slane %v1760_v55, 4  ;;  %7511 = vmatmul.mubr.msk.bf16.gmra.mrb[24].mxu1 %vm282_vm1, %v7822_v1  ;;  %v1568_v51 = vld [vmem:[#allocation2 + $0x70] sm:$0xf]  ;;  %v1569_v59 = vld [vmem:[#allocation2 + $0x74] sm:$0x1] }
 0x14e   : > { %v6874_v8 = vcombine.low %v1748_v62, %v1758_v32  ;;  %v989_v9 = vrot.slane %v987_v27, 7  ;;  %v1012_v10 = vshrl.u32 %v7247_v37, 16  ;;  %v1015_v11 = vshll.u32 %v7247_v37, 16  ;;  %7514 = vmatprep.mubr.msk.bf16.mxu1 %vm282_vm1, %v7823_v7 }
 0x14f   : > { %v1009_v14 = vor.u32 %v1007_v60, %v1006_v2  ;;  %v1010_v15 = vrot.slane %v1006_v2, 4  ;;  %v995_v16 = vshrl.u32 %v7245_v4, 16  ;;  %v998_v18 = vshll.u32 %v7245_v4, 16  ;;  %v1570_v4 = vld [vmem:[#allocation2 + $0x78] sm:$0xf] }
 0x150   : > { %7532 = vmatprep.mubr.msk.bf16.mxu0 %vm282_vm1, %v6874_v8  ;;  %v992_v19 = vor.u32 %v990_v0, %v989_v9  ;;  %v993_v20 = vrot.slane %v989_v9, 4  ;;  %v1014_v23 = vrot.slane %v1012_v10, 7  ;;  %v1763_v25 = vshll.u32 %v1561_v44, 16 }
 0x151   : > { %v1177_v26 = vsel %vm8092_vm12, %v1009_v14, %v1176_v63  ;;  %v997_v29 = vrot.slane %v995_v16, 7  ;;  %v1769_v30 = vshll.u32 %v1562_v13, 16  ;;  %v1773_v31 = vshrl.u32 %v1562_v13, 16 }
 0x152   : > { %1178 = vst [vmem:[#allocation2 + $0xc0] sm:$0xf] %v1177_v26  ;;  %v1170_v28 = vsel %vm8092_vm12, %v992_v19, %v1169_v3  ;;  %v1017_v35 = vor.u32 %v1015_v11, %v1014_v23  ;;  %v1019_v34 = vrot.slane %v1014_v23, 4  ;;  %v1765_v22 = vrot.slane %v1763_v25, 5 }
 0x153   : > { %1171 = vst [vmem:[#allocation2 + $0xb4] sm:$0xf] %v1170_v28  ;;  %v1000_v36 = vor.u32 %v998_v18, %v997_v29  ;;  %v1002_v38 = vrot.slane %v997_v29, 4  ;;  %v1771_v39 = vrot.slane %v1769_v30, 5  ;;  %v1775_v40 = vrot.slane %v1773_v31, 4 }
 0x154   : > { %v1018_v44 = vsel %vm8103_vm13, %v1010_v15, %v1017_v35  ;;  %v1181_v45 = vsel %vm7969_vm4, %v1019_v34, %v1180_v24  ;;  %v1766_v46 = vor.u32 %v1765_v22, %v1762_v6  ;;  %v1779_v52 = vshll.u32 %v1563_v56, 16  ;;  %v1571_v15 = vld [vmem:[#allocation2 + $0x7c] sm:$0xf]  ;;  %v1572_v18 = vld [vmem:[#allocation2 + $0x80] sm:$0x1] }
 0x155   : > { %1179 = vst.msk [vmem:[#allocation2 + $0xc4] sm:$0xf] %vm544_vm7, %v1018_v44  ;;  %1182 = vst [vmem:[#allocation2 + $0xc8] sm:$0x1] %v1181_v45  ;;  %v1001_v41 = vsel %vm8103_vm13, %v993_v20, %v1000_v36  ;;  %v1174_v47 = vsel %vm7969_vm4, %v1002_v38, %v1173_v33  ;;  %v1776_v12 = vor.u32 %v1775_v40, %v1771_v39  ;;  %v1784_v58 = vshrl.u32 %v1564_v42, 16 }
 0x156   : > { %1172 = vst.msk [vmem:[#allocation2 + $0xb8] sm:$0xf] %vm544_vm7, %v1001_v41  ;;  %1175 = vst [vmem:[#allocation2 + $0xbc] sm:$0x1] %v1174_v47  ;;  %v1767_v54 = vrot.slane %v1766_v46, 4  ;;  %v1781_v17 = vrot.slane %v1779_v52, 5 }
 0x157   : > { %v1787_v55 = vshll.u32 %v1564_v42, 16  ;;  %v1793_v57 = vshll.u32 %v1565_v43, 16  ;;  %v1777_v60 = vrot.slane %v1776_v12, 4  ;;  %v1786_v61 = vrot.slane %v1784_v58, 4  ;;  %v1573_v34 = vld [vmem:[#allocation2 + $0x84] sm:$0xf] }
 0x158   : > { %v1797_v62 = vshrl.u32 %v1565_v43, 16  ;;  %v1803_v63 = vshll.u32 %v1566_v48, 16  ;;  %v1772_v5 = vsel %vm8034_vm10, %v1767_v54, %v1771_v39  ;;  %v1808_v37 = vshrl.u32 %v1567_v21, 16  ;;  %v1574_v38 = vld [vmem:[#allocation2 + $0x88] sm:$0xf] }
 0x159   : > { %v1789_v27 = vrot.slane %v1787_v55, 5  ;;  %v1795_v0 = vrot.slane %v1793_v57, 5  ;;  %v1782_v1 = vsel %vm8034_vm10, %v1777_v60, %v1781_v17  ;;  %v1811_v3 = vshll.u32 %v1567_v21, 16  ;;  %v1575_v45 = vld [vmem:[#allocation2 + $0x8c] sm:$0x1] }
 0x15a   : > { %v1799_v32 = vrot.slane %v1797_v62, 4  ;;  %v1805_v2 = vrot.slane %v1803_v63, 5  ;;  %v6875_v6 = vcombine.low %v1772_v5, %v1782_v1  ;;  %v1810_v8 = vrot.slane %v1808_v37, 4  ;;  %v1576_v46 = vld [vmem:[#allocation2 + $0x90] sm:$0xf] }
 0x15b   : > { %v1790_v7 = vor.u32 %v1789_v27, %v1786_v61  ;;  %v1817_v9 = vshll.u32 %v1568_v51, 16  ;;  %v1813_v11 = vrot.slane %v1811_v3, 5  ;;  %v1821_v13 = vshrl.u32 %v1568_v51, 16  ;;  %v1577_v47 = vld [vmem:[#allocation2 + $0x94] sm:$0xf] }
 0x15c   : > { %v1800_v10 = vor.u32 %v1799_v32, %v1795_v0  ;;  %v1827_v14 = vshll.u32 %v1569_v59, 16  ;;  %7533 = vmatmul.mubr.msk.bf16.gmra.mrb[44].mxu0 %vm282_vm1, %v6875_v6  ;;  %v1832_v56 = vshrl.u32 %v1570_v4, 16  ;;  %v1835_v19 = vshll.u32 %v1570_v4, 16  ;;  %v1578_v5 = vld [vmem:[#allocation2 + $0x98] sm:$0x1] }
 0x15d   : > { %v1791_v24 = vrot.slane %v1790_v7, 4  ;;  %v1819_v16 = vrot.slane %v1817_v9, 5  ;;  %v1814_v23 = vor.u32 %v1813_v11, %v1810_v8  ;;  %v1823_v25 = vrot.slane %v1821_v13, 4  ;;  %v7824_v29 = vld [vmem:[#allocation2 + $0xb4] sm:$0xff]   ;;  %v8381_v27 = vld [vmem:[%s9605_s3 + $0xa] sm:$0x3] }
 0x15e   : > { %v1801_v20 = vrot.slane %v1800_v10, 4  ;;  %v1829_v26 = vrot.slane %v1827_v14, 5  ;;  %v1834_v31 = vrot.slane %v1832_v56, 4  ;;  %v1837_v28 = vrot.slane %v1835_v19, 5  ;;  %7515 = vmatmul.mubr.msk.bf16.gmra.mrb[28].mxu1 %vm282_vm1, %v7824_v29  ;;  %7796 = vmatprep.subr.msk.bf16.mxu0 %vm331_vm0, %v8381_v27  ;;  %v1580_v8 = vld [vmem:[#allocation2 + $0xa0] sm:$0xf] }
 0x15f   : > { %v1796_v30 = vsel %vm8034_vm10, %v1791_v24, %v1795_v0  ;;  %v1841_v35 = vshll.u32 %v1571_v15, 16  ;;  %v1815_v22 = vrot.slane %v1814_v23, 4  ;;  %v1824_v42 = vor.u32 %v1823_v25, %v1819_v16  ;;  %v1582_v23 = vld [vmem:[#allocation2 + $0xa8] sm:$0xf]  ;;  %v1581_v29 = vld [vmem:[#allocation2 + $0xa4] sm:$0x1] }
 0x160   : > { %v1806_v33 = vsel %vm8034_vm10, %v1801_v20, %v1805_v2  ;;  %v1845_v36 = vshrl.u32 %v1571_v15, 16  ;;  %v1838_v40 = vor.u32 %v1837_v28, %v1834_v31  ;;  %v1851_v44 = vshll.u32 %v1572_v18, 16  ;;  %v1579_v2 = vld [vmem:[#allocation2 + $0x9c] sm:$0xf] }
 0x161   : > { %v6876_v39 = vcombine.low %v1796_v30, %v1806_v33  ;;  %v1843_v43 = vrot.slane %v1841_v35, 5  ;;  %v1820_v52 = vsel %vm8034_vm10, %v1815_v22, %v1819_v16  ;;  %v1825_v48 = vrot.slane %v1824_v42, 4  ;;  %v1583_v22 = vld [vmem:[#allocation2 + $0xac] sm:$0xf] }
 0x162   : > { %v1847_v21 = vrot.slane %v1845_v36, 4  ;;  %v1856_v41 = vshrl.u32 %v1573_v34, 16  ;;  %v1839_v12 = vrot.slane %v1838_v40, 4  ;;  %v1853_v58 = vrot.slane %v1851_v44, 5  ;;  %v2333_v40 = vld [vmem:[#allocation2] sm:$0xe] }
 0x163   : > { %7536 = vmatprep.mubr.msk.bf16.mxu0 %vm282_vm1, %v6876_v39  ;;  %v1859_v51 = vshll.u32 %v1573_v34, 16  ;;  %v1865_v54 = vshll.u32 %v1574_v38, 16  ;;  %v1830_v17 = vsel %vm8034_vm10, %v1825_v48, %v1829_v26  ;;  %v1869_v59 = vshrl.u32 %v1574_v38, 16  ;;  %v2335_v48 = vld [vmem:[#allocation2 + $0x8] sm:$0x1] }
 0x164   : > { %v1848_v55 = vor.u32 %v1847_v21, %v1843_v43  ;;  %v1858_v57 = vrot.slane %v1856_v41, 4  ;;  %v6877_v60 = vcombine.low %v1820_v52, %v1830_v17  ;;  %v1844_v61 = vsel %vm8034_vm10, %v1839_v12, %v1843_v43  ;;  %v2334_v52 = vld [vmem:[#allocation2 + $0x4] sm:$0xf] }
 0x165   : > { %v1861_v62 = vrot.slane %v1859_v51, 5  ;;  %v1867_v63 = vrot.slane %v1865_v54, 5  ;;  %v1871_v37 = vrot.slane %v1869_v59, 4  ;;  %v1875_v1 = vshll.u32 %v1575_v45, 16 }
 0x166   : > { %v1849_v0 = vrot.slane %v1848_v55, 4  ;;  %v1880_v32 = vshrl.u32 %v1576_v46, 16  ;;  %7537 = vmatmul.mubr.msk.bf16.gmra.mrb[48].mxu0 %vm282_vm1, %v6877_v60  ;;  %v1883_v4 = vshll.u32 %v1576_v46, 16  ;;  %v1889_v6 = vshll.u32 %v1577_v47, 16 }
 0x167   : > { %v1862_v3 = vor.u32 %v1861_v62, %v1858_v57  ;;  %v1893_v7 = vshrl.u32 %v1577_v47, 16  ;;  %v1872_v10 = vor.u32 %v1871_v37, %v1867_v63  ;;  %v1877_v11 = vrot.slane %v1875_v1, 5  ;;  %v1584_v47 = vld [vmem:[#allocation2 + $0xb0] sm:$0x1]  ;;  %v2336_v62 = vld [vmem:[#allocation2 + $0xc] sm:$0xe] }
 0x168   : > { %v1854_v9 = vsel %vm8034_vm10, %v1849_v0, %v1853_v58  ;;  %v1882_v13 = vrot.slane %v1880_v32, 4  ;;  %v1885_v24 = vrot.slane %v1883_v4, 5  ;;  %v1891_v16 = vrot.slane %v1889_v6, 5  ;;  %v2337_v1 = vld [vmem:[#allocation2 + $0x10] sm:$0xf] }
 0x169   : > { %v6878_v14 = vcombine.low %v1844_v61, %v1854_v9  ;;  %v1863_v15 = vrot.slane %v1862_v3, 4  ;;  %v1873_v18 = vrot.slane %v1872_v10, 4  ;;  %v1895_v56 = vrot.slane %v1893_v7, 4  ;;  %v2338_v6 = vld [vmem:[#allocation2 + $0x14] sm:$0x1] }
 0x16a   : > { %v1899_v19 = vshll.u32 %v1578_v5, 16  ;;  %v1904_v20 = vshrl.u32 %v1579_v2, 16  ;;  %v1886_v26 = vor.u32 %v1885_v24, %v1882_v13  ;;  %v1907_v30 = vshll.u32 %v1579_v2, 16 }
 0x16b   : > { %7540 = vmatprep.mubr.msk.bf16.mxu0 %vm282_vm1, %v6878_v14  ;;  %v1868_v25 = vsel %vm8034_vm10, %v1863_v15, %v1867_v63  ;;  %v1913_v31 = vshll.u32 %v1580_v8, 16  ;;  %v1878_v28 = vsel %vm8034_vm10, %v1873_v18, %v1877_v11  ;;  %v1896_v35 = vor.u32 %v1895_v56, %v1891_v16 }
 0x16c   : > { %v1901_v34 = vrot.slane %v1899_v19, 5  ;;  %v1906_v33 = vrot.slane %v1904_v20, 4  ;;  %v6879_v42 = vcombine.low %v1868_v25, %v1878_v28  ;;  %v1887_v36 = vrot.slane %v1886_v26, 4  ;;  %v7858_v20 = vld [vmem:[%s9605_s3 + $0x8] sm:$0x3] }
 0x16d   : > { %v1909_v38 = vrot.slane %v1907_v30, 5  ;;  %v1915_v39 = vrot.slane %v1913_v31, 5  ;;  %v1897_v43 = vrot.slane %v1896_v35, 4  ;;  %v1917_v44 = vshrl.u32 %v1580_v8, 16  ;;  %v1586_v25 = vld [vmem:[#allocation2 + $0xb8] sm:$0xf] }
 0x16e   : > { %v1923_v45 = vshll.u32 %v1581_v29, 16  ;;  %v1928_v46 = vshrl.u32 %v1582_v23, 16  ;;  %7541 = vmatmul.mubr.msk.bf16.gmra.mrb[52].mxu0 %vm282_vm1, %v6879_v42  ;;  %v1892_v21 = vsel %vm8034_vm10, %v1887_v36, %v1891_v16  ;;  %v1931_v12 = vshll.u32 %v1582_v23, 16  ;;  %v1585_v16 = vld [vmem:[#allocation2 + $0xb4] sm:$0xf] }
 0x16f   : > { %v1910_v41 = vor.u32 %v1909_v38, %v1906_v33  ;;  %v1937_v58 = vshll.u32 %v1583_v22, 16  ;;  %v1902_v51 = vsel %vm8034_vm10, %v1897_v43, %v1901_v34  ;;  %v1919_v54 = vrot.slane %v1917_v44, 4  ;;  %v1587_v26 = vld [vmem:[#allocation2 + $0xbc] sm:$0x1]  ;;  %v2339_v35 = vld [vmem:[#allocation2 + $0x18] sm:$0xe] }
 0x170   : > { %v1925_v17 = vrot.slane %v1923_v45, 5  ;;  %v1930_v55 = vrot.slane %v1928_v46, 4  ;;  %v6880_v57 = vcombine.low %v1892_v21, %v1902_v51  ;;  %v1933_v60 = vrot.slane %v1931_v12, 5  ;;  %v2340_v34 = vld [vmem:[#allocation2 + $0x1c] sm:$0xf] }
 0x171   : > { %v1911_v59 = vrot.slane %v1910_v41, 4  ;;  %v1939_v61 = vrot.slane %v1937_v58, 5  ;;  %v1920_v63 = vor.u32 %v1919_v54, %v1915_v39  ;;  %v1941_v5 = vshrl.u32 %v1583_v22, 16  ;;  %v2341_v33 = vld [vmem:[#allocation2 + $0x20] sm:$0x1] }
 0x172   : > { %v1947_v0 = vshll.u32 %v1584_v47, 16  ;;  %v6900_v37 = vrot.slane %v2333_v40, 9  ;;  %7544 = vmatprep.mubr.msk.bf16.mxu0 %vm282_vm1, %v6880_v57  ;;  %v1934_v2 = vor.u32 %v1933_v60, %v1930_v55  ;;  %v2434_v3 = vrot.slane %v2334_v52, 5  ;;  %v2343_v40 = vld [vmem:[#allocation2 + $0x28] sm:$0xf] }
 0x173   : > { %v1916_v32 = vsel %vm8034_vm10, %v1911_v59, %v1915_v39  ;;  %v2437_v4 = vrot.slane %v2335_v48, 5  ;;  %v1921_v7 = vrot.slane %v1920_v63, 4  ;;  %v1943_v8 = vrot.slane %v1941_v5, 4  ;;  %v2342_v39 = vld [vmem:[#allocation2 + $0x24] sm:$0xe] }
 0x174   : > { %v1949_v9 = vrot.slane %v1947_v0, 5  ;;  %v6901_v11 = vrot.slane %v2336_v62, 9  ;;  %v1935_v13 = vrot.slane %v1934_v2, 4  ;;  %v2435_v14 = vsel %vm8403_vm2, %v6900_v37, %v2434_v3  ;;  %v2344_v52 = vld [vmem:[#allocation2 + $0x2c] sm:$0x1] }
 0x175   : > { %v2436_v15 = vrot.slane %v2434_v3, 4  ;;  %v2441_v24 = vrot.slane %v2337_v1, 5  ;;  %v1926_v18 = vsel %vm8034_vm10, %v1921_v7, %v1925_v17  ;;  %v1944_v56 = vor.u32 %v1943_v8, %v1939_v61  ;;  %v2345_v12 = vld [vmem:[#allocation2 + $0x30] sm:$0xe]  ;;  %v2346_v58 = vld [vmem:[#allocation2 + $0x34] sm:$0xf] }
 0x176   : > { %v2444_v19 = vrot.slane %v2338_v6, 5  ;;  %v3855_v23 = vsel %vm331_vm0, %v7858_v20, 0  ;;  %v6881_v29 = vcombine.low %v1916_v32, %v1926_v18  ;;  %v1940_v30 = vsel %vm8034_vm10, %v1935_v13, %v1939_v61  ;;  %v2347_v57 = vld [vmem:[#allocation2 + $0x38] sm:$0x1]  ;;  %v2348_v59 = vld [vmem:[#allocation2 + $0x3c] sm:$0xe] }
 0x177   : > { %v2438_v31 = vsel %vm8403_vm2, %v2436_v15, %v2437_v4  ;;  %v2442_v28 = vsel %vm8403_vm2, %v6901_v11, %v2441_v24  ;;  %v1945_v22 = vrot.slane %v1944_v56, 4  ;;  %v2443_v36 = vrot.slane %v2441_v24, 4  ;;  %v8430_v5 = vld [vmem:[%s9605_s3 + $0xc] sm:$0x3]  ;;  %v2349_v2 = vld [vmem:[#allocation2 + $0x40] sm:$0xf] }
 0x178   : > { %v6917_v42 = vcombine.low %v2435_v14, %v2438_v31  ;;  %v1952_v38 = vshrl.u32 %v1585_v16, 16  ;;  %7545 = vmatmul.mubr.msk.bf16.gmra.mrb[56].mxu0 %vm282_vm1, %v6881_v29  ;;  %v1955_v43 = vshll.u32 %v1585_v16, 16  ;;  %v1961_v44 = vshll.u32 %v1586_v25, 16  ;;  %v2350_v8 = vld [vmem:[#allocation2 + $0x44] sm:$0x1] }
 0x179   : > { %v1965_v45 = vshrl.u32 %v1586_v25, 16  ;;  %v1971_v46 = vshll.u32 %v1587_v26, 16  ;;  %v1950_v48 = vsel %vm8034_vm10, %v1945_v22, %v1949_v9  ;;  %v2445_v21 = vsel %vm8403_vm2, %v2443_v36, %v2444_v19  ;;  %v2351_v9 = vld [vmem:[#allocation2 + $0x48] sm:$0xe]  ;;  %v2352_v24 = vld [vmem:[#allocation2 + $0x4c] sm:$0xf] }
 0x17a   : > { %7554 = vmatprep.mubr.msk.bf16.mxu1 %vm282_vm1, %v6917_v42  ;;  %v1954_v41 = vrot.slane %v1952_v38, 4  ;;  %v6902_v47 = vrot.slane %v2339_v35, 9  ;;  %v6882_v51 = vcombine.low %v1940_v30, %v1950_v48  ;;  %v6918_v54 = vcombine.low %v2442_v28, %v2445_v21  ;;  %v2353_v20 = vld [vmem:[#allocation2 + $0x50] sm:$0x1]  ;;  %v2354_v30 = vld [vmem:[#allocation2 + $0x54] sm:$0xe] }
 0x17b   : > { %v1957_v17 = vrot.slane %v1955_v43, 5  ;;  %v1963_v55 = vrot.slane %v1961_v44, 5  ;;  %v1967_v60 = vrot.slane %v1965_v45, 4  ;;  %v1973_v61 = vrot.slane %v1971_v46, 5  ;;  %v2355_v31 = vld [vmem:[#allocation2 + $0x58] sm:$0xf] }
 0x17c   : > { %v2448_v62 = vrot.slane %v2340_v34, 5  ;;  %v2451_v63 = vrot.slane %v2341_v33, 5  ;;  %7548 = vmatprep.mubr.msk.bf16.mxu0 %vm282_vm1, %v6882_v51  ;;  %7555 = vmatmul.mubr.msk.bf16.vlgmr.msra.gmra.mrb[32].mxu1 %vm282_vm1, %v6918_v54  ;;  %v6903_v37 = vrot.slane %v2342_v39, 9  ;;  %v2455_v1 = vrot.slane %v2343_v40, 5  ;;  %v2356_v28 = vld [vmem:[#allocation2 + $0x5c] sm:$0x1] }
 0x17d   : > { %v1958_v0 = vor.u32 %v1957_v17, %v1954_v41  ;;  %v2458_v32 = vrot.slane %v2344_v52, 5  ;;  %7621 = vmatpush3.bf16.msra.mxu1 %v3855_v23  ;;  %v1968_v3 = vor.u32 %v1967_v60, %v1963_v55  ;;  %v6904_v7 = vrot.slane %v2345_v12, 9  ;;  %v2357_v42 = vld [vmem:[#allocation2 + $0x60] sm:$0xe]  ;;  %v2358_v36 = vld [vmem:[#allocation2 + $0x64] sm:$0xf] }
 0x17e   : > { %v2449_v4 = vsel %vm8403_vm2, %v6902_v47, %v2448_v62  ;;  %v2450_v6 = vrot.slane %v2448_v62, 4  ;;  %v2456_v13 = vsel %vm8403_vm2, %v6903_v37, %v2455_v1  ;;  %v2457_v14 = vrot.slane %v2455_v1, 4  ;;  %7797 = vmatprep.subr.msk.bf16.mxu1 %vm331_vm0, %v8430_v5  ;;  %v7825_v39 = vld [vmem:[#allocation2 + $0xc] sm:$0xff]   ;;  %v2359_v45 = vld [vmem:[#allocation2 + $0x68] sm:$0x1] }
 0x17f   : > { %v1959_v11 = vrot.slane %v1958_v0, 4  ;;  %v2462_v15 = vrot.slane %v2346_v58, 5  ;;  %v1969_v16 = vrot.slane %v1968_v3, 4  ;;  %v2465_v56 = vrot.slane %v2347_v57, 5  ;;  %v2360_v41 = vld [vmem:[#allocation2 + $0x6c] sm:$0xe] }
 0x180   : > { %v2452_v18 = vsel %vm8403_vm2, %v2450_v6, %v2451_v63  ;;  %v6905_v19 = vrot.slane %v2348_v59, 9  ;;  %v2459_v26 = vsel %vm8403_vm2, %v2457_v14, %v2458_v32  ;;  %v2469_v22 = vrot.slane %v2349_v2, 5  ;;  %v2361_v47 = vld [vmem:[#allocation2 + $0x70] sm:$0xf]  ;;  %v2362_v17 = vld [vmem:[#allocation2 + $0x74] sm:$0x1] }
 0x181   : > { %v1964_v23 = vsel %vm8034_vm10, %v1959_v11, %v1963_v55  ;;  %v6919_v25 = vcombine.low %v2449_v4, %v2452_v18  ;;  %v2463_v29 = vsel %vm8403_vm2, %v6904_v7, %v2462_v15  ;;  %v1974_v35 = vsel %vm8034_vm10, %v1969_v16, %v1973_v61  ;;  %v2363_v55 = vld [vmem:[#allocation2 + $0x78] sm:$0xe]  ;;  %v2364_v62 = vld [vmem:[#allocation2 + $0x7c] sm:$0xf]  ;;  %v2365_v32 = vld [vmem:[#allocation2 + $0x80] sm:$0x1] }
 0x182   : > { %v6920_v34 = vcombine.low %v2456_v13, %v2459_v26  ;;  %v2464_v33 = vrot.slane %v2462_v15, 4  ;;  %v6883_v38 = vcombine.low %v1964_v23, %v1974_v35  ;;  %v2472_v40 = vrot.slane %v2350_v8, 5  ;;  %v2366_v2 = vld [vmem:[#allocation2 + $0x84] sm:$0xe]  ;;  %v2367_v8 = vld [vmem:[#allocation2 + $0x88] sm:$0xf] }
 0x183   : > { %7558 = vmatprep.mubr.msk.bf16.mxu1 %vm282_vm1, %v6919_v25  ;;  %v6906_v43 = vrot.slane %v2351_v9, 9  ;;  %v2476_v44 = vrot.slane %v2352_v24, 5  ;;  %v2470_v52 = vsel %vm8403_vm2, %v6905_v19, %v2469_v22  ;;  %v2471_v48 = vrot.slane %v2469_v22, 4  ;;  %v2368_v9 = vld [vmem:[#allocation2 + $0x8c] sm:$0x1]  ;;  %v7826_v16 = vld [vmem:[#allocation2 + $0x18] sm:$0xff]  }
 0x184   : > { %v2466_v46 = vsel %vm8403_vm2, %v2464_v33, %v2465_v56  ;;  %v2479_v21 = vrot.slane %v2353_v20, 5  ;;  %7549 = vmatmul.mubr.msk.bf16.gmra.mrb[60].mxu0 %vm282_vm1, %v6883_v38  ;;  %7559 = vmatmul.mubr.msk.bf16.gmra.mrb[36].mxu1 %vm282_vm1, %v6920_v34  ;;  %v6907_v54 = vrot.slane %v2354_v30, 9  ;;  %v2483_v59 = vrot.slane %v2355_v31, 5  ;;  %v2369_v24 = vld [vmem:[#allocation2 + $0x90] sm:$0xe]  ;;  %v7827_v25 = vld [vmem:[#allocation2 + $0x24] sm:$0xff]  }
 0x185   : > { %v6921_v12 = vcombine.low %v2463_v29, %v2466_v46  ;;  %v2477_v58 = vsel %vm8403_vm2, %v6906_v43, %v2476_v44  ;;  %v2478_v51 = vrot.slane %v2476_v44, 4  ;;  %7588 = vmatprep.mubr.msk.bf16.mxu0 %vm282_vm1, %v7825_v39  ;;  %v2473_v57 = vsel %vm8403_vm2, %v2471_v48, %v2472_v40  ;;  %v2370_v23 = vld [vmem:[#allocation2 + $0x94] sm:$0xf]  ;;  %v2372_v35 = vld [vmem:[#allocation2 + $0x9c] sm:$0xe] }
 0x186   : > { %v2486_v60 = vrot.slane %v2356_v28, 5  ;;  %v6908_v61 = vrot.slane %v2357_v42, 9  ;;  %v6922_v63 = vcombine.low %v2470_v52, %v2473_v57  ;;  %v2490_v37 = vrot.slane %v2358_v36, 5  ;;  %v2371_v28 = vld [vmem:[#allocation2 + $0x98] sm:$0x1] }
 0x187   : > { %7562 = vmatprep.mubr.msk.bf16.mxu1 %vm282_vm1, %v6921_v12  ;;  %v2480_v0 = vsel %vm8403_vm2, %v2478_v51, %v2479_v21  ;;  %v2493_v1 = vrot.slane %v2359_v45, 5  ;;  %v8467_v4 = vsel %vm8403_vm2, %v6907_v54, %v2483_v59  ;;  %v2485_v6 = vrot.slane %v2483_v59, 4  ;;  %v2373_v36 = vld [vmem:[#allocation2 + $0xa0] sm:$0xf]  ;;  %v2374_v38 = vld [vmem:[#allocation2 + $0xa4] sm:$0x1] }
 0x188   : > { %v6923_v3 = vcombine.low %v2477_v58, %v2480_v0  ;;  %v6909_v7 = vrot.slane %v2360_v41, 9  ;;  %v8471_v11 = vsel %vm8403_vm2, %v6908_v61, %v2490_v37  ;;  %v2492_v13 = vrot.slane %v2490_v37, 4  ;;  %v2375_v45 = vld [vmem:[#allocation2 + $0xa8] sm:$0xe]  ;;  %v2376_v41 = vld [vmem:[#allocation2 + $0xac] sm:$0xf] }
 0x189   : > { %v2497_v14 = vrot.slane %v2361_v47, 5  ;;  %v2500_v15 = vrot.slane %v2362_v17, 5  ;;  %v8475_v18 = vsel %vm8403_vm2, %v2485_v6, %v2486_v60  ;;  %v6910_v56 = vrot.slane %v2363_v55, 9  ;;  %v2377_v47 = vld [vmem:[#allocation2 + $0xb0] sm:$0x1] }
 0x18a   : > { %v2504_v19 = vrot.slane %v2364_v62, 5  ;;  %v2507_v20 = vrot.slane %v2365_v32, 5  ;;  %v6924_v26 = vcombine.low %v8467_v4, %v8475_v18  ;;  %v8481_v29 = vsel %vm8403_vm2, %v2492_v13, %v2493_v1  ;;  %v2378_v17 = vld [vmem:[#allocation2 + $0xb4] sm:$0xe]  ;;  %v2379_v61 = vld [vmem:[#allocation2 + $0xb8] sm:$0xf] }
 0x18b   : > { %v8485_v30 = vsel %vm8403_vm2, %v6909_v7, %v2497_v14  ;;  %v2499_v31 = vrot.slane %v2497_v14, 4  ;;  %v6925_v34 = vcombine.low %v8471_v11, %v8481_v29  ;;  %v6911_v42 = vrot.slane %v2366_v2, 9  ;;  %v2380_v1 = vld [vmem:[#allocation2 + $0xbc] sm:$0x1]  ;;  %v3324_v6 = vld [vmem:[#allocation2 + $0xc] sm:$0xf] }
 0x18c   : > { %v8491_v33 = vsel %vm8403_vm2, %v6910_v56, %v2504_v19  ;;  %v2506_v22 = vrot.slane %v2504_v19, 4  ;;  %7589 = vmatmul.mubr.msk.bf16.vlgmr.msra.gmra.mrb[64].mxu0 %vm282_vm1, %v7826_v16  ;;  %7563 = vmatmul.mubr.msk.bf16.gmra.mrb[40].mxu1 %vm282_vm1, %v6922_v63  ;;  %v2511_v40 = vrot.slane %v2367_v8, 5  ;;  %v2514_v43 = vrot.slane %v2368_v9, 5  ;;  %v7828_v7 = vld [vmem:[#allocation2 + $0x30] sm:$0xff]   ;;  %v3327_v29 = vld [vmem:[#allocation2 + $0x18] sm:$0xf] }
 0x18d   : > { %v8497_v39 = vsel %vm8403_vm2, %v2499_v31, %v2500_v15  ;;  %v6912_v44 = vrot.slane %v2369_v24, 9  ;;  %7592 = vmatprep.mubr.msk.bf16.mxu0 %vm282_vm1, %v7827_v25  ;;  %7566 = vmatprep.mubr.msk.bf16.mxu1 %vm282_vm1, %v6923_v3  ;;  %v2518_v48 = vrot.slane %v2370_v23, 5  ;;  %v2521_v21 = vrot.slane %v2371_v28, 5  ;;  %v3325_v14 = vld [vmem:[#allocation2 + $0x10] sm:$0xf]  ;;  %v7829_v15 = vld [vmem:[#allocation2 + $0x3c] sm:$0xff]  }
 0x18e   : > { %v6926_v46 = vcombine.low %v8485_v30, %v8497_v39  ;;  %v8505_v52 = vsel %vm8403_vm2, %v2506_v22, %v2507_v20  ;;  %v8511_v58 = vsel %vm8403_vm2, %v6911_v42, %v2511_v40  ;;  %v2513_v51 = vrot.slane %v2511_v40, 4  ;;  %v3326_v19 = vld [vmem:[#allocation2 + $0x14] sm:$0x1]  ;;  %v3328_v40 = vld [vmem:[#allocation2 + $0x1c] sm:$0xf] }
 0x18f   : > { %v6927_v12 = vcombine.low %v8491_v33, %v8505_v52  ;;  %v6913_v54 = vrot.slane %v2372_v35, 9  ;;  %v8515_v55 = vsel %vm8403_vm2, %v6912_v44, %v2518_v48  ;;  %v2520_v57 = vrot.slane %v2518_v48, 4  ;;  %v4116_v39 = vld [vmem:[#allocation2 + $0x14] sm:$0x1] }
 0x190   : > { %v2525_v59 = vrot.slane %v2373_v36, 5  ;;  %v2528_v60 = vrot.slane %v2374_v38, 5  ;;  %v8519_v62 = vsel %vm8403_vm2, %v2513_v51, %v2514_v43  ;;  %v6914_v63 = vrot.slane %v2375_v45, 9 }
 0x191   : > { %v2532_v0 = vrot.slane %v2376_v41, 5  ;;  %v2535_v37 = vrot.slane %v2377_v47, 5  ;;  %v6928_v32 = vcombine.low %v8511_v58, %v8519_v62  ;;  %v8525_v2 = vsel %vm8403_vm2, %v2520_v57, %v2521_v21 }
 0x192   : > { %v8529_v3 = vsel %vm8403_vm2, %v6913_v54, %v2525_v59  ;;  %v2527_v4 = vrot.slane %v2525_v59, 4  ;;  %v6929_v8 = vcombine.low %v8515_v55, %v8525_v2  ;;  %v4421_v13 = vsel %vm331_vm0, %v8381_v27, 0  ;;  %v3330_v54 = vld [vmem:[#allocation2 + $0x24] sm:$0xf] }
 0x193   : > { %v8535_v9 = vsel %vm8403_vm2, %v6914_v63, %v2532_v0  ;;  %v2534_v11 = vrot.slane %v2532_v0, 4  ;;  %7655 = vmatpush3.bf16.msra.mxu0 %v4421_v13  ;;  %v6915_v16 = vrot.slane %v2378_v17, 9  ;;  %v2539_v18 = vrot.slane %v2379_v61, 5  ;;  %v3331_v61 = vld [vmem:[#allocation2 + $0x28] sm:$0xf] }
 0x194   : > { %v8541_v24 = vsel %vm8403_vm2, %v2527_v4, %v2528_v60  ;;  %v2542_v56 = vrot.slane %v2380_v1, 5  ;;  %7593 = vmatmul.mubr.msk.bf16.gmra.mrb[68].mxu0 %vm282_vm1, %v7828_v7  ;;  %7567 = vmatmul.mubr.msk.bf16.gmra.mrb[44].mxu1 %vm282_vm1, %v6924_v26  ;;  %v3373_v23 = vshrl.u32 %v3324_v6, 16  ;;  %v3376_v25 = vshll.u32 %v3324_v6, 16  ;;  %v7830_v63 = vld [vmem:[#allocation2 + $0x48] sm:$0xff]   ;;  %v7831_v7 = vld [vmem:[#allocation2 + $0x54] sm:$0xff]  }
 0x195   : > { %v6930_v20 = vcombine.low %v8529_v3, %v8541_v24  ;;  %v8549_v27 = vsel %vm8403_vm2, %v2534_v11, %v2535_v37  ;;  %7596 = vmatprep.mubr.msk.bf16.mxu0 %vm282_vm1, %v7829_v15  ;;  %7570 = vmatprep.mubr.msk.bf16.mxu1 %vm282_vm1, %v6925_v34  ;;  %v8557_v26 = vsel %vm8403_vm2, %v6915_v16, %v2539_v18  ;;  %v2541_v28 = vrot.slane %v2539_v18, 4  ;;  %v3329_v34 = vld [vmem:[#allocation2 + $0x20] sm:$0x1]  ;;  %v3332_v6 = vld [vmem:[#allocation2 + $0x2c] sm:$0x1] }
 0x196   : > { %v6931_v31 = vcombine.low %v8535_v9, %v8549_v27  ;;  %v3382_v35 = vshll.u32 %v3325_v14, 16  ;;  %v3375_v22 = vrot.slane %v3373_v23, 4  ;;  %v3378_v42 = vrot.slane %v3376_v25, 5  ;;  %v4114_v16 = vld [vmem:[#allocation2 + $0xc] sm:$0xe] }
 0x197   : > { %v3386_v36 = vshrl.u32 %v3325_v14, 16  ;;  %v3392_v38 = vshll.u32 %v3326_v19, 16  ;;  %v8561_v43 = vsel %vm8403_vm2, %v2541_v28, %v2542_v56  ;;  %v3397_v45 = vshrl.u32 %v3327_v29, 16  ;;  %v4115_v23 = vld [vmem:[#allocation2 + $0x10] sm:$0xf] }
 0x198   : > { %v3384_v44 = vrot.slane %v3382_v35, 5  ;;  %v3400_v48 = vshll.u32 %v3327_v29, 16  ;;  %v6932_v21 = vcombine.low %v8557_v26, %v8561_v43  ;;  %v3379_v41 = vor.u32 %v3378_v42, %v3375_v22 }
 0x199   : > { %v3388_v47 = vrot.slane %v3386_v36, 4  ;;  %v3394_v51 = vrot.slane %v3392_v38, 5  ;;  %v3399_v17 = vrot.slane %v3397_v45, 4  ;;  %v3406_v59 = vshll.u32 %v3328_v40, 16  ;;  %v3333_v36 = vld [vmem:[#allocation2 + $0x30] sm:$0xf] }
 0x19a   : > { %v3402_v57 = vrot.slane %v3400_v48, 5  ;;  %v3410_v60 = vshrl.u32 %v3328_v40, 16  ;;  %v3380_v0 = vrot.slane %v3379_v41, 4  ;;  %v3416_v1 = vshll.u32 %v3329_v34, 16  ;;  %v3334_v48 = vld [vmem:[#allocation2 + $0x34] sm:$0xf] }
 0x19b   : > { %v3389_v37 = vor.u32 %v3388_v47, %v3384_v44  ;;  %v8567_v4 = vsel %vm331_vm0, %v8430_v5, 0  ;;  %v3408_v13 = vrot.slane %v3406_v59, 5  ;;  %v3421_v15 = vshrl.u32 %v3330_v54, 16  ;;  %v7832_v41 = vld [vmem:[#allocation2 + $0x60] sm:$0xff]  }
 0x19c   : > { %v3403_v11 = vor.u32 %v3402_v57, %v3399_v17  ;;  %v3412_v14 = vrot.slane %v3410_v60, 4  ;;  %7597 = vmatmul.mubr.msk.bf16.gmra.mrb[72].mxu0 %vm282_vm1, %v7830_v63  ;;  %7571 = vmatmul.mubr.msk.bf16.gmra.mrb[48].mxu1 %vm282_vm1, %v6926_v46  ;;  %v3385_v18 = vsel %vm8034_vm10, %v3380_v0, %v3384_v44  ;;  %v3418_v5 = vrot.slane %v3416_v1, 5  ;;  %v3336_v0 = vld [vmem:[#allocation2 + $0x3c] sm:$0xf] }
 0x19d   : > { %v3390_v56 = vrot.slane %v3389_v37, 4  ;;  %v3424_v19 = vshll.u32 %v3330_v54, 16  ;;  %7600 = vmatprep.mubr.msk.bf16.mxu0 %vm282_vm1, %v7831_v7  ;;  %7574 = vmatprep.mubr.msk.bf16.mxu1 %vm282_vm1, %v6927_v12  ;;  %v3423_v28 = vrot.slane %v3421_v15, 4  ;;  %v3430_v30 = vshll.u32 %v3331_v61, 16  ;;  %v7833_v37 = vld [vmem:[#allocation2 + $0x6c] sm:$0xff]  }
 0x19e   : > { %v3404_v25 = vrot.slane %v3403_v11, 4  ;;  %v3413_v29 = vor.u32 %v3412_v14, %v3408_v13  ;;  %v3434_v22 = vshrl.u32 %v3331_v61, 16  ;;  %v3440_v42 = vshll.u32 %v3332_v6, 16  ;;  %v3335_v61 = vld [vmem:[#allocation2 + $0x38] sm:$0x1] }
 0x19f   : > { %v3395_v46 = vsel %vm8034_vm10, %v3390_v56, %v3394_v51  ;;  %v3426_v35 = vrot.slane %v3424_v19, 5  ;;  %v3432_v52 = vrot.slane %v3430_v30, 5  ;;  %v7015_v45 = vrot.slane %v4114_v16, 9  ;;  %v3338_v56 = vld [vmem:[#allocation2 + $0x44] sm:$0x1] }
 0x1a0   : > { %v8583_v38 = vcombine.low %v3385_v18, %v3395_v46  ;;  %v3409_v40 = vsel %vm8034_vm10, %v3404_v25, %v3408_v13  ;;  %v3414_v33 = vrot.slane %v3413_v29, 4  ;;  %v3436_v44 = vrot.slane %v3434_v22, 4  ;;  %v3337_v13 = vld [vmem:[#allocation2 + $0x40] sm:$0xf]  ;;  %v8614_v19 = vld [vmem:[%s9605_s3 + $0xe] sm:$0x3] }
 0x1a1   : > { %v3427_v12 = vor.u32 %v3426_v35, %v3423_v28  ;;  %v3442_v34 = vrot.slane %v3440_v42, 5  ;;  %v4212_v51 = vrot.slane %v4115_v23, 5  ;;  %v4215_v54 = vrot.slane %v4116_v39, 5  ;;  %v4117_v25 = vld [vmem:[#allocation2 + $0x18] sm:$0xe]  ;;  %7798 = vmatprep.subr.msk.bf16.mxu0 %vm331_vm0, %v8614_v19 }
 0x1a2   : > { %v3419_v47 = vsel %vm8034_vm10, %v3414_v33, %v3418_v5  ;;  %v3445_v17 = vshrl.u32 %v3333_v36, 16  ;;  %v3437_v60 = vor.u32 %v3436_v44, %v3432_v52  ;;  %v3448_v63 = vshll.u32 %v3333_v36, 16  ;;  %v4118_v29 = vld [vmem:[#allocation2 + $0x1c] sm:$0xf]  ;;  %v4119_v35 = vld [vmem:[#allocation2 + $0x20] sm:$0x1] }
 0x1a3   : > { %v8589_v57 = vcombine.low %v3409_v40, %v3419_v47  ;;  %v3428_v59 = vrot.slane %v3427_v12, 4  ;;  %v8593_v1 = vsel %vm8403_vm2, %v7015_v45, %v4212_v51  ;;  %v4214_v6 = vrot.slane %v4212_v51, 4  ;;  %v4120_v22 = vld [vmem:[#allocation2 + $0x24] sm:$0xe]  ;;  %v7834_v42 = vld [vmem:[#allocation2 + $0x78] sm:$0xff]  }
 0x1a4   : > { %v3447_v7 = vrot.slane %v3445_v17, 4  ;;  %v3454_v11 = vshll.u32 %v3334_v48, 16  ;;  %7601 = vmatmul.mubr.msk.bf16.gmra.mrb[76].mxu0 %vm282_vm1, %v7832_v41  ;;  %7575 = vmatmul.mubr.msk.bf16.gmra.mrb[52].mxu1 %vm282_vm1, %v6928_v32  ;;  %v3438_v15 = vrot.slane %v3437_v60, 4  ;;  %v3450_v16 = vrot.slane %v3448_v63, 5  ;;  %v4121_v12 = vld [vmem:[#allocation2 + $0x28] sm:$0xf] }
 0x1a5   : > { %v3433_v14 = vsel %vm8034_vm10, %v3428_v59, %v3432_v52  ;;  %v3458_v18 = vshrl.u32 %v3334_v48, 16  ;;  %7604 = vmatprep.mubr.msk.bf16.mxu0 %vm282_vm1, %v7833_v37  ;;  %7578 = vmatprep.mubr.msk.bf16.mxu1 %vm282_vm1, %v6929_v8  ;;  %v8609_v5 = vsel %vm8403_vm2, %v4214_v6, %v4215_v54  ;;  %v3464_v62 = vshll.u32 %v3335_v61, 16  ;;  %v4122_v41 = vld [vmem:[#allocation2 + $0x2c] sm:$0x1]  ;;  %v7835_v47 = vld [vmem:[#allocation2 + $0x84] sm:$0xff]  }
 0x1a6   : > { %v3456_v58 = vrot.slane %v3454_v11, 5  ;;  %v3469_v32 = vshrl.u32 %v3336_v0, 16  ;;  %v3443_v23 = vsel %vm8034_vm10, %v3438_v15, %v3442_v34  ;;  %v7032_v55 = vcombine.low %v8593_v1, %v8609_v5  ;;  %v3339_v60 = vld [vmem:[#allocation2 + $0x48] sm:$0xf]  ;;  %v3341_v15 = vld [vmem:[#allocation2 + $0x50] sm:$0x1] }
 0x1a7   : > { %v3451_v2 = vor.u32 %v3450_v16, %v3447_v7  ;;  %v3460_v8 = vrot.slane %v3458_v18, 4  ;;  %v8622_v28 = vcombine.low %v3433_v14, %v3443_v23  ;;  %v3466_v30 = vrot.slane %v3464_v62, 5  ;;  %v3340_v14 = vld [vmem:[#allocation2 + $0x4c] sm:$0xf]  ;;  %v3342_v18 = vld [vmem:[#allocation2 + $0x54] sm:$0xf] }
 0x1a8   : > { %v3471_v39 = vrot.slane %v3469_v32, 4  ;;  %v3472_v46 = vshll.u32 %v3336_v0, 16  ;;  %v3478_v33 = vshll.u32 %v3337_v13, 16  ;;  %v3482_v52 = vshrl.u32 %v3337_v13, 16  ;;  %v3343_v23 = vld [vmem:[#allocation2 + $0x58] sm:$0xf] }
 0x1a9   : > { %v3452_v36 = vrot.slane %v3451_v2, 4  ;;  %v3461_v40 = vor.u32 %v3460_v8, %v3456_v58  ;;  %v3488_v34 = vshll.u32 %v3338_v56, 16  ;;  %v7016_v45 = vrot.slane %v4117_v25, 9  ;;  %v7836_v8 = vld [vmem:[#allocation2 + $0x90] sm:$0xff]  }
 0x1aa   : > { %v3474_v44 = vrot.slane %v3472_v46, 5  ;;  %v4219_v48 = vrot.slane %v4118_v29, 5  ;;  %v3480_v17 = vrot.slane %v3478_v33, 5  ;;  %v3484_v59 = vrot.slane %v3482_v52, 4  ;;  %v3344_v46 = vld [vmem:[#allocation2 + $0x5c] sm:$0x1] }
 0x1ab   : > { %v3457_v51 = vsel %vm8034_vm10, %v3452_v36, %v3456_v58  ;;  %v3462_v54 = vrot.slane %v3461_v40, 4  ;;  %v3490_v63 = vrot.slane %v3488_v34, 5  ;;  %v4222_v11 = vrot.slane %v4119_v35, 5  ;;  %v7837_v35 = vld [vmem:[#allocation2 + $0x9c] sm:$0xff]   ;;  %v4123_v33 = vld [vmem:[#allocation2 + $0x30] sm:$0xe] }
 0x1ac   : > { %v3475_v61 = vor.u32 %v3474_v44, %v3471_v39  ;;  %v8628_v0 = vsel %vm8403_vm2, %v7016_v45, %v4219_v48  ;;  %v4221_v37 = vrot.slane %v4219_v48, 4  ;;  %7605 = vmatmul.mubr.msk.bf16.gmra.mrb[80].mxu0 %vm282_vm1, %v7834_v42  ;;  %7579 = vmatmul.mubr.msk.bf16.gmra.mrb[56].mxu1 %vm282_vm1, %v6930_v20  ;;  %v3485_v7 = vor.u32 %v3484_v59, %v3480_v17  ;;  %v4124_v52 = vld [vmem:[#allocation2 + $0x34] sm:$0xf]  ;;  %v4125_v48 = vld [vmem:[#allocation2 + $0x38] sm:$0x1] }
 0x1ad   : > { %v3467_v6 = vsel %vm8034_vm10, %v3462_v54, %v3466_v30  ;;  %v7017_v13 = vrot.slane %v4120_v22, 9  ;;  %7608 = vmatprep.mubr.msk.bf16.mxu0 %vm282_vm1, %v7835_v47  ;;  %7582 = vmatprep.mubr.msk.bf16.mxu1 %vm282_vm1, %v6931_v31  ;;  %v4226_v24 = vrot.slane %v4121_v12, 5  ;;  %v4229_v20 = vrot.slane %v4122_v41, 5  ;;  %v4126_v41 = vld [vmem:[#allocation2 + $0x3c] sm:$0xe] }
 0x1ae   : > { %v8642_v16 = vcombine.low %v3457_v51, %v3467_v6  ;;  %v3476_v3 = vrot.slane %v3475_v61, 4  ;;  %v3486_v56 = vrot.slane %v3485_v7, 4  ;;  %v8646_v58 = vsel %vm8403_vm2, %v4221_v37, %v4222_v11  ;;  %v4127_v59 = vld [vmem:[#allocation2 + $0x40] sm:$0xf]  ;;  %v4128_v6 = vld [vmem:[#allocation2 + $0x44] sm:$0x1] }
 0x1af   : > { %v3493_v62 = vshrl.u32 %v3339_v60, 16  ;;  %v3496_v32 = vshll.u32 %v3339_v60, 16  ;;  %v7033_v9 = vcombine.low %v8628_v0, %v8646_v58  ;;  %v8654_v27 = vsel %vm8403_vm2, %v7017_v13, %v4226_v24 }
 0x1b0   : > { %v3481_v2 = vsel %vm8034_vm10, %v3476_v3, %v3480_v17  ;;  %v4228_v31 = vrot.slane %v4226_v24, 4  ;;  %v3491_v25 = vsel %vm8034_vm10, %v3486_v56, %v3490_v63  ;;  %v3502_v39 = vshll.u32 %v3340_v14, 16 }
 0x1b1   : > { %v3495_v29 = vrot.slane %v3493_v62, 4  ;;  %v3498_v30 = vrot.slane %v3496_v32, 5  ;;  %v8658_v22 = vcombine.low %v3481_v2, %v3491_v25  ;;  %v3506_v36 = vshrl.u32 %v3340_v14, 16  ;;  %v3346_v62 = vld [vmem:[#allocation2 + $0x64] sm:$0xf] }
 0x1b2   : > { %v8662_v42 = vsel %vm8403_vm2, %v4228_v31, %v4229_v20  ;;  %v3512_v40 = vshll.u32 %v3341_v15, 16  ;;  %v3504_v34 = vrot.slane %v3502_v39, 5  ;;  %v3517_v45 = vshrl.u32 %v3342_v18, 16  ;;  %v3345_v15 = vld [vmem:[#allocation2 + $0x60] sm:$0xf]  ;;  %v7838_v31 = vld [vmem:[#allocation2 + $0xa8] sm:$0xff]  }
 0x1b3   : > { %v7034_v12 = vcombine.low %v8654_v27, %v8662_v42  ;;  %v3499_v44 = vor.u32 %v3498_v30, %v3495_v29  ;;  %v3508_v47 = vrot.slane %v3506_v36, 4  ;;  %v3520_v54 = vshll.u32 %v3342_v18, 16  ;;  %v3347_v30 = vld [vmem:[#allocation2 + $0x68] sm:$0x1]  ;;  %v3357_v42 = vld [vmem:[#allocation2 + $0x90] sm:$0xf] }
 0x1b4   : > { %v3514_v51 = vrot.slane %v3512_v40, 5  ;;  %v3526_v17 = vshll.u32 %v3343_v23, 16  ;;  %7609 = vmatmul.mubr.msk.bf16.gmra.mrb[84].mxu0 %vm282_vm1, %v7836_v8  ;;  %7583 = vmatmul.mubr.msk.bf16.gmra.mrb[60].mxu1 %vm282_vm1, %v6932_v21  ;;  %v3519_v61 = vrot.slane %v3517_v45, 4  ;;  %v3530_v63 = vshrl.u32 %v3343_v23, 16 }
 0x1b5   : > { %v3500_v60 = vrot.slane %v3499_v44, 4  ;;  %v3536_v37 = vshll.u32 %v3344_v46, 16  ;;  %7612 = vmatprep.mubr.msk.bf16.mxu0 %vm282_vm1, %v7837_v35  ;;  %7622 = vmatprep.mubr.msk.bf16.mxu1 %vm282_vm1, %v8583_v38  ;;  %v3509_v7 = vor.u32 %v3508_v47, %v3504_v34  ;;  %v3522_v11 = vrot.slane %v3520_v54, 5  ;;  %v7839_v46 = vld [vmem:[#allocation2 + $0xb4] sm:$0xff]   ;;  %v3349_v44 = vld [vmem:[#allocation2 + $0x70] sm:$0xf] }
 0x1b6   : > { %v3528_v13 = vrot.slane %v3526_v17, 5  ;;  %v7018_v14 = vrot.slane %v4123_v33, 9  ;;  %v3532_v43 = vrot.slane %v3530_v63, 4  ;;  %v4233_v3 = vrot.slane %v4124_v52, 5  ;;  %v3348_v52 = vld [vmem:[#allocation2 + $0x6c] sm:$0xf] }
 0x1b7   : > { %v3505_v26 = vsel %vm8034_vm10, %v3500_v60, %v3504_v34  ;;  %v3538_v21 = vrot.slane %v3536_v37, 5  ;;  %v3510_v24 = vrot.slane %v3509_v7, 4  ;;  %v3523_v20 = vor.u32 %v3522_v11, %v3519_v61  ;;  %v3350_v47 = vld [vmem:[#allocation2 + $0x74] sm:$0x1]  ;;  %v4129_v61 = vld [vmem:[#allocation2 + $0x48] sm:$0xe] }
 0x1b8   : > { %v4236_v18 = vrot.slane %v4125_v48, 5  ;;  %v7019_v56 = vrot.slane %v4126_v41, 9  ;;  %v3533_v32 = vor.u32 %v3532_v43, %v3528_v13  ;;  %v8678_v38 = vsel %vm8403_vm2, %v7018_v14, %v4233_v3  ;;  %v4130_v63 = vld [vmem:[#allocation2 + $0x4c] sm:$0xf] }
 0x1b9   : > { %v4235_v23 = vrot.slane %v4233_v3, 4  ;;  %v4240_v2 = vrot.slane %v4127_v59, 5  ;;  %v3515_v8 = vsel %vm8034_vm10, %v3510_v24, %v3514_v51  ;;  %v3524_v25 = vrot.slane %v3523_v20, 4  ;;  %v8699_v51 = vld [vmem:[%s9605_s3 + $0x10] sm:$0x3]  ;;  %v7840_v3 = vld [vmem:[#allocation2 + $0xc0] sm:$0xff]  }
 0x1ba   : > { %v4243_v29 = vrot.slane %v4128_v6, 5  ;;  %v3541_v39 = vshrl.u32 %v3345_v15, 16  ;;  %v8682_v35 = vcombine.low %v3505_v26, %v3515_v8  ;;  %v3534_v36 = vrot.slane %v3533_v32, 4  ;;  %v4133_v8 = vld [vmem:[#allocation2 + $0x58] sm:$0xf] }
 0x1bb   : > { %v8686_v40 = vsel %vm8403_vm2, %v4235_v23, %v4236_v18  ;;  %v8690_v33 = vsel %vm8403_vm2, %v7019_v56, %v4240_v2  ;;  %v3529_v34 = vsel %vm8034_vm10, %v3524_v25, %v3528_v13  ;;  %v4242_v48 = vrot.slane %v4240_v2, 4 }
 0x1bc   : > { %v7035_v45 = vcombine.low %v8678_v38, %v8686_v40  ;;  %v3543_v41 = vrot.slane %v3541_v39, 4  ;;  %7613 = vmatmul.mubr.msk.bf16.gmra.mrb[88].mxu0 %vm282_vm1, %v7838_v31  ;;  %7623 = vmatmul.mubr.msk.bf16.vlgmr.msra.gmra.mrb[64].mxu1 %vm282_vm1, %v8589_v57  ;;  %v3539_v54 = vsel %vm8034_vm10, %v3534_v36, %v3538_v21  ;;  %v3544_v17 = vshll.u32 %v3345_v15, 16 }
 0x1bd   : > { %v3550_v59 = vshll.u32 %v3346_v62, 16  ;;  %v3554_v60 = vshrl.u32 %v3346_v62, 16  ;;  %7616 = vmatprep.mubr.msk.bf16.mxu0 %vm282_vm1, %v7839_v46  ;;  %7689 = vmatpush3.bf16.msra.mxu1 %v8567_v4  ;;  %v8708_v37 = vcombine.low %v3529_v34, %v3539_v54  ;;  %v8712_v6 = vsel %vm8403_vm2, %v4242_v48, %v4243_v29  ;;  %v4131_v62 = vld [vmem:[#allocation2 + $0x50] sm:$0x1]  ;;  %v4134_v46 = vld [vmem:[#allocation2 + $0x5c] sm:$0x1] }
 0x1be   : > { %v3560_v7 = vshll.u32 %v3347_v30, 16  ;;  %v3565_v57 = vshrl.u32 %v3348_v52, 16  ;;  %7626 = vmatprep.mubr.msk.bf16.mxu1 %vm282_vm1, %v8622_v28  ;;  %v7036_v11 = vcombine.low %v8690_v33, %v8712_v6  ;;  %v3546_v13 = vrot.slane %v3544_v17, 5  ;;  %7799 = vmatprep.subr.msk.bf16.mxu1 %vm331_vm0, %v8699_v51  ;;  %v4132_v28 = vld [vmem:[#allocation2 + $0x54] sm:$0xe] }
 0x1bf   : > { %v3552_v14 = vrot.slane %v3550_v59, 5  ;;  %v3556_v15 = vrot.slane %v3554_v60, 4  ;;  %v3568_v43 = vshll.u32 %v3348_v52, 16  ;;  %v3574_v21 = vshll.u32 %v3349_v44, 16  ;;  %v3351_v48 = vld [vmem:[#allocation2 + $0x78] sm:$0xf] }
 0x1c0   : > { %v3562_v4 = vrot.slane %v3560_v7, 5  ;;  %v3567_v26 = vrot.slane %v3565_v57, 4  ;;  %v3547_v24 = vor.u32 %v3546_v13, %v3543_v41  ;;  %v3578_v18 = vshrl.u32 %v3349_v44, 16  ;;  %v3352_v41 = vld [vmem:[#allocation2 + $0x7c] sm:$0xf] }
 0x1c1   : > { %v3557_v20 = vor.u32 %v3556_v15, %v3552_v14  ;;  %v3584_v56 = vshll.u32 %v3350_v47, 16  ;;  %v3570_v32 = vrot.slane %v3568_v43, 5  ;;  %v3576_v23 = vrot.slane %v3574_v21, 5  ;;  %v4143_v6 = vld [vmem:[#allocation2 + $0x80] sm:$0x1] }
 0x1c2   : > { %v7020_v2 = vrot.slane %v4129_v61, 9  ;;  %v4247_v31 = vrot.slane %v4130_v63, 5  ;;  %v3548_v25 = vrot.slane %v3547_v24, 4  ;;  %v3580_v30 = vrot.slane %v3578_v18, 4 }
 0x1c3   : > { %v3558_v29 = vrot.slane %v3557_v20, 4  ;;  %v3586_v39 = vrot.slane %v3584_v56, 5  ;;  %v3571_v36 = vor.u32 %v3570_v32, %v3567_v26  ;;  %v4250_v44 = vrot.slane %v4131_v62, 5  ;;  %v3355_v26 = vld [vmem:[#allocation2 + $0x88] sm:$0xf] }
 0x1c4   : > { %v8722_v52 = vsel %vm8403_vm2, %v7020_v2, %v4247_v31  ;;  %v4249_v34 = vrot.slane %v4247_v31, 4  ;;  %7617 = vmatmul.mubr.msk.bf16.gmra.mrb[92].mxu0 %vm282_vm1, %v7840_v3  ;;  %7627 = vmatmul.mubr.msk.bf16.gmra.mrb[68].mxu1 %vm282_vm1, %v8642_v16  ;;  %v3553_v47 = vsel %vm8034_vm10, %v3548_v25, %v3552_v14  ;;  %v3581_v17 = vor.u32 %v3580_v30, %v3576_v23  ;;  %v3353_v14 = vld [vmem:[#allocation2 + $0x80] sm:$0x1]  ;;  %v3356_v20 = vld [vmem:[#allocation2 + $0x8c] sm:$0x1] }
 0x1c5   : > { %v3563_v54 = vsel %vm8034_vm10, %v3558_v29, %v3562_v4  ;;  %v7021_v59 = vrot.slane %v4132_v28, 9  ;;  %7656 = vmatprep.mubr.msk.bf16.mxu0 %vm282_vm1, %v7032_v55  ;;  %7630 = vmatprep.mubr.msk.bf16.mxu1 %vm282_vm1, %v8658_v22  ;;  %v3572_v61 = vrot.slane %v3571_v36, 4  ;;  %v4254_v63 = vrot.slane %v4133_v8, 5  ;;  %v3354_v4 = vld [vmem:[#allocation2 + $0x84] sm:$0xf] }
 0x1c6   : > { %v8737_v60 = vcombine.low %v3553_v47, %v3563_v54  ;;  %v8741_v16 = vsel %vm8403_vm2, %v4249_v34, %v4250_v44  ;;  %v3582_v7 = vrot.slane %v3581_v17, 4  ;;  %v4257_v13 = vrot.slane %v4134_v46, 5  ;;  %v4135_v32 = vld [vmem:[#allocation2 + $0x60] sm:$0xe]  ;;  %v4137_v29 = vld [vmem:[#allocation2 + $0x68] sm:$0x1] }
 0x1c7   : > { %v7037_v57 = vcombine.low %v8722_v52, %v8741_v16  ;;  %v3589_v1 = vshrl.u32 %v3351_v48, 16  ;;  %v3577_v5 = vsel %vm8034_vm10, %v3572_v61, %v3576_v23  ;;  %v8749_v55 = vsel %vm8403_vm2, %v7021_v59, %v4254_v63  ;;  %v4136_v23 = vld [vmem:[#allocation2 + $0x64] sm:$0xf]  ;;  %v4138_v30 = vld [vmem:[#allocation2 + $0x6c] sm:$0xe] }
 0x1c8   : > { %v4256_v22 = vrot.slane %v4254_v63, 4  ;;  %v3592_v15 = vshll.u32 %v3351_v48, 16  ;;  %v3587_v43 = vsel %vm8034_vm10, %v3582_v7, %v3586_v39  ;;  %v3598_v3 = vshll.u32 %v3352_v41, 16  ;;  %v4139_v54 = vld [vmem:[#allocation2 + $0x70] sm:$0xf] }
 0x1c9   : > { %v3591_v21 = vrot.slane %v3589_v1, 4  ;;  %v3602_v24 = vshrl.u32 %v3352_v41, 16  ;;  %v8753_v18 = vcombine.low %v3577_v5, %v3587_v43  ;;  %v3608_v28 = vshll.u32 %v3353_v14, 16  ;;  %v4140_v7 = vld [vmem:[#allocation2 + $0x74] sm:$0x1] }
 0x1ca   : > { %v8757_v56 = vsel %vm8403_vm2, %v4256_v22, %v4257_v13  ;;  %v3594_v62 = vrot.slane %v3592_v15, 5  ;;  %v3600_v31 = vrot.slane %v3598_v3, 5  ;;  %v3613_v25 = vshrl.u32 %v3354_v4, 16  ;;  %v3358_v15 = vld [vmem:[#allocation2 + $0x94] sm:$0xf] }
 0x1cb   : > { %v7038_v2 = vcombine.low %v8749_v55, %v8757_v56  ;;  %v3604_v8 = vrot.slane %v3602_v24, 4  ;;  %v3610_v46 = vrot.slane %v3608_v28, 5  ;;  %v3616_v36 = vshll.u32 %v3354_v4, 16  ;;  %v3359_v4 = vld [vmem:[#allocation2 + $0x98] sm:$0x1] }
 0x1cc   : > { %v3595_v39 = vor.u32 %v3594_v62, %v3591_v21  ;;  %v3622_v34 = vshll.u32 %v3355_v26, 16  ;;  %7657 = vmatmul.mubr.msk.bf16.vlgmr.msra.gmra.mrb[96].mxu0 %vm282_vm1, %v7033_v9  ;;  %7631 = vmatmul.mubr.msk.bf16.gmra.mrb[72].mxu1 %vm282_vm1, %v8682_v35  ;;  %v3615_v48 = vrot.slane %v3613_v25, 4  ;;  %v3626_v41 = vshrl.u32 %v3355_v26, 16  ;;  %v3360_v24 = vld [vmem:[#allocation2 + $0x9c] sm:$0xf] }
 0x1cd   : > { %v3605_v44 = vor.u32 %v3604_v8, %v3600_v31  ;;  %v3632_v47 = vshll.u32 %v3356_v20, 16  ;;  %7660 = vmatprep.mubr.msk.bf16.mxu0 %vm282_vm1, %v7034_v12  ;;  %7634 = vmatprep.mubr.msk.bf16.mxu1 %vm282_vm1, %v8708_v37  ;;  %v3618_v0 = vrot.slane %v3616_v36, 5  ;;  %v7022_v9 = vrot.slane %v4135_v32, 9 }
 0x1ce   : > { %v3596_v17 = vrot.slane %v3595_v39, 4  ;;  %v3624_v58 = vrot.slane %v3622_v34, 5  ;;  %v3628_v61 = vrot.slane %v3626_v41, 4  ;;  %v4261_v63 = vrot.slane %v4136_v23, 5  ;;  %v3361_v23 = vld [vmem:[#allocation2 + $0xa0] sm:$0xf] }
 0x1cf   : > { %v3606_v59 = vrot.slane %v3605_v44, 4  ;;  %v3634_v35 = vrot.slane %v3632_v47, 5  ;;  %v3619_v14 = vor.u32 %v3618_v0, %v3615_v48  ;;  %v4264_v1 = vrot.slane %v4137_v29, 5  ;;  %v4141_v44 = vld [vmem:[#allocation2 + $0x78] sm:$0xe] }
 0x1d0   : > { %v3601_v13 = vsel %vm8034_vm10, %v3596_v17, %v3600_v31  ;;  %v7023_v27 = vrot.slane %v4138_v30, 9  ;;  %v3629_v37 = vor.u32 %v3628_v61, %v3624_v58  ;;  %v8779_v5 = vsel %vm8403_vm2, %v7022_v9, %v4261_v63  ;;  %v3362_v30 = vld [vmem:[#allocation2 + $0xa4] sm:$0x1]  ;;  %v4142_v48 = vld [vmem:[#allocation2 + $0x7c] sm:$0xf] }
 0x1d1   : > { %v3611_v12 = vsel %vm8034_vm10, %v3606_v59, %v3610_v46  ;;  %v4263_v22 = vrot.slane %v4261_v63, 4  ;;  %v3620_v43 = vrot.slane %v3619_v14, 4  ;;  %v4268_v21 = vrot.slane %v4139_v54, 5  ;;  %v4145_v61 = vld [vmem:[#allocation2 + $0x88] sm:$0xf] }
 0x1d2   : > { %v8781_v26 = vcombine.low %v3601_v13, %v3611_v12  ;;  %v4271_v3 = vrot.slane %v4140_v7, 5  ;;  %v3630_v20 = vrot.slane %v3629_v37, 4  ;;  %v3637_v28 = vshrl.u32 %v3357_v42, 16 }
 0x1d3   : > { %v8785_v62 = vsel %vm8403_vm2, %v4263_v22, %v4264_v1  ;;  %v3640_v32 = vshll.u32 %v3357_v42, 16  ;;  %v3625_v31 = vsel %vm8034_vm10, %v3620_v43, %v3624_v58  ;;  %v8793_v25 = vsel %vm8403_vm2, %v7023_v27, %v4268_v21  ;;  %v7488_v41 = vpop.f32.mrb[0].mxu1  ;;  %v4146_v22 = vld [vmem:[#allocation2 + $0x8c] sm:$0x1] }
 0x1d4   : > { %v7039_v8 = vcombine.low %v8779_v5, %v8785_v62  ;;  %v4270_v29 = vrot.slane %v4268_v21, 4  ;;  %7661 = vmatmul.mubr.msk.bf16.gmra.mrb[100].mxu0 %vm282_vm1, %v7035_v45  ;;  %7635 = vmatmul.mubr.msk.bf16.gmra.mrb[76].mxu1 %vm282_vm1, %v8737_v60  ;;  %v3635_v39 = vsel %vm8034_vm10, %v3630_v20, %v3634_v35  ;;  %v3639_v46 = vrot.slane %v3637_v28, 4  ;;  %1510 = vst.msk [vmem:[#allocation3 + $0x10] sm:$0xff] %vm282_vm1, %v7488_v41 }
 0x1d5   : > { %v3642_v36 = vrot.slane %v3640_v32, 5  ;;  %v3646_v34 = vshll.u32 %v3358_v15, 16  ;;  %7664 = vmatprep.mubr.msk.bf16.mxu0 %vm282_vm1, %v7036_v11  ;;  %7638 = vmatprep.mubr.msk.bf16.mxu1 %vm282_vm1, %v8753_v18  ;;  %v6993_v38 = vcombine.low %v3625_v31, %v3635_v39  ;;  %v3650_v45 = vshrl.u32 %v3358_v15, 16  ;;  %v4144_v11 = vld [vmem:[#allocation2 + $0x84] sm:$0xe]  ;;  %v1381_v18 = vpop.f32.mrb[1].mxu1 }
 0x1d6   : > { %v8811_v40 = vsel %vm8403_vm2, %v4270_v29, %v4271_v3  ;;  %v3656_v60 = vshll.u32 %v3359_v4, 16  ;;  %v3661_v33 = vshrl.u32 %v3360_v24, 16  ;;  %v3664_v9 = vshll.u32 %v3360_v24, 16  ;;  %1508 = vst.msk [vmem:[#allocation3] sm:$0xff] %vm282_vm1, %v1381_v18  ;;  %v7489_v35 = vpop.f32.mrb[2].mxu1 }
 0x1d7   : > { %v7040_v47 = vcombine.low %v8793_v25, %v8811_v40  ;;  %v3643_v54 = vor.u32 %v3642_v36, %v3639_v46  ;;  %v3648_v17 = vrot.slane %v3646_v34, 5  ;;  %v3652_v0 = vrot.slane %v3650_v45, 4  ;;  %1511 = vst.msk [vmem:[#allocation3 + $0x18] sm:$0xff] %vm282_vm1, %v7489_v35  ;;  %v1384_v1 = vpop.f32.mrb[3].mxu1  ;;  %v3363_v3 = vld [vmem:[#allocation2 + $0xa8] sm:$0xf] }
 0x1d8   : > { %v3658_v58 = vrot.slane %v3656_v60, 5  ;;  %v3670_v59 = vshll.u32 %v3361_v23, 16  ;;  %v3663_v7 = vrot.slane %v3661_v33, 4  ;;  %v3674_v13 = vshrl.u32 %v3361_v23, 16  ;;  %1509 = vst.msk [vmem:[#allocation3 + $0x8] sm:$0xff] %vm282_vm1, %v1384_v1 }
 0x1d9   : > { %v3644_v63 = vrot.slane %v3643_v54, 4  ;;  %v3680_v14 = vshll.u32 %v3362_v30, 16  ;;  %v3653_v27 = vor.u32 %v3652_v0, %v3648_v17  ;;  %v3666_v42 = vrot.slane %v3664_v9, 5  ;;  %v3364_v23 = vld [vmem:[#allocation2 + $0xac] sm:$0xf] }
 0x1da   : > { %v3672_v12 = vrot.slane %v3670_v59, 5  ;;  %v7024_v37 = vrot.slane %v4141_v44, 9  ;;  %v3676_v4 = vrot.slane %v3674_v13, 4  ;;  %v4275_v21 = vrot.slane %v4142_v48, 5  ;;  %v3365_v46 = vld [vmem:[#allocation2 + $0xb0] sm:$0x1] }
 0x1db   : > { %v3649_v15 = vsel %vm8034_vm10, %v3644_v63, %v3648_v17  ;;  %v3682_v43 = vrot.slane %v3680_v14, 5  ;;  %v3654_v24 = vrot.slane %v3653_v27, 4  ;;  %v3667_v20 = vor.u32 %v3666_v42, %v3663_v7  ;;  %v3366_v36 = vld [vmem:[#allocation2 + $0xb4] sm:$0xf]  ;;  %v3367_v48 = vld [vmem:[#allocation2 + $0xb8] sm:$0xf] }
 0x1dc   : > { %v4278_v28 = vrot.slane %v4143_v6, 5  ;;  %v7025_v32 = vrot.slane %v4144_v11, 9  ;;  %7665 = vmatmul.mubr.msk.bf16.gmra.mrb[104].mxu0 %vm282_vm1, %v7037_v57  ;;  %7639 = vmatmul.mubr.msk.bf16.gmra.mrb[80].mxu1 %vm282_vm1, %v8781_v26  ;;  %v3677_v31 = vor.u32 %v3676_v4, %v3672_v12  ;;  %v8829_v29 = vsel %vm8403_vm2, %v7024_v37, %v4275_v21  ;;  %v3368_v6 = vld [vmem:[#allocation2 + $0xbc] sm:$0x1]  ;;  %v4147_v9 = vld [vmem:[#allocation2 + $0x90] sm:$0xe] }
 0x1dd   : > { %v4277_v30 = vrot.slane %v4275_v21, 4  ;;  %v4282_v39 = vrot.slane %v4145_v61, 5  ;;  %7668 = vmatprep.mubr.msk.bf16.mxu0 %vm282_vm1, %v7038_v2  ;;  %7642 = vmatprep.mubr.msk.bf16.mxu1 %vm282_vm1, %v6993_v38  ;;  %v3659_v52 = vsel %vm8034_vm10, %v3654_v24, %v3658_v58  ;;  %v3668_v16 = vrot.slane %v3667_v20, 4  ;;  %v4148_v59 = vld [vmem:[#allocation2 + $0x94] sm:$0xf] }
 0x1de   : > { %v4285_v57 = vrot.slane %v4146_v22, 5  ;;  %v3685_v26 = vshrl.u32 %v3363_v3, 16  ;;  %v6994_v34 = vcombine.low %v3649_v15, %v3659_v52  ;;  %v3678_v44 = vrot.slane %v3677_v31, 4  ;;  %v4149_v13 = vld [vmem:[#allocation2 + $0x98] sm:$0x1] }
 0x1df   : > { %v8840_v45 = vsel %vm8403_vm2, %v4277_v30, %v4278_v28  ;;  %v8844_v60 = vsel %vm8403_vm2, %v7025_v32, %v4282_v39  ;;  %v3673_v55 = vsel %vm8034_vm10, %v3668_v16, %v3672_v12  ;;  %v4284_v2 = vrot.slane %v4282_v39, 4  ;;  %v4150_v21 = vld [vmem:[#allocation2 + $0x9c] sm:$0xe]  ;;  %v4151_v30 = vld [vmem:[#allocation2 + $0xa0] sm:$0xf] }
 0x1e0   : > { %v7041_v56 = vcombine.low %v8829_v29, %v8840_v45  ;;  %v3687_v38 = vrot.slane %v3685_v26, 4  ;;  %v3683_v41 = vsel %vm8034_vm10, %v3678_v44, %v3682_v43  ;;  %v3688_v54 = vshll.u32 %v3363_v3, 16  ;;  %v3369_v26 = vld [vmem:[#allocation2 + $0xc0] sm:$0xf] }
 0x1e1   : > { %v3694_v17 = vshll.u32 %v3364_v23, 16  ;;  %v3698_v33 = vshrl.u32 %v3364_v23, 16  ;;  %v6995_v11 = vcombine.low %v3673_v55, %v3683_v41  ;;  %v8854_v18 = vsel %vm8403_vm2, %v4284_v2, %v4285_v57 }
 0x1e2   : > { %v3704_v0 = vshll.u32 %v3365_v46, 16  ;;  %v3709_v58 = vshrl.u32 %v3366_v36, 16  ;;  %v7042_v61 = vcombine.low %v8844_v60, %v8854_v18  ;;  %v3690_v35 = vrot.slane %v3688_v54, 5  ;;  %v7492_v14 = vpop.f32.mrb[4].mxu1  ;;  %v4152_v46 = vld [vmem:[#allocation2 + $0xa4] sm:$0x1] }
 0x1e3   : > { %v3696_v63 = vrot.slane %v3694_v17, 5  ;;  %v3700_v7 = vrot.slane %v3698_v33, 4  ;;  %v3712_v42 = vshll.u32 %v3366_v36, 16  ;;  %v3718_v12 = vshll.u32 %v3367_v48, 16  ;;  %1514 = vst.msk [vmem:[#allocation3 + $0x30] sm:$0xff] %vm282_vm1, %v7492_v14  ;;  %v1397_v37 = vpop.f32.mrb[5].mxu1 }
 0x1e4   : > { %v3706_v1 = vrot.slane %v3704_v0, 5  ;;  %v3711_v27 = vrot.slane %v3709_v58, 4  ;;  %7669 = vmatmul.mubr.msk.bf16.gmra.mrb[108].mxu0 %vm282_vm1, %v7039_v8  ;;  %7643 = vmatmul.mubr.msk.bf16.gmra.mrb[84].mxu1 %vm282_vm1, %v6994_v34  ;;  %v3691_v22 = vor.u32 %v3690_v35, %v3687_v38  ;;  %v3722_v4 = vshrl.u32 %v3367_v48, 16  ;;  %1512 = vst.msk [vmem:[#allocation3 + $0x20] sm:$0xff] %vm282_vm1, %v1397_v37  ;;  %v7493_v3 = vpop.f32.mrb[6].mxu1 }
 0x1e5   : > { %v3701_v15 = vor.u32 %v3700_v7, %v3696_v63  ;;  %v3728_v43 = vshll.u32 %v3368_v6, 16  ;;  %7672 = vmatprep.mubr.msk.bf16.mxu0 %vm282_vm1, %v7040_v47  ;;  %7646 = vmatprep.mubr.msk.bf16.mxu1 %vm282_vm1, %v6995_v11  ;;  %v3714_v5 = vrot.slane %v3712_v42, 5  ;;  %v3720_v62 = vrot.slane %v3718_v12, 5  ;;  %1515 = vst.msk [vmem:[#allocation3 + $0x38] sm:$0xff] %vm282_vm1, %v7493_v3  ;;  %v1400_v20 = vpop.f32.mrb[7].mxu1 }
 0x1e6   : > { %v7026_v8 = vrot.slane %v4147_v9, 9  ;;  %v4289_v24 = vrot.slane %v4148_v59, 5  ;;  %v3692_v28 = vrot.slane %v3691_v22, 4  ;;  %v3724_v23 = vrot.slane %v3722_v4, 4  ;;  %1513 = vst.msk [vmem:[#allocation3 + $0x28] sm:$0xff] %vm282_vm1, %v1400_v20 }
 0x1e7   : > { %v3702_v32 = vrot.slane %v3701_v15, 4  ;;  %v3730_v31 = vrot.slane %v3728_v43, 5  ;;  %v3715_v39 = vor.u32 %v3714_v5, %v3711_v27  ;;  %v4292_v47 = vrot.slane %v4149_v13, 5  ;;  %v3370_v38 = vld [vmem:[#allocation2 + $0xc4] sm:$0xf] }
 0x1e8   : > { %v8874_v25 = vsel %vm8403_vm2, %v7026_v8, %v4289_v24  ;;  %v4291_v40 = vrot.slane %v4289_v24, 4  ;;  %v3697_v36 = vsel %vm8034_vm10, %v3692_v28, %v3696_v63  ;;  %v3725_v16 = vor.u32 %v3724_v23, %v3720_v62  ;;  %v3371_v48 = vld [vmem:[#allocation2 + $0xc8] sm:$0x1]  ;;  %v4153_v6 = vld [vmem:[#allocation2 + $0xa8] sm:$0xe] }
 0x1e9   : > { %v3707_v52 = vsel %vm8034_vm10, %v3702_v32, %v3706_v1  ;;  %v7027_v57 = vrot.slane %v4150_v21, 9  ;;  %v3716_v44 = vrot.slane %v3715_v39, 4  ;;  %v4296_v2 = vrot.slane %v4151_v30, 5  ;;  %v4154_v11 = vld [vmem:[#allocation2 + $0xac] sm:$0xf] }
 0x1ea   : > { %v6996_v34 = vcombine.low %v3697_v36, %v3707_v52  ;;  %v8882_v55 = vsel %vm8403_vm2, %v4291_v40, %v4292_v47  ;;  %v3726_v41 = vrot.slane %v3725_v16, 4  ;;  %v4299_v17 = vrot.slane %v4152_v46, 5  ;;  %v4155_v35 = vld [vmem:[#allocation2 + $0xb0] sm:$0x1]  ;;  %v7496_v63 = vpop.f32.mrb[8].mxu1 }
 0x1eb   : > { %v7043_v54 = vcombine.low %v8874_v25, %v8882_v55  ;;  %v5634_v33 = vsel %vm331_vm0, %v8614_v19, 0  ;;  %v3721_v0 = vsel %vm8034_vm10, %v3716_v44, %v3720_v62  ;;  %v8892_v58 = vsel %vm8403_vm2, %v7027_v57, %v4296_v2  ;;  %v4156_v1 = vld [vmem:[#allocation2 + $0xb4] sm:$0xe]  ;;  %1518 = vst.msk [vmem:[#allocation3 + $0x50] sm:$0xff] %vm282_vm1, %v7496_v63  ;;  %v1413_v27 = vpop.f32.mrb[9].mxu1 }
 0x1ec   : > { %v4298_v9 = vrot.slane %v4296_v2, 4  ;;  %7723 = vmatpush3.bf16.msra.mxu0 %v5634_v33  ;;  %v3733_v59 = vshrl.u32 %v3369_v26, 16  ;;  %7647 = vmatmul.mubr.msk.bf16.gmra.mrb[88].mxu1 %vm282_vm1, %v6996_v34  ;;  %v3731_v19 = vsel %vm8034_vm10, %v3726_v41, %v3730_v31  ;;  %v3736_v7 = vshll.u32 %v3369_v26, 16  ;;  %v4157_v12 = vld [vmem:[#allocation2 + $0xb8] sm:$0xf]  ;;  %1516 = vst.msk [vmem:[#allocation3 + $0x40] sm:$0xff] %vm282_vm1, %v1413_v27 }
 0x1ed   : > { %7673 = vmatmul.mubr.msk.bf16.gmra.mrb[112].mxu0 %vm282_vm1, %v7041_v56  ;;  %v3742_v13 = vshll.u32 %v3370_v38, 16  ;;  %v3746_v14 = vshrl.u32 %v3370_v38, 16  ;;  %v6997_v29 = vcombine.low %v3721_v0, %v3731_v19  ;;  %v3752_v42 = vshll.u32 %v3371_v48, 16  ;;  %v7497_v37 = vpop.f32.mrb[10].mxu1  ;;  %v4158_v21 = vld [vmem:[#allocation2 + $0xbc] sm:$0x1] }
 0x1ee   : > { %7676 = vmatprep.mubr.msk.bf16.mxu0 %vm282_vm1, %v7042_v61  ;;  %v4300_v45 = vsel %vm8403_vm2, %v4298_v9, %v4299_v17  ;;  %v3735_v56 = vrot.slane %v3733_v59, 4  ;;  %v3738_v15 = vrot.slane %v3736_v7, 5  ;;  %1519 = vst.msk [vmem:[#allocation3 + $0x58] sm:$0xff] %vm282_vm1, %v7497_v37  ;;  %v1416_v60 = vpop.f32.mrb[11].mxu1  ;;  %v7028_v61 = vrot.slane %v4153_v6, 9  ;;  %v7841_v9 = vld [vmem:[#allocation2 + $0x18] sm:$0xff]  }
 0x1ef   : > { %v7044_v22 = vcombine.low %v8892_v58, %v4300_v45  ;;  %v3744_v4 = vrot.slane %v3742_v13, 5  ;;  %v3748_v43 = vrot.slane %v3746_v14, 4  ;;  %7650 = vmatprep.mubr.msk.bf16.mxu1 %vm282_vm1, %v6997_v29  ;;  %v3754_v18 = vrot.slane %v3752_v42, 5  ;;  %v4159_v62 = vld [vmem:[#allocation2 + $0xc0] sm:$0xe]  ;;  %1517 = vst.msk [vmem:[#allocation3 + $0x48] sm:$0xff] %vm282_vm1, %v1416_v60 }
 0x1f0   : > { %v4303_v3 = vrot.slane %v4154_v11, 5  ;;  %v4306_v5 = vrot.slane %v4155_v35, 5  ;;  %v3739_v8 = vor.u32 %v3738_v15, %v3735_v56  ;;  %v7029_v20 = vrot.slane %v4156_v1, 9  ;;  %v4160_v32 = vld [vmem:[#allocation2 + $0xc4] sm:$0xf] }
 0x1f1   : > { %v3749_v24 = vor.u32 %v3748_v43, %v3744_v4  ;;  %v4310_v28 = vrot.slane %v4157_v12, 5  ;;  %v4161_v23 = vld [vmem:[#allocation2 + $0xc8] sm:$0x1]  ;;  %v4313_v39 = vrot.slane %v4158_v21, 5  ;;  %v8919_v40 = vsel %vm331_vm0, %v8699_v51, 0 }
 0x1f2   : > { %v8915_v31 = vsel %vm8403_vm2, %v7028_v61, %v4303_v3  ;;  %v4305_v30 = vrot.slane %v4303_v3, 4  ;;  %v3740_v47 = vrot.slane %v3739_v8, 4  ;;  %v5103_v16 = vld [vmem:[#allocation2 + $0x18] sm:$0xf]  ;;  %v7030_v26 = vrot.slane %v4159_v62, 9 }
 0x1f3   : > { %v3750_v46 = vrot.slane %v3749_v24, 4  ;;  %v8923_v36 = vsel %vm8403_vm2, %v7029_v20, %v4310_v28  ;;  %v4312_v52 = vrot.slane %v4310_v28, 4  ;;  %v4317_v34 = vrot.slane %v4160_v32, 5  ;;  %v5104_v2 = vld [vmem:[#allocation2 + $0x1c] sm:$0xf]  ;;  %v7500_v6 = vpop.f32.mrb[12].mxu1 }
 0x1f4   : > { %v4307_v57 = vsel %vm8403_vm2, %v4305_v30, %v4306_v5  ;;  %v4320_v44 = vrot.slane %v4161_v23, 5  ;;  %v3745_v51 = vsel %vm8034_vm10, %v3740_v47, %v3744_v4  ;;  %v5105_v17 = vld [vmem:[#allocation2 + $0x20] sm:$0x1]  ;;  %v5106_v33 = vld [vmem:[#allocation2 + $0x24] sm:$0xf]  ;;  %1522 = vst.msk [vmem:[#allocation3 + $0x70] sm:$0xff] %vm282_vm1, %v7500_v6 }
 0x1f5   : > { %7677 = vmatmul.mubr.msk.bf16.gmra.mrb[116].mxu0 %vm282_vm1, %v7043_v54  ;;  %v3755_v38 = vsel %vm8034_vm10, %v3750_v46, %v3754_v18  ;;  %v7045_v48 = vcombine.low %v8915_v31, %v4307_v57  ;;  %v4314_v41 = vsel %vm8403_vm2, %v4312_v52, %v4313_v39  ;;  %v8942_v55 = vsel %vm8403_vm2, %v7030_v26, %v4317_v34  ;;  %v5107_v0 = vld [vmem:[#allocation2 + $0x28] sm:$0xf]  ;;  %v1429_v58 = vpop.f32.mrb[13].mxu1  ;;  %v5108_v1 = vld [vmem:[#allocation2 + $0x2c] sm:$0x1] }
 0x1f6   : > { %7680 = vmatprep.mubr.msk.bf16.mxu0 %vm282_vm1, %v7044_v22  ;;  %v6998_v11 = vcombine.low %v3745_v51, %v3755_v38  ;;  %v7046_v25 = vcombine.low %v8923_v36, %v4314_v41  ;;  %v4319_v54 = vrot.slane %v4317_v34, 4  ;;  %v5152_v59 = vshrl.u32 %v5103_v16, 16  ;;  %1520 = vst.msk [vmem:[#allocation3 + $0x60] sm:$0xff] %vm282_vm1, %v1429_v58  ;;  %v7501_v7 = vpop.f32.mrb[14].mxu1  ;;  %v5109_v22 = vld [vmem:[#allocation2 + $0x30] sm:$0xf] }
 0x1f7   : > { %v5155_v35 = vshll.u32 %v5103_v16, 16  ;;  %v5161_v63 = vshll.u32 %v5104_v2, 16  ;;  %v5165_v19 = vshrl.u32 %v5104_v2, 16  ;;  %v5171_v14 = vshll.u32 %v5105_v17, 16  ;;  %1523 = vst.msk [vmem:[#allocation3 + $0x78] sm:$0xff] %vm282_vm1, %v7501_v7  ;;  %v1432_v45 = vpop.f32.mrb[15].mxu1 }
 0x1f8   : > { %7651 = vmatmul.mubr.msk.bf16.gmra.mrb[92].mxu1 %vm282_vm1, %v6998_v11  ;;  %v8949_v13 = vsel %vm8403_vm2, %v4319_v54, %v4320_v44  ;;  %v5176_v27 = vshrl.u32 %v5106_v33, 16  ;;  %v5179_v29 = vshll.u32 %v5106_v33, 16  ;;  %v5154_v42 = vrot.slane %v5152_v59, 4  ;;  %v8955_v15 = vpop.f32.mrb[32].mxu0  ;;  %1521 = vst.msk [vmem:[#allocation3 + $0x68] sm:$0xff] %vm282_vm1, %v1432_v45  ;;  %v7842_v52 = vld [vmem:[#allocation2 + $0x24] sm:$0xff]  }
 0x1f9   : > { %7690 = vmatprep.mubr.msk.bf16.mxu1 %vm282_vm1, %v7841_v9  ;;  %v7047_v56 = vcombine.low %v8942_v55, %v8949_v13  ;;  %v5157_v12 = vrot.slane %v5155_v35, 5  ;;  %v5163_v37 = vrot.slane %v5161_v63, 5  ;;  %v5167_v4 = vrot.slane %v5165_v19, 4  ;;  %v8958_v18 = vpop.f32.mrb[33].mxu0  ;;  %v5110_v28 = vld [vmem:[#allocation2 + $0x34] sm:$0xf] }
 0x1fa   : > { %v5173_v43 = vrot.slane %v5171_v14, 5  ;;  %v5178_v21 = vrot.slane %v5176_v27, 4  ;;  %v5181_v60 = vrot.slane %v5179_v29, 5  ;;  %v5185_v3 = vshll.u32 %v5107_v0, 16  ;;  %v8960_v8 = vpop.f32.mrb[34].mxu0  ;;  %v7843_v44 = vld [vmem:[#allocation2 + $0x30] sm:$0xff]  }
 0x1fb   : > { %v5158_v61 = vor.u32 %v5157_v12, %v5154_v42  ;;  %v5189_v5 = vshrl.u32 %v5107_v0, 16  ;;  %v5195_v62 = vshll.u32 %v5108_v1, 16  ;;  %v5168_v24 = vor.u32 %v5167_v4, %v5163_v37  ;;  %v8962_v31 = vpop.f32.mrb[35].mxu0  ;;  %v5111_v36 = vld [vmem:[#allocation2 + $0x38] sm:$0x1] }
 0x1fc   : > { %v5182_v20 = vor.u32 %v5181_v60, %v5178_v21  ;;  %v5200_v32 = vshrl.u32 %v5109_v22, 16  ;;  %v5203_v23 = vshll.u32 %v5109_v22, 16  ;;  %v5187_v39 = vrot.slane %v5185_v3, 5  ;;  %v5114_v54 = vld [vmem:[#allocation2 + $0x44] sm:$0x1] }
 0x1fd   : > { %7681 = vmatmul.mubr.msk.bf16.gmra.mrb[120].mxu0 %vm282_vm1, %v7045_v48  ;;  %v5159_v30 = vrot.slane %v5158_v61, 4  ;;  %v5191_v47 = vrot.slane %v5189_v5, 4  ;;  %v5197_v46 = vrot.slane %v5195_v62, 5  ;;  %v5169_v16 = vrot.slane %v5168_v24, 4  ;;  %v5112_v48 = vld [vmem:[#allocation2 + $0x3c] sm:$0xf] }
 0x1fe   : > { %7684 = vmatprep.mubr.msk.bf16.mxu0 %vm282_vm1, %v7046_v25  ;;  %v5183_v57 = vrot.slane %v5182_v20, 4  ;;  %v5202_v26 = vrot.slane %v5200_v32, 4  ;;  %v5205_v34 = vrot.slane %v5203_v23, 5  ;;  %v5209_v38 = vshll.u32 %v5110_v28, 16  ;;  %v5113_v25 = vld [vmem:[#allocation2 + $0x40] sm:$0xf] }
 0x1ff   : > { %v5164_v2 = vsel %vm8034_vm10, %v5159_v30, %v5163_v37  ;;  %v5192_v51 = vor.u32 %v5191_v47, %v5187_v39  ;;  %v5213_v41 = vshrl.u32 %v5110_v28, 16  ;;  %v5174_v17 = vsel %vm8034_vm10, %v5169_v16, %v5173_v43  ;;  %v5115_v35 = vld [vmem:[#allocation2 + $0x48] sm:$0xf]  ;;  %v7504_v63 = vpop.f32.mrb[16].mxu1  ;;  %v5116_v12 = vld [vmem:[#allocation2 + $0x4c] sm:$0xf] }
 0x200   : > { %7691 = vmatmul.mubr.msk.bf16.vlgmr.msra.gmra.mrb[96].mxu1 %vm282_vm1, %v7842_v52  ;;  %v5188_v33 = vsel %vm8034_vm10, %v5183_v57, %v5187_v39  ;;  %v5206_v6 = vor.u32 %v5205_v34, %v5202_v26  ;;  %v5219_v11 = vshll.u32 %v5111_v36, 16  ;;  %v7098_v0 = vcombine.low %v5164_v2, %v5174_v17  ;;  %1526 = vst.msk [vmem:[#allocation3 + $0x90] sm:$0xff] %vm282_vm1, %v7504_v63  ;;  %v1445_v27 = vpop.f32.mrb[17].mxu1  ;;  %v7844_v24 = vld [vmem:[#allocation2 + $0x3c] sm:$0xff]   ;;  %v5117_v28 = vld [vmem:[#allocation2 + $0x50] sm:$0x1] }
 0x201   : > { %7757 = vmatpush3.bf16.msra.mxu1 %v8919_v40  ;;  %7694 = vmatprep.mubr.msk.bf16.mxu1 %vm282_vm1, %v7843_v44  ;;  %v5193_v58 = vrot.slane %v5192_v51, 4  ;;  %v5211_v9 = vrot.slane %v5209_v38, 5  ;;  %v5215_v59 = vrot.slane %v5213_v41, 4  ;;  %v5224_v14 = vshrl.u32 %v5112_v48, 16  ;;  %1524 = vst.msk [vmem:[#allocation3 + $0x80] sm:$0xff] %vm282_vm1, %v1445_v27  ;;  %v7505_v37 = vpop.f32.mrb[18].mxu1 }
 0x202   : > { %v5207_v19 = vrot.slane %v5206_v6, 4  ;;  %v5221_v7 = vrot.slane %v5219_v11, 5  ;;  %v5227_v1 = vshll.u32 %v5112_v48, 16  ;;  %v5233_v40 = vshll.u32 %v5113_v25, 16  ;;  %1527 = vst.msk [vmem:[#allocation3 + $0x98] sm:$0xff] %vm282_vm1, %v7505_v37  ;;  %v1448_v60 = vpop.f32.mrb[19].mxu1 }
 0x203   : > { %v5198_v29 = vsel %vm8034_vm10, %v5193_v58, %v5197_v46  ;;  %v5216_v45 = vor.u32 %v5215_v59, %v5211_v9  ;;  %v5237_v42 = vshrl.u32 %v5113_v25, 16  ;;  %v5226_v43 = vrot.slane %v5224_v14, 4  ;;  %1525 = vst.msk [vmem:[#allocation3 + $0x88] sm:$0xff] %vm282_vm1, %v1448_v60  ;;  %v7845_v39 = vld [vmem:[#allocation2 + $0x48] sm:$0xff]   ;;  %v5118_v46 = vld [vmem:[#allocation2 + $0x54] sm:$0xf] }
 0x204   : > { %v7099_v22 = vcombine.low %v5188_v33, %v5198_v29  ;;  %v5212_v4 = vsel %vm8034_vm10, %v5207_v19, %v5211_v9  ;;  %v5229_v21 = vrot.slane %v5227_v1, 5  ;;  %v5235_v3 = vrot.slane %v5233_v40, 5  ;;  %v5119_v26 = vld [vmem:[#allocation2 + $0x58] sm:$0xf]  ;;  %v5120_v48 = vld [vmem:[#allocation2 + $0x5c] sm:$0x1] }
 0x205   : > { %7685 = vmatmul.mubr.msk.bf16.gmra.mrb[124].mxu0 %vm282_vm1, %v7047_v56  ;;  %v5217_v61 = vrot.slane %v5216_v45, 4  ;;  %v5239_v5 = vrot.slane %v5237_v42, 4  ;;  %v5243_v62 = vshll.u32 %v5114_v54, 16  ;;  %v5248_v32 = vshrl.u32 %v5115_v35, 16  ;;  %v5122_v19 = vld [vmem:[#allocation2 + $0x64] sm:$0xf] }
 0x206   : > { %7724 = vmatprep.mubr.msk.bf16.mxu0 %vm282_vm1, %v7098_v0  ;;  %v5230_v20 = vor.u32 %v5229_v21, %v5226_v43  ;;  %v5251_v23 = vshll.u32 %v5115_v35, 16  ;;  %v5257_v30 = vshll.u32 %v5116_v12, 16  ;;  %v5261_v47 = vshrl.u32 %v5116_v12, 16  ;;  %v5121_v0 = vld [vmem:[#allocation2 + $0x60] sm:$0xf]  ;;  %v7846_v40 = vld [vmem:[#allocation2 + $0x54] sm:$0xff]  }
 0x207   : > { %v5222_v55 = vsel %vm8034_vm10, %v5217_v61, %v5221_v7  ;;  %v5240_v13 = vor.u32 %v5239_v5, %v5235_v3  ;;  %v5245_v56 = vrot.slane %v5243_v62, 5  ;;  %v5250_v16 = vrot.slane %v5248_v32, 4  ;;  %v5123_v37 = vld [vmem:[#allocation2 + $0x68] sm:$0x1]  ;;  %v5124_v32 = vld [vmem:[#allocation2 + $0x6c] sm:$0xf] }
 0x208   : > { %7695 = vmatmul.mubr.msk.bf16.gmra.mrb[100].mxu1 %vm282_vm1, %v7844_v24  ;;  %v7100_v36 = vcombine.low %v5212_v4, %v5222_v55  ;;  %v5231_v52 = vrot.slane %v5230_v20, 4  ;;  %v5253_v57 = vrot.slane %v5251_v23, 5  ;;  %v5259_v44 = vrot.slane %v5257_v30, 5 }
 0x209   : > { %7698 = vmatprep.mubr.msk.bf16.mxu1 %vm282_vm1, %v7845_v39  ;;  %v5241_v34 = vrot.slane %v5240_v13, 4  ;;  %v5263_v2 = vrot.slane %v5261_v47, 4  ;;  %v5267_v51 = vshll.u32 %v5117_v28, 16  ;;  %v5272_v17 = vshrl.u32 %v5118_v46, 16  ;;  %v2237_v47 = vld [vmem:[#allocation3] sm:$0xff] }
 0x20a   : > { %v5236_v38 = vsel %vm8034_vm10, %v5231_v52, %v5235_v3  ;;  %v5254_v41 = vor.u32 %v5253_v57, %v5250_v16  ;;  %v5275_v33 = vshll.u32 %v5118_v46, 16  ;;  %v5281_v54 = vshll.u32 %v5119_v26, 16  ;;  %v8996_v58 = vpop.f32.mrb[36].mxu0 }
 0x20b   : > { %v5246_v6 = vsel %vm8034_vm10, %v5241_v34, %v5245_v56  ;;  %v5264_v11 = vor.u32 %v5263_v2, %v5259_v44  ;;  %v5269_v25 = vrot.slane %v5267_v51, 5  ;;  %v5274_v35 = vrot.slane %v5272_v17, 4  ;;  %v9000_v7 = vpop.f32.mrb[37].mxu0  ;;  %v2239_v56 = vld [vmem:[#allocation3 + $0x10] sm:$0xff]  ;;  %v5125_v34 = vld [vmem:[#allocation2 + $0x70] sm:$0xf] }
 0x20c   : > { %v8998_v9 = vcombine.low %v5236_v38, %v5246_v6  ;;  %v5255_v59 = vrot.slane %v5254_v41, 4  ;;  %v5277_v63 = vrot.slane %v5275_v33, 5  ;;  %v9003_v1 = vrot.slane %v5281_v54, 5  ;;  %v9005_v45 = vpop.f32.mrb[38].mxu0 }
 0x20d   : > { %7725 = vmatmul.mubr.msk.bf16.vlgmr.msra.gmra.mrb[128].mxu0 %vm282_vm1, %v7099_v22  ;;  %v5265_v14 = vrot.slane %v5264_v11, 4  ;;  %v5285_v27 = vshrl.u32 %v5119_v26, 16  ;;  %v5291_v29 = vshll.u32 %v5120_v48, 16  ;;  %v5296_v4 = vshrl.u32 %v5121_v0, 16  ;;  %v9010_v21 = vpop.f32.mrb[39].mxu0  ;;  %v7847_v22 = vld [vmem:[#allocation2 + $0x60] sm:$0xff]  }
 0x20e   : > { %7728 = vmatprep.mubr.msk.bf16.mxu0 %vm282_vm1, %v7100_v36  ;;  %v5260_v42 = vsel %vm8034_vm10, %v5255_v59, %v5259_v44  ;;  %v5278_v12 = vor.u32 %v5277_v63, %v5274_v35  ;;  %v5299_v43 = vshll.u32 %v5121_v0, 16  ;;  %v5305_v5 = vshll.u32 %v5122_v19, 16  ;;  %v7508_v23 = vpop.f32.mrb[20].mxu1  ;;  %v2240_v26 = vld [vmem:[#allocation3 + $0x18] sm:$0xff]  ;;  %v2238_v48 = vld [vmem:[#allocation3 + $0x8] sm:$0xff] }
 0x20f   : > { %v5270_v60 = vsel %vm8034_vm10, %v5265_v14, %v5269_v25  ;;  %v5287_v61 = vrot.slane %v5285_v27, 4  ;;  %v5293_v3 = vrot.slane %v5291_v29, 5  ;;  %v5298_v20 = vrot.slane %v5296_v4, 4  ;;  %1530 = vst.msk [vmem:[#allocation3 + $0xb0] sm:$0xff] %vm282_vm1, %v7508_v23  ;;  %v1461_v46 = vpop.f32.mrb[21].mxu1 }
 0x210   : > { %7699 = vmatmul.mubr.msk.bf16.gmra.mrb[104].mxu1 %vm282_vm1, %v7846_v40  ;;  %v7102_v62 = vcombine.low %v5260_v42, %v5270_v60  ;;  %v5279_v24 = vrot.slane %v5278_v12, 4  ;;  %v5301_v28 = vrot.slane %v5299_v43, 5  ;;  %v5307_v39 = vrot.slane %v5305_v5, 5  ;;  %1528 = vst.msk [vmem:[#allocation3 + $0xa0] sm:$0xff] %vm282_vm1, %v1461_v46  ;;  %v7509_v44 = vpop.f32.mrb[22].mxu1 }
 0x211   : > { %7702 = vmatprep.mubr.msk.bf16.mxu1 %vm282_vm1, %v7847_v22  ;;  %v5288_v30 = vor.u32 %v5287_v61, %v9003_v1  ;;  %v5309_v55 = vshrl.u32 %v5122_v19, 16  ;;  %v5315_v13 = vshll.u32 %v5123_v37, 16  ;;  %v2271_v16 = vadd.f32 %v8955_v15, %v2239_v56  ;;  %1531 = vst.msk [vmem:[#allocation3 + $0xb8] sm:$0xff] %vm282_vm1, %v7509_v44  ;;  %v1464_v17 = vpop.f32.mrb[23].mxu1  ;;  %v5127_v59 = vld [vmem:[#allocation2 + $0x78] sm:$0xf] }
 0x212   : > { %v5284_v36 = vsel %vm8034_vm10, %v5279_v24, %v9003_v1  ;;  %v5302_v52 = vor.u32 %v5301_v28, %v5298_v20  ;;  %v2269_v57 = vadd.f32 %v2237_v47, %v8958_v18  ;;  %v2272_v41 = vadd.f32 %v8960_v8, %v2240_v26  ;;  %v5126_v18 = vld [vmem:[#allocation2 + $0x74] sm:$0x1]  ;;  %1529 = vst.msk [vmem:[#allocation3 + $0xa8] sm:$0xff] %vm282_vm1, %v1464_v17  ;;  %v5128_v35 = vld [vmem:[#allocation2 + $0x7c] sm:$0xf] }
 0x213   : > { %v5289_v2 = vrot.slane %v5288_v30, 4  ;;  %v5311_v51 = vrot.slane %v5309_v55, 4  ;;  %v5317_v38 = vrot.slane %v5315_v13, 5  ;;  %2303 = vst.msk [vmem:[#allocation3 + $0x10] sm:$0xff] %vm282_vm1, %v2271_v16  ;;  %v2270_v15 = vadd.f32 %v2238_v48, %v8962_v31  ;;  %v7848_v31 = vld [vmem:[#allocation2 + $0x6c] sm:$0xff]   ;;  %v7849_v1 = vld [vmem:[#allocation2 + $0x78] sm:$0xff]  }
 0x214   : > { %v5303_v33 = vrot.slane %v5302_v52, 4  ;;  %2301 = vst.msk [vmem:[#allocation3] sm:$0xff] %vm282_vm1, %v2269_v57  ;;  %v5320_v6 = vshrl.u32 %v5124_v32, 16  ;;  %v5323_v11 = vshll.u32 %v5124_v32, 16  ;;  %2304 = vst.msk [vmem:[#allocation3 + $0x18] sm:$0xff] %vm282_vm1, %v2272_v41  ;;  %v5329_v54 = vshll.u32 %v5125_v34, 16 }
 0x215   : > { %7729 = vmatmul.mubr.msk.bf16.gmra.mrb[132].mxu0 %vm282_vm1, %v8998_v9  ;;  %v5294_v8 = vsel %vm8034_vm10, %v5289_v2, %v5293_v3  ;;  %v5312_v25 = vor.u32 %v5311_v51, %v5307_v39  ;;  %v5333_v0 = vshrl.u32 %v5125_v34, 16  ;;  %2302 = vst.msk [vmem:[#allocation3 + $0x8] sm:$0xff] %vm282_vm1, %v2270_v15  ;;  %v5339_v42 = vshll.u32 %v5126_v18, 16  ;;  %v5129_v37 = vld [vmem:[#allocation2 + $0x80] sm:$0x1]  ;;  %v2243_v13 = vld [vmem:[#allocation3 + $0x30] sm:$0xff] }
 0x216   : > { %7732 = vmatprep.mubr.msk.bf16.mxu0 %vm282_vm1, %v7102_v62  ;;  %v7103_v63 = vcombine.low %v5284_v36, %v5294_v8  ;;  %v5308_v19 = vsel %vm8034_vm10, %v5303_v33, %v5307_v39  ;;  %v5322_v9 = vrot.slane %v5320_v6, 4  ;;  %v5325_v14 = vrot.slane %v5323_v11, 5  ;;  %v5130_v32 = vld [vmem:[#allocation2 + $0x84] sm:$0xf]  ;;  %v2241_v56 = vld [vmem:[#allocation3 + $0x20] sm:$0xff]  ;;  %v2244_v16 = vld [vmem:[#allocation3 + $0x38] sm:$0xff] }
 0x217   : > { %v5313_v27 = vrot.slane %v5312_v25, 4  ;;  %v5331_v29 = vrot.slane %v5329_v54, 5  ;;  %v5335_v40 = vrot.slane %v5333_v0, 4  ;;  %v5344_v4 = vshrl.u32 %v5127_v59, 16  ;;  %v5131_v57 = vld [vmem:[#allocation2 + $0x88] sm:$0xf] }
 0x218   : > { %7703 = vmatmul.mubr.msk.bf16.gmra.mrb[108].mxu1 %vm282_vm1, %v7848_v31  ;;  %v5326_v12 = vor.u32 %v5325_v14, %v5322_v9  ;;  %v5347_v43 = vshll.u32 %v5127_v59, 16  ;;  %v5353_v22 = vshll.u32 %v5128_v35, 16  ;;  %v5341_v3 = vrot.slane %v5339_v42, 5  ;;  %v2242_v51 = vld [vmem:[#allocation3 + $0x28] sm:$0xff]  ;;  %v5133_v41 = vld [vmem:[#allocation2 + $0x90] sm:$0xf] }
 0x219   : > { %7706 = vmatprep.mubr.msk.bf16.mxu1 %vm282_vm1, %v7849_v1  ;;  %v5318_v60 = vsel %vm8034_vm10, %v5313_v27, %v5317_v38  ;;  %v5336_v61 = vor.u32 %v5335_v40, %v5331_v29  ;;  %v5357_v5 = vshrl.u32 %v5128_v35, 16  ;;  %v5346_v20 = vrot.slane %v5344_v4, 4  ;;  %v5132_v38 = vld [vmem:[#allocation2 + $0x8c] sm:$0x1]  ;;  %v7850_v48 = vld [vmem:[#allocation2 + $0x84] sm:$0xff]   ;;  %v7851_v15 = vld [vmem:[#allocation2 + $0x90] sm:$0xff]  }
 0x21a   : > { %v7104_v62 = vcombine.low %v5308_v19, %v5318_v60  ;;  %v5327_v24 = vrot.slane %v5326_v12, 4  ;;  %v5349_v28 = vrot.slane %v5347_v43, 5  ;;  %v5355_v30 = vrot.slane %v5353_v22, 5  ;;  %v5134_v59 = vld [vmem:[#allocation2 + $0x94] sm:$0xf] }
 0x21b   : > { %v5337_v23 = vrot.slane %v5336_v61, 4  ;;  %v5359_v39 = vrot.slane %v5357_v5, 4  ;;  %v5363_v55 = vshll.u32 %v5129_v37, 16  ;;  %v2275_v36 = vadd.f32 %v8996_v58, %v2243_v13  ;;  %v5135_v14 = vld [vmem:[#allocation2 + $0x98] sm:$0x1] }
 0x21c   : > { %v5332_v47 = vsel %vm8034_vm10, %v5327_v24, %v5331_v29  ;;  %v5350_v46 = vor.u32 %v5349_v28, %v5346_v20  ;;  %v2273_v52 = vadd.f32 %v2241_v56, %v9000_v7  ;;  %v2276_v2 = vadd.f32 %v9005_v45, %v2244_v16  ;;  %v5136_v37 = vld [vmem:[#allocation2 + $0x9c] sm:$0xf]  ;;  %v7853_v16 = vld [vmem:[#allocation2 + $0xa8] sm:$0xff]  }
 0x21d   : > { %7733 = vmatmul.mubr.msk.bf16.gmra.mrb[136].mxu0 %vm282_vm1, %v7103_v63  ;;  %v5342_v26 = vsel %vm8034_vm10, %v5337_v23, %v5341_v3  ;;  %v5360_v34 = vor.u32 %v5359_v39, %v5355_v30  ;;  %v5365_v44 = vrot.slane %v5363_v55, 5  ;;  %2307 = vst.msk [vmem:[#allocation3 + $0x30] sm:$0xff] %vm282_vm1, %v2275_v36  ;;  %v2274_v7 = vadd.f32 %v2242_v51, %v9010_v21  ;;  %v2247_v3 = vld [vmem:[#allocation3 + $0x50] sm:$0xff]  ;;  %v2245_v5 = vld [vmem:[#allocation3 + $0x40] sm:$0xff]  ;;  %v2248_v23 = vld [vmem:[#allocation3 + $0x58] sm:$0xff] }
 0x21e   : > { %7736 = vmatprep.mubr.msk.bf16.mxu0 %vm282_vm1, %v7104_v62  ;;  %v7105_v58 = vcombine.low %v5332_v47, %v5342_v26  ;;  %v5351_v17 = vrot.slane %v5350_v46, 4  ;;  %2305 = vst.msk [vmem:[#allocation3 + $0x20] sm:$0xff] %vm282_vm1, %v2273_v52  ;;  %v5368_v33 = vshrl.u32 %v5130_v32, 16  ;;  %2308 = vst.msk [vmem:[#allocation3 + $0x38] sm:$0xff] %vm282_vm1, %v2276_v2  ;;  %v5371_v45 = vshll.u32 %v5130_v32, 16  ;;  %v7530_v8 = vpop.f32.mrb[40].mxu0 }
 0x21f   : > { %v5361_v18 = vrot.slane %v5360_v34, 4  ;;  %v5377_v6 = vshll.u32 %v5131_v57, 16  ;;  %v5381_v11 = vshrl.u32 %v5131_v57, 16  ;;  %2306 = vst.msk [vmem:[#allocation3 + $0x28] sm:$0xff] %vm282_vm1, %v2274_v7  ;;  %v5387_v0 = vshll.u32 %v5132_v38, 16  ;;  %v2142_v35 = vpop.f32.mrb[41].mxu0 }
 0x220   : > { %7707 = vmatmul.mubr.msk.bf16.gmra.mrb[112].mxu1 %vm282_vm1, %v7850_v48  ;;  %v5356_v25 = vsel %vm8034_vm10, %v5351_v17, %v5355_v30  ;;  %v5370_v54 = vrot.slane %v5368_v33, 4  ;;  %v5392_v21 = vshrl.u32 %v5133_v41, 16  ;;  %v5373_v63 = vrot.slane %v5371_v45, 5  ;;  %v7531_v1 = vpop.f32.mrb[42].mxu0  ;;  %v7512_v4 = vpop.f32.mrb[24].mxu1  ;;  %v2246_v46 = vld [vmem:[#allocation3 + $0x48] sm:$0xff] }
 0x221   : > { %7710 = vmatprep.mubr.msk.bf16.mxu1 %vm282_vm1, %v7851_v15  ;;  %v5366_v31 = vsel %vm8034_vm10, %v5361_v18, %v5365_v44  ;;  %v5379_v19 = vrot.slane %v5377_v6, 5  ;;  %v5383_v9 = vrot.slane %v5381_v11, 4  ;;  %v5389_v29 = vrot.slane %v5387_v0, 5  ;;  %v2145_v12 = vpop.f32.mrb[43].mxu0  ;;  %1534 = vst.msk [vmem:[#allocation3 + $0xd0] sm:$0xff] %vm282_vm1, %v7512_v4  ;;  %v1477_v62 = vpop.f32.mrb[25].mxu1 }
 0x222   : > { %v7106_v27 = vcombine.low %v5356_v25, %v5366_v31  ;;  %v5394_v40 = vrot.slane %v5392_v21, 4  ;;  %v5395_v42 = vshll.u32 %v5133_v41, 16  ;;  %v5374_v43 = vor.u32 %v5373_v63, %v5370_v54  ;;  %v5137_v30 = vld [vmem:[#allocation2 + $0xa0] sm:$0xf]  ;;  %1532 = vst.msk [vmem:[#allocation3 + $0xc0] sm:$0xff] %vm282_vm1, %v1477_v62  ;;  %v7513_v39 = vpop.f32.mrb[26].mxu1 }
 0x223   : > { %v5384_v22 = vor.u32 %v5383_v9, %v5379_v19  ;;  %v5401_v60 = vshll.u32 %v5134_v59, 16  ;;  %v5405_v61 = vshrl.u32 %v5134_v59, 16  ;;  %v5411_v20 = vshll.u32 %v5135_v14, 16  ;;  %1535 = vst.msk [vmem:[#allocation3 + $0xd8] sm:$0xff] %vm282_vm1, %v7513_v39  ;;  %v1480_v36 = vpop.f32.mrb[27].mxu1  ;;  %v7852_v52 = vld [vmem:[#allocation2 + $0x9c] sm:$0xff]  }
 0x224   : > { %v5397_v24 = vrot.slane %v5395_v42, 5  ;;  %v2279_v28 = vadd.f32 %v7530_v8, %v2247_v3  ;;  %v2277_v32 = vadd.f32 %v2245_v5, %v2142_v35  ;;  %v5375_v55 = vrot.slane %v5374_v43, 4  ;;  %1533 = vst.msk [vmem:[#allocation3 + $0xc8] sm:$0xff] %vm282_vm1, %v1480_v36  ;;  %v5138_v38 = vld [vmem:[#allocation2 + $0xa4] sm:$0x1]  ;;  %v7854_v43 = vld [vmem:[#allocation2 + $0xb4] sm:$0xff]  }
 0x225   : > { %7737 = vmatmul.mubr.msk.bf16.gmra.mrb[140].mxu0 %vm282_vm1, %v7105_v58  ;;  %v5385_v13 = vrot.slane %v5384_v22, 4  ;;  %v5403_v56 = vrot.slane %v5401_v60, 5  ;;  %v5407_v47 = vrot.slane %v5405_v61, 4  ;;  %v2280_v26 = vadd.f32 %v7531_v1, %v2248_v23  ;;  %v5139_v48 = vld [vmem:[#allocation2 + $0xa8] sm:$0xf]  ;;  %v7855_v5 = vld [vmem:[#allocation2 + $0xc0] sm:$0xff]  }
 0x226   : > { %7740 = vmatprep.mubr.msk.bf16.mxu0 %vm282_vm1, %v7106_v27  ;;  %v5398_v57 = vor.u32 %v5397_v24, %v5394_v40  ;;  %2311 = vst.msk [vmem:[#allocation3 + $0x50] sm:$0xff] %vm282_vm1, %v2279_v28  ;;  %2309 = vst.msk [vmem:[#allocation3 + $0x40] sm:$0xff] %vm282_vm1, %v2277_v32  ;;  %v2278_v34 = vadd.f32 %v2246_v46, %v2145_v12  ;;  %v5413_v51 = vrot.slane %v5411_v20, 5  ;;  %v5416_v41 = vshrl.u32 %v5136_v37, 16  ;;  %v5140_v11 = vld [vmem:[#allocation2 + $0xac] sm:$0xf] }
 0x227   : > { %v5390_v44 = vsel %vm8034_vm10, %v5385_v13, %v5389_v29  ;;  %v5408_v2 = vor.u32 %v5407_v47, %v5403_v56  ;;  %v5380_v58 = vsel %vm8034_vm10, %v5375_v55, %v5379_v19  ;;  %2312 = vst.msk [vmem:[#allocation3 + $0x58] sm:$0xff] %vm282_vm1, %v2280_v26  ;;  %v5419_v7 = vshll.u32 %v5136_v37, 16  ;;  %v5141_v0 = vld [vmem:[#allocation2 + $0xb0] sm:$0x1]  ;;  %v607_v19 = vld [vmem:[#allocation2 + $0xcc] sm:$0x1] }
 0x228   : > { %7711 = vmatmul.mubr.msk.bf16.gmra.mrb[116].mxu1 %vm282_vm1, %v7852_v52  ;;  %v5399_v17 = vrot.slane %v5398_v57, 4  ;;  %2310 = vst.msk [vmem:[#allocation3 + $0x48] sm:$0xff] %vm282_vm1, %v2278_v34  ;;  %v5425_v33 = vshll.u32 %v5137_v30, 16  ;;  %v7107_v15 = vcombine.low %v5380_v58, %v5390_v44  ;;  %v5418_v45 = vrot.slane %v5416_v41, 4  ;;  %v5142_v9 = vld [vmem:[#allocation2 + $0xb4] sm:$0xf] }
 0x229   : > { %7714 = vmatprep.mubr.msk.bf16.mxu1 %vm282_vm1, %v7853_v16  ;;  %v5409_v18 = vrot.slane %v5408_v2, 4  ;;  %v5429_v6 = vshrl.u32 %v5137_v30, 16  ;;  %v5421_v8 = vrot.slane %v5419_v7, 5  ;;  %v5435_v54 = vshll.u32 %v5138_v38, 16  ;;  %v5143_v4 = vld [vmem:[#allocation2 + $0xb8] sm:$0xf] }
 0x22a   : > { %v5427_v25 = vrot.slane %v5425_v33, 5  ;;  %v5440_v59 = vshrl.u32 %v5139_v48, 16  ;;  %v5404_v21 = vsel %vm8034_vm10, %v5399_v17, %v5403_v56  ;;  %v5443_v63 = vshll.u32 %v5139_v48, 16  ;;  %v5144_v32 = vld [vmem:[#allocation2 + $0xbc] sm:$0x1]  ;;  %v2251_v39 = vld [vmem:[#allocation3 + $0x70] sm:$0xff] }
 0x22b   : > { %v5414_v35 = vsel %vm8034_vm10, %v5409_v18, %v5413_v51  ;;  %v5431_v31 = vrot.slane %v5429_v6, 4  ;;  %v5422_v1 = vor.u32 %v5421_v8, %v5418_v45  ;;  %v5449_v29 = vshll.u32 %v5140_v11, 16  ;;  %v5894_v47 = vld [vmem:[#allocation2 + $0x1c] sm:$0xf]  ;;  %v5895_v34 = vld [vmem:[#allocation2 + $0x20] sm:$0x1] }
 0x22c   : > { %v7108_v14 = vcombine.low %v5404_v21, %v5414_v35  ;;  %v5442_v27 = vrot.slane %v5440_v59, 4  ;;  %v5445_v42 = vrot.slane %v5443_v63, 5  ;;  %v5453_v12 = vshrl.u32 %v5140_v11, 16  ;;  %v2249_v26 = vld [vmem:[#allocation3 + $0x60] sm:$0xff]  ;;  %v2252_v41 = vld [vmem:[#allocation3 + $0x78] sm:$0xff] }
 0x22d   : > { %7741 = vmatmul.mubr.msk.bf16.gmra.mrb[144].mxu0 %vm282_vm1, %v7107_v15  ;;  %v5432_v40 = vor.u32 %v5431_v31, %v5427_v25  ;;  %v5459_v37 = vshll.u32 %v5141_v0, 16  ;;  %v5423_v22 = vrot.slane %v5422_v1, 4  ;;  %v5451_v60 = vrot.slane %v5449_v29, 5  ;;  %v5145_v58 = vld [vmem:[#allocation2 + $0xc0] sm:$0xf] }
 0x22e   : > { %7744 = vmatprep.mubr.msk.bf16.mxu0 %vm282_vm1, %v7108_v14  ;;  %v608_v61 = vsel %vm7969_vm4, 0, %v607_v19  ;;  %v5464_v3 = vshrl.u32 %v5142_v9, 16  ;;  %v5437_v24 = vrot.slane %v5435_v54, 5  ;;  %v5446_v20 = vor.u32 %v5445_v42, %v5442_v27  ;;  %v2250_v15 = vld [vmem:[#allocation3 + $0x68] sm:$0xff]  ;;  %v5147_v19 = vld [vmem:[#allocation2 + $0xc8] sm:$0x1] }
 0x22f   : > { %v5433_v62 = vrot.slane %v5432_v40, 4  ;;  %v5455_v28 = vrot.slane %v5453_v12, 4  ;;  %609 = vst [vmem:[#allocation2 + $0xcc] sm:$0x1] %v608_v61  ;;  %v5428_v23 = vsel %vm8034_vm10, %v5423_v22, %v5427_v25  ;;  %v7534_v30 = vpop.f32.mrb[44].mxu0  ;;  %v5467_v13 = vshll.u32 %v5142_v9, 16 }
 0x230   : > { %7715 = vmatmul.mubr.msk.bf16.gmra.mrb[120].mxu1 %vm282_vm1, %v7854_v43  ;;  %v5466_v55 = vrot.slane %v5464_v3, 4  ;;  %v5473_v56 = vshll.u32 %v5143_v4, 16  ;;  %v5447_v36 = vrot.slane %v5446_v20, 4  ;;  %v2283_v16 = vadd.f32 %v7534_v30, %v2251_v39  ;;  %v2158_v57 = vpop.f32.mrb[45].mxu0  ;;  %v5146_v0 = vld [vmem:[#allocation2 + $0xc4] sm:$0xf] }
 0x231   : > { %7718 = vmatprep.mubr.msk.bf16.mxu1 %vm282_vm1, %v7855_v5  ;;  %v5438_v46 = vsel %vm8034_vm10, %v5433_v62, %v5437_v24  ;;  %v5456_v52 = vor.u32 %v5455_v28, %v5451_v60  ;;  %v5461_v2 = vrot.slane %v5459_v37, 5  ;;  %v2281_v51 = vadd.f32 %v2249_v26, %v2158_v57  ;;  %v7535_v38 = vpop.f32.mrb[46].mxu0  ;;  %v7516_v6 = vpop.f32.mrb[28].mxu1  ;;  %v5896_v43 = vld [vmem:[#allocation2 + $0x24] sm:$0xe]  ;;  %v2253_v57 = vld [vmem:[#allocation3 + $0x80] sm:$0xff] }
 0x232   : > { %v7109_v44 = vcombine.low %v5428_v23, %v5438_v46  ;;  %v5469_v48 = vrot.slane %v5467_v13, 5  ;;  %2315 = vst.msk [vmem:[#allocation3 + $0x70] sm:$0xff] %vm282_vm1, %v2283_v16  ;;  %v2284_v7 = vadd.f32 %v7535_v38, %v2252_v41  ;;  %v2161_v33 = vpop.f32.mrb[47].mxu0  ;;  %v5475_v18 = vrot.slane %v5473_v56, 5  ;;  %1538 = vst.msk [vmem:[#allocation3 + $0xf0] sm:$0xff] %vm282_vm1, %v7516_v6  ;;  %v1493_v59 = vpop.f32.mrb[29].mxu1 }
 0x233   : > { %v5457_v17 = vrot.slane %v5456_v52, 4  ;;  %v5477_v45 = vshrl.u32 %v5143_v4, 16  ;;  %v5452_v11 = vsel %vm8034_vm10, %v5447_v36, %v5451_v60  ;;  %2313 = vst.msk [vmem:[#allocation3 + $0x60] sm:$0xff] %vm282_vm1, %v2281_v51  ;;  %v2282_v8 = vadd.f32 %v2250_v15, %v2161_v33  ;;  %1536 = vst.msk [vmem:[#allocation3 + $0xe0] sm:$0xff] %vm282_vm1, %v1493_v59  ;;  %v7517_v9 = vpop.f32.mrb[30].mxu1  ;;  %v2256_v41 = vld [vmem:[#allocation3 + $0x98] sm:$0xff] }
 0x234   : > { %v5470_v25 = vor.u32 %v5469_v48, %v5466_v55  ;;  %v5483_v54 = vshll.u32 %v5144_v32, 16  ;;  %2316 = vst.msk [vmem:[#allocation3 + $0x78] sm:$0xff] %vm282_vm1, %v2284_v7  ;;  %v7130_v31 = vrot.slane %v5893_v50, 9  ;;  %v5991_v63 = vrot.slane %v5894_v47, 5  ;;  %1539 = vst.msk [vmem:[#allocation3 + $0xf8] sm:$0xff] %vm282_vm1, %v7517_v9  ;;  %v1496_v22 = vpop.f32.mrb[31].mxu1 }
 0x235   : > { %7745 = vmatmul.mubr.msk.bf16.gmra.mrb[148].mxu0 %vm282_vm1, %v7109_v44  ;;  %v5462_v21 = vsel %vm8034_vm10, %v5457_v17, %v5461_v2  ;;  %v5479_v35 = vrot.slane %v5477_v45, 4  ;;  %2314 = vst.msk [vmem:[#allocation3 + $0x68] sm:$0xff] %vm282_vm1, %v2282_v8  ;;  %v5994_v29 = vrot.slane %v5895_v34, 5  ;;  %v5488_v40 = vshrl.u32 %v5145_v58, 16  ;;  %v5897_v62 = vld [vmem:[#allocation2 + $0x28] sm:$0xf] }
 0x236   : > { %v7110_v14 = vcombine.low %v5452_v11, %v5462_v21  ;;  %v7856_v1 = vld [vmem:[#allocation2 + $0xcc] sm:$0xff]   ;;  %v5471_v27 = vrot.slane %v5470_v25, 4  ;;  %v5485_v12 = vrot.slane %v5483_v54, 5  ;;  %v5993_v37 = vrot.slane %v5991_v63, 4  ;;  %1537 = vst.msk [vmem:[#allocation3 + $0xe8] sm:$0xff] %vm282_vm1, %v1496_v22  ;;  %v2254_v48 = vld [vmem:[#allocation3 + $0x88] sm:$0xff] }
 0x237   : > { %v5480_v42 = vor.u32 %v5479_v35, %v5475_v18  ;;  %v5491_v4 = vshll.u32 %v5145_v58, 16  ;;  %v5992_v60 = vsel %vm8403_vm2, %v7130_v31, %v5991_v63  ;;  %v5490_v61 = vrot.slane %v5488_v40, 4  ;;  %v5898_v23 = vld [vmem:[#allocation2 + $0x2c] sm:$0x1]  ;;  %v5899_v47 = vld [vmem:[#allocation2 + $0x30] sm:$0xe] }
 0x238   : > { %7748 = vmatprep.mubr.msk.bf16.mxu0 %vm282_vm1, %v7110_v14  ;;  %7719 = vmatmul.mubr.msk.bf16.gmra.mrb[124].mxu1 %vm282_vm1, %v7856_v1  ;;  %v5497_v3 = vshll.u32 %v5146_v0, 16  ;;  %v5501_v5 = vshrl.u32 %v5146_v0, 16  ;;  %v5995_v20 = vsel %vm8403_vm2, %v5993_v37, %v5994_v29  ;;  %v5507_v32 = vshll.u32 %v5147_v19, 16  ;;  %v2255_v50 = vld [vmem:[#allocation3 + $0x90] sm:$0xff]  ;;  %v5900_v34 = vld [vmem:[#allocation2 + $0x34] sm:$0xf] }
 0x239   : > { %v5481_v24 = vrot.slane %v5480_v42, 4  ;;  %v5493_v28 = vrot.slane %v5491_v4, 5  ;;  %v5476_v30 = vsel %vm8034_vm10, %v5471_v27, %v5475_v18  ;;  %v7147_v39 = vcombine.low %v5992_v60, %v5995_v20  ;;  %v7538_v56 = vpop.f32.mrb[48].mxu0  ;;  %v663_v17 = vld [vmem:[#allocation2 + $0xd4] sm:$0x1] }
 0x23a   : > { %v5499_v55 = vrot.slane %v5497_v3, 5  ;;  %v5503_v13 = vrot.slane %v5501_v5, 4  ;;  %v2287_v52 = vadd.f32 %v7538_v56, %v2255_v50  ;;  %v2174_v16 = vpop.f32.mrb[49].mxu0  ;;  %v7131_v26 = vrot.slane %v5896_v43, 9  ;;  %v5148_v6 = vld [vmem:[#allocation2 + $0xcc] sm:$0xf] }
 0x23b   : > { %v5486_v46 = vsel %vm8034_vm10, %v5481_v24, %v5485_v12  ;;  %v5494_v36 = vor.u32 %v5493_v28, %v5490_v61  ;;  %7758 = vmatprep.mubr.msk.bf16.mxu1 %vm282_vm1, %v7147_v39  ;;  %v2285_v51 = vadd.f32 %v2253_v57, %v2174_v16  ;;  %v7539_v38 = vpop.f32.mrb[50].mxu0  ;;  %v5998_v58 = vrot.slane %v5897_v62, 5  ;;  %v5901_v54 = vld [vmem:[#allocation2 + $0x38] sm:$0x1]  ;;  %v5149_v63 = vld [vmem:[#allocation2 + $0xd0] sm:$0xf] }
 0x23c   : > { %v7111_v44 = vcombine.low %v5476_v30, %v5486_v46  ;;  %v5504_v2 = vor.u32 %v5503_v13, %v5499_v55  ;;  %v5509_v33 = vrot.slane %v5507_v32, 5  ;;  %2319 = vst.msk [vmem:[#allocation3 + $0x90] sm:$0xff] %vm282_vm1, %v2287_v52  ;;  %v2288_v15 = vadd.f32 %v7539_v38, %v2256_v41  ;;  %v2177_v18 = vpop.f32.mrb[51].mxu0  ;;  %v5903_v27 = vld [vmem:[#allocation2 + $0x40] sm:$0xf]  ;;  %v2259_v61 = vld [vmem:[#allocation3 + $0xb0] sm:$0xff] }
 0x23d   : > { %v5495_v7 = vrot.slane %v5494_v36, 4  ;;  %v6001_v45 = vrot.slane %v5898_v23, 5  ;;  %2317 = vst.msk [vmem:[#allocation3 + $0x80] sm:$0xff] %vm282_vm1, %v2285_v51  ;;  %v2286_v8 = vadd.f32 %v2254_v48, %v2177_v18  ;;  %v6000_v25 = vrot.slane %v5998_v58, 4  ;;  %v5902_v37 = vld [vmem:[#allocation2 + $0x3c] sm:$0xe] }
 0x23e   : > { %7749 = vmatmul.mubr.msk.bf16.gmra.mrb[152].mxu0 %vm282_vm1, %v7111_v44  ;;  %v5505_v11 = vrot.slane %v5504_v2, 4  ;;  %v7132_v0 = vrot.slane %v5899_v47, 9  ;;  %2320 = vst.msk [vmem:[#allocation3 + $0x98] sm:$0xff] %vm282_vm1, %v2288_v15  ;;  %v5999_v21 = vsel %vm8403_vm2, %v7131_v26, %v5998_v58  ;;  %v6005_v35 = vrot.slane %v5900_v34, 5  ;;  %v5904_v20 = vld [vmem:[#allocation2 + $0x44] sm:$0x1] }
 0x23f   : > { %v5500_v59 = vsel %vm8034_vm10, %v5495_v7, %v5499_v55  ;;  %v664_v31 = vsel %vm7977_vm6, 0, %v663_v17  ;;  %2318 = vst.msk [vmem:[#allocation3 + $0x88] sm:$0xff] %vm282_vm1, %v2286_v8  ;;  %v6002_v9 = vsel %vm8403_vm2, %v6000_v25, %v6001_v45  ;;  %v5512_v14 = vshrl.u32 %v5148_v6, 16  ;;  %v5906_v32 = vld [vmem:[#allocation2 + $0x4c] sm:$0xf]  ;;  %v2257_v13 = vld [vmem:[#allocation3 + $0xa0] sm:$0xff] }
 0x240   : > { %v5510_v19 = vsel %vm8034_vm10, %v5505_v11, %v5509_v33  ;;  %665 = vst [vmem:[#allocation2 + $0xd4] sm:$0x1] %v664_v31  ;;  %v5515_v1 = vshll.u32 %v5148_v6, 16  ;;  %v7148_v40 = vcombine.low %v5999_v21, %v6002_v9  ;;  %v6007_v42 = vrot.slane %v6005_v35, 4  ;;  %v2260_v50 = vld [vmem:[#allocation3 + $0xb8] sm:$0xff]  ;;  %v2258_v52 = vld [vmem:[#allocation3 + $0xa8] sm:$0xff] }
 0x241   : > { %v7112_v29 = vcombine.low %v5500_v59, %v5510_v19  ;;  %v6008_v12 = vrot.slane %v5901_v54, 5  ;;  %v5514_v53 = vrot.slane %v5512_v14, 4  ;;  %v5521_v43 = vshll.u32 %v5149_v63, 16  ;;  %v7542_v60 = vpop.f32.mrb[52].mxu0  ;;  %v5905_v26 = vld [vmem:[#allocation2 + $0x48] sm:$0xe] }
 0x242   : > { %v5517_v4 = vrot.slane %v5515_v1, 5  ;;  %v5525_v22 = vshrl.u32 %v5149_v63, 16  ;;  %7759 = vmatmul.mubr.msk.bf16.vlgmr.msra.gmra.mrb[128].mxu1 %vm282_vm1, %v7148_v40  ;;  %v6006_v3 = vsel %vm8403_vm2, %v7132_v0, %v6005_v35  ;;  %v2291_v62 = vadd.f32 %v7542_v60, %v2259_v61  ;;  %v2190_v24 = vpop.f32.mrb[53].mxu0  ;;  %v5907_v38 = vld [vmem:[#allocation2 + $0x50] sm:$0x1]  ;;  %v2263_v40 = vld [vmem:[#allocation3 + $0xd0] sm:$0xff] }
 0x243   : > { %7752 = vmatprep.mubr.msk.bf16.mxu0 %vm282_vm1, %v7112_v29  ;;  %v6009_v5 = vsel %vm8403_vm2, %v6007_v42, %v6008_v12  ;;  %v6012_v28 = vrot.slane %v5903_v27, 5  ;;  %v5523_v39 = vrot.slane %v5521_v43, 5  ;;  %v7543_v56 = vpop.f32.mrb[54].mxu0  ;;  %v2289_v47 = vadd.f32 %v2257_v13, %v2190_v24  ;;  %v5909_v41 = vld [vmem:[#allocation2 + $0x58] sm:$0xf] }
 0x244   : > { %v7149_v23 = vcombine.low %v6006_v3, %v6009_v5  ;;  %v5518_v30 = vor.u32 %v5517_v4, %v5514_v53  ;;  %v5527_v55 = vrot.slane %v5525_v22, 4  ;;  %2323 = vst.msk [vmem:[#allocation3 + $0xb0] sm:$0xff] %vm282_vm1, %v2291_v62  ;;  %v2292_v46 = vadd.f32 %v7543_v56, %v2260_v50  ;;  %v2193_v36 = vpop.f32.mrb[55].mxu0  ;;  %v5912_v7 = vld [vmem:[#allocation2 + $0x64] sm:$0xf]  ;;  %v2261_v22 = vld [vmem:[#allocation3 + $0xc0] sm:$0xff] }
 0x245   : > { %v7133_v16 = vrot.slane %v5902_v37, 9  ;;  %v6014_v57 = vrot.slane %v6012_v28, 4  ;;  %v2290_v2 = vadd.f32 %v2258_v52, %v2193_v36  ;;  %v6015_v51 = vrot.slane %v5904_v20, 5  ;;  %2321 = vst.msk [vmem:[#allocation3 + $0xa0] sm:$0xff] %vm282_vm1, %v2289_v47  ;;  %v5910_v25 = vld [vmem:[#allocation2 + $0x5c] sm:$0x1] }
 0x246   : > { %7762 = vmatprep.mubr.msk.bf16.mxu1 %vm282_vm1, %v7149_v23  ;;  %v5519_v34 = vrot.slane %v5518_v30, 4  ;;  %v5528_v44 = vor.u32 %v5527_v55, %v5523_v39  ;;  %2324 = vst.msk [vmem:[#allocation3 + $0xb8] sm:$0xff] %vm282_vm1, %v2292_v46  ;;  %v6019_v17 = vrot.slane %v5906_v32, 5  ;;  %v7134_v45 = vrot.slane %v5905_v26, 9  ;;  %v5913_v21 = vld [vmem:[#allocation2 + $0x68] sm:$0x1] }
 0x247   : > { %v5150_v48 = vld [vmem:[#allocation2 + $0xd4] sm:$0x1]  ;;  %v6013_v58 = vsel %vm8403_vm2, %v7133_v16, %v6012_v28  ;;  %2322 = vst.msk [vmem:[#allocation3 + $0xa8] sm:$0xff] %vm282_vm1, %v2290_v2  ;;  %v6016_v18 = vsel %vm8403_vm2, %v6014_v57, %v6015_v51  ;;  %v6022_v8 = vrot.slane %v5907_v38, 5  ;;  %v6026_v54 = vrot.slane %v5909_v41, 5  ;;  %v2262_v23 = vld [vmem:[#allocation3 + $0xc8] sm:$0xff] }
 0x248   : > { %v5529_v33 = vrot.slane %v5528_v44, 4  ;;  %v5531_v15 = vshll.u32 %v5150_v48, 16  ;;  %v7150_v6 = vcombine.low %v6013_v58, %v6016_v18  ;;  %v6021_v11 = vrot.slane %v6019_v17, 4  ;;  %v5908_v19 = vld [vmem:[#allocation2 + $0x54] sm:$0xe]  ;;  %v2808_v50 = vld [vmem:[#allocation3 + $0x10] sm:$0xff] }
 0x249   : > { %v5524_v0 = vsel %vm8034_vm10, %v5519_v34, %v5523_v39  ;;  %v6033_v35 = vrot.slane %v5912_v7, 5  ;;  %v6020_v31 = vsel %vm8403_vm2, %v7134_v45, %v6019_v17  ;;  %v6028_v9 = vrot.slane %v6026_v54, 4  ;;  %v9154_v14 = vld [vmem:[#allocation2 + $0x70] sm:$0xf]  ;;  %v5911_v12 = vld [vmem:[#allocation2 + $0x60] sm:$0xe] }
 0x24a   : > { %v5533_v59 = vrot.slane %v5531_v15, 5  ;;  %7763 = vmatmul.mubr.msk.bf16.gmra.mrb[132].mxu1 %vm282_vm1, %v7150_v6  ;;  %v6023_v63 = vsel %vm8403_vm2, %v6021_v11, %v6022_v8  ;;  %v6029_v42 = vrot.slane %v5910_v25, 5  ;;  %v6036_v60 = vrot.slane %v5913_v21, 5  ;;  %v9158_v61 = vld [vmem:[#allocation2 + $0x7c] sm:$0xf]  ;;  %v2264_v62 = vld [vmem:[#allocation3 + $0xd8] sm:$0xff] }
 0x24b   : > { %v7151_v27 = vcombine.low %v6020_v31, %v6023_v63  ;;  %v7546_v29 = vpop.f32.mrb[56].mxu0  ;;  %v6035_v37 = vrot.slane %v6033_v35, 4  ;;  %v7135_v49 = vrot.slane %v5908_v19, 9  ;;  %v6040_v20 = vrot.slane %v9154_v14, 5  ;;  %v2806_v57 = vld [vmem:[#allocation3] sm:$0xff]  ;;  %v2809_v38 = vld [vmem:[#allocation3 + $0x18] sm:$0xff] }
 0x24c   : > { %v5534_v1 = vsel %vm8034_vm10, %v5529_v33, %v5533_v59  ;;  %v2295_v4 = vadd.f32 %v7546_v29, %v2263_v40  ;;  %v2206_v43 = vpop.f32.mrb[57].mxu0  ;;  %v6030_v24 = vsel %vm8403_vm2, %v6028_v9, %v6029_v42  ;;  %v7136_v30 = vrot.slane %v5911_v12, 9  ;;  %v5914_v26 = vld [vmem:[#allocation2 + $0x6c] sm:$0xe]  ;;  %v5916_v34 = vld [vmem:[#allocation2 + $0x74] sm:$0x1] }
 0x24d   : > { %v7113_v53 = vcombine.low %v5524_v0, %v5534_v1  ;;  %7766 = vmatprep.mubr.msk.bf16.mxu1 %vm282_vm1, %v7151_v27  ;;  %v2293_v3 = vadd.f32 %v2261_v22, %v2206_v43  ;;  %v7547_v5 = vpop.f32.mrb[58].mxu0  ;;  %v6037_v39 = vsel %vm8403_vm2, %v6035_v37, %v6036_v60  ;;  %v6027_v13 = vsel %vm8403_vm2, %v7135_v49, %v6026_v54  ;;  %v5919_v48 = vld [vmem:[#allocation2 + $0x80] sm:$0x1]  ;;  %v9178_v15 = vld [vmem:[#allocation2 + $0x88] sm:$0xf]  ;;  %v2265_v42 = vld [vmem:[#allocation3 + $0xe0] sm:$0xff] }
 0x24e   : > { %2327 = vst.msk [vmem:[#allocation3 + $0xd0] sm:$0xff] %vm282_vm1, %v2295_v4  ;;  %v2296_v28 = vadd.f32 %v7547_v5, %v2264_v62  ;;  %v2209_v32 = vpop.f32.mrb[59].mxu0  ;;  %v6047_v47 = vrot.slane %v9158_v61, 5  ;;  %v7152_v46 = vcombine.low %v6027_v13, %v6030_v24  ;;  %v6034_v36 = vsel %vm8403_vm2, %v7136_v30, %v6033_v35  ;;  %v2807_v7 = vld [vmem:[#allocation3 + $0x8] sm:$0xff]  ;;  %v5917_v6 = vld [vmem:[#allocation2 + $0x78] sm:$0xe] }
 0x24f   : > { %7753 = vmatmul.mubr.msk.bf16.gmra.mrb[156].mxu0 %vm282_vm1, %v7113_v53  ;;  %2325 = vst.msk [vmem:[#allocation3 + $0xc0] sm:$0xff] %vm282_vm1, %v2293_v3  ;;  %v2294_v55 = vadd.f32 %v2262_v23, %v2209_v32  ;;  %v7556_v56 = vpop.f32.mrb[32].mxu1  ;;  %v7153_v44 = vcombine.low %v6034_v36, %v6037_v39  ;;  %v6042_v41 = vrot.slane %v6040_v20, 4  ;;  %v6043_v45 = vrot.slane %v5916_v34, 5  ;;  %v9182_v11 = vld [vmem:[#allocation2 + $0x94] sm:$0xf] }
 0x250   : > { %2328 = vst.msk [vmem:[#allocation3 + $0xd8] sm:$0xff] %vm282_vm1, %v2296_v28  ;;  %v2840_v52 = vadd.f32 %v7556_v56, %v2808_v50  ;;  %v2679_v16 = vpop.f32.mrb[33].mxu1  ;;  %v6049_v33 = vrot.slane %v6047_v47, 4  ;;  %v6050_v8 = vrot.slane %v5919_v48, 5  ;;  %v7137_v25 = vrot.slane %v5914_v26, 9  ;;  %v2267_v19 = vld [vmem:[#allocation3 + $0xf0] sm:$0xff] }
 0x251   : > { %2326 = vst.msk [vmem:[#allocation3 + $0xc8] sm:$0xff] %vm282_vm1, %v2294_v55  ;;  %v2838_v2 = vadd.f32 %v2806_v57, %v2679_v16  ;;  %v7557_v51 = vpop.f32.mrb[34].mxu1  ;;  %v6044_v54 = vsel %vm8403_vm2, %v6042_v41, %v6043_v45  ;;  %v6054_v0 = vrot.slane %v9178_v15, 5  ;;  %v7138_v59 = vrot.slane %v5917_v6, 9  ;;  %v5922_v35 = vld [vmem:[#allocation2 + $0x8c] sm:$0x1] }
 0x252   : > { %7767 = vmatmul.mubr.msk.bf16.gmra.mrb[136].mxu1 %vm282_vm1, %v7152_v46  ;;  %2872 = vst.msk [vmem:[#allocation3 + $0x10] sm:$0xff] %vm282_vm1, %v2840_v52  ;;  %v2841_v58 = vadd.f32 %v7557_v51, %v2809_v38  ;;  %v2682_v17 = vpop.f32.mrb[35].mxu1  ;;  %v6051_v21 = vsel %vm8403_vm2, %v6049_v33, %v6050_v8  ;;  %v6061_v31 = vrot.slane %v9182_v11, 5  ;;  %v6041_v9 = vsel %vm8403_vm2, %v7137_v25, %v6040_v20  ;;  %v2812_v1 = vld [vmem:[#allocation3 + $0x30] sm:$0xff]  ;;  %v5925_v27 = vld [vmem:[#allocation2 + $0x98] sm:$0x1] }
 0x253   : > { %7770 = vmatprep.mubr.msk.bf16.mxu1 %vm282_vm1, %v7153_v44  ;;  %2870 = vst.msk [vmem:[#allocation3] sm:$0xff] %vm282_vm1, %v2838_v2  ;;  %v2839_v18 = vadd.f32 %v2807_v7, %v2682_v17  ;;  %v7154_v12 = vcombine.low %v6041_v9, %v6044_v54  ;;  %v6048_v37 = vsel %vm8403_vm2, %v7138_v59, %v6047_v47  ;;  %v2810_v43 = vld [vmem:[#allocation3 + $0x20] sm:$0xff]  ;;  %v5920_v22 = vld [vmem:[#allocation2 + $0x84] sm:$0xe]  ;;  %v9196_v60 = vld [vmem:[#allocation2 + $0xa0] sm:$0xf] }
 0x254   : > { %2873 = vst.msk [vmem:[#allocation3 + $0x18] sm:$0xff] %vm282_vm1, %v2841_v58  ;;  %v2268_v5 = vld [vmem:[#allocation3 + $0xf8] sm:$0xff]  ;;  %v7155_v62 = vcombine.low %v6048_v37, %v6051_v21  ;;  %v6056_v28 = vrot.slane %v6054_v0, 4  ;;  %v2266_v30 = vld [vmem:[#allocation3 + $0xe8] sm:$0xff]  ;;  %v6063_v56 = vrot.slane %v6061_v31, 4  ;;  %v6057_v46 = vrot.slane %v5922_v35, 5 }
 0x255   : > { %2871 = vst.msk [vmem:[#allocation3 + $0x8] sm:$0xff] %vm282_vm1, %v2839_v18  ;;  %v2813_v20 = vld [vmem:[#allocation3 + $0x38] sm:$0xff]  ;;  %v2811_v13 = vld [vmem:[#allocation3 + $0x28] sm:$0xff]  ;;  %v9208_v52 = vld [vmem:[#allocation2 + $0xac] sm:$0xf]  ;;  %v6064_v16 = vrot.slane %v5925_v27, 5 }
 0x256   : > { %v5923_v36 = vld [vmem:[#allocation2 + $0x90] sm:$0xe]  ;;  %v7139_v26 = vrot.slane %v5920_v22, 9  ;;  %v6058_v34 = vsel %vm8403_vm2, %v6056_v28, %v6057_v46  ;;  %v6068_v44 = vrot.slane %v9196_v60, 5  ;;  %v6075_v41 = vrot.slane %v9208_v52, 5  ;;  %v2816_v33 = vld [vmem:[#allocation3 + $0x50] sm:$0xff] }
 0x257   : > { %v7550_v63 = vpop.f32.mrb[60].mxu0  ;;  %v7560_v14 = vpop.f32.mrb[36].mxu1  ;;  %v7140_v51 = vrot.slane %v5923_v36, 9  ;;  %v6065_v38 = vsel %vm8403_vm2, %v6063_v56, %v6064_v16  ;;  %v2814_v21 = vld [vmem:[#allocation3 + $0x40] sm:$0xff]  ;;  %v5929_v60 = vld [vmem:[#allocation2 + $0xa8] sm:$0xe] }
 0x258   : > { %v2299_v29 = vadd.f32 %v7550_v63, %v2267_v19  ;;  %v2222_v40 = vpop.f32.mrb[61].mxu0  ;;  %v2844_v53 = vadd.f32 %v7560_v14, %v2812_v1  ;;  %v2695_v4 = vpop.f32.mrb[37].mxu1  ;;  %v6055_v17 = vsel %vm8403_vm2, %v7139_v26, %v6054_v0  ;;  %v5926_v35 = vld [vmem:[#allocation2 + $0x9c] sm:$0xe]  ;;  %v5928_v63 = vld [vmem:[#allocation2 + $0xa4] sm:$0x1] }
 0x259   : > { %v2297_v61 = vadd.f32 %v2265_v42, %v2222_v40  ;;  %v7551_v3 = vpop.f32.mrb[62].mxu0  ;;  %v2842_v49 = vadd.f32 %v2810_v43, %v2695_v4  ;;  %v7561_v24 = vpop.f32.mrb[38].mxu1  ;;  %v3230_v57 = vld [vmem:[#allocation3 + $0x10] sm:$0xff]  ;;  %v7156_v8 = vcombine.low %v6055_v17, %v6058_v34  ;;  %v6062_v25 = vsel %vm8403_vm2, %v7140_v51, %v6061_v31  ;;  %v2817_v1 = vld [vmem:[#allocation3 + $0x58] sm:$0xff] }
 0x25a   : > { %2331 = vst.msk [vmem:[#allocation3 + $0xf0] sm:$0xff] %vm282_vm1, %v2299_v29  ;;  %v2300_v32 = vadd.f32 %v7551_v3, %v2268_v5  ;;  %v2225_v23 = vpop.f32.mrb[63].mxu0  ;;  %7771 = vmatmul.mubr.msk.bf16.gmra.mrb[140].mxu1 %vm282_vm1, %v7154_v12  ;;  %2876 = vst.msk [vmem:[#allocation3 + $0x30] sm:$0xff] %vm282_vm1, %v2844_v53  ;;  %v2845_v39 = vadd.f32 %v7561_v24, %v2813_v20  ;;  %v2698_v55 = vpop.f32.mrb[39].mxu1  ;;  %v3228_v2 = vld [vmem:[#allocation3] sm:$0xff]  ;;  %v7157_v9 = vcombine.low %v6062_v25, %v6065_v38  ;;  %v2815_v12 = vld [vmem:[#allocation3 + $0x48] sm:$0xff] }
 0x25b   : > { %2329 = vst.msk [vmem:[#allocation3 + $0xe0] sm:$0xff] %vm282_vm1, %v2297_v61  ;;  %v2298_v50 = vadd.f32 %v2266_v30, %v2225_v23  ;;  %7774 = vmatprep.mubr.msk.bf16.mxu1 %vm282_vm1, %v7155_v62  ;;  %2874 = vst.msk [vmem:[#allocation3 + $0x20] sm:$0xff] %vm282_vm1, %v2842_v49  ;;  %v2843_v47 = vadd.f32 %v2811_v13, %v2698_v55  ;;  %v3231_v58 = vld [vmem:[#allocation3 + $0x18] sm:$0xff]  ;;  %v6070_v27 = vrot.slane %v6068_v44, 4  ;;  %v6077_v37 = vrot.slane %v6075_v41, 4  ;;  %v2820_v56 = vld [vmem:[#allocation3 + $0x70] sm:$0xff] }
 0x25c   : > { %2332 = vst.msk [vmem:[#allocation3 + $0xf8] sm:$0xff] %vm282_vm1, %v2300_v32  ;;  %2877 = vst.msk [vmem:[#allocation3 + $0x38] sm:$0xff] %vm282_vm1, %v2845_v39  ;;  %v3229_v6 = vld [vmem:[#allocation3 + $0x8] sm:$0xff]  ;;  %v5931_v29 = vld [vmem:[#allocation2 + $0xb0] sm:$0x1]  ;;  %v6071_v22 = vrot.slane %v5928_v63, 5 }
 0x25d   : > { %2330 = vst.msk [vmem:[#allocation3 + $0xe8] sm:$0xff] %vm282_vm1, %v2298_v50  ;;  %2875 = vst.msk [vmem:[#allocation3 + $0x28] sm:$0xff] %vm282_vm1, %v2843_v47  ;;  %v9233_v53 = vld [vmem:[#allocation2 + $0xb8] sm:$0xf]  ;;  %v9238_v61 = vld [vmem:[#allocation2 + $0xc4] sm:$0xf] }
 0x25e   : > { %v6078_v3 = vrot.slane %v5931_v29, 5  ;;  %v7141_v62 = vrot.slane %v5926_v35, 9  ;;  %v6072_v49 = vsel %vm8403_vm2, %v6070_v27, %v6071_v22  ;;  %v6082_v24 = vrot.slane %v9233_v53, 5  ;;  %v5934_v50 = vld [vmem:[#allocation2 + $0xbc] sm:$0x1] }
 0x25f   : > { %v7590_v48 = vpop.f32.mrb[64].mxu0  ;;  %v7564_v7 = vpop.f32.mrb[40].mxu1  ;;  %v7142_v28 = vrot.slane %v5929_v60, 9  ;;  %v6089_v23 = vrot.slane %v9238_v61, 5  ;;  %v9256_v51 = vld [vmem:[#allocation2 + $0xd0] sm:$0xf] }
 0x260   : > { %v3262_v18 = vadd.f32 %v7590_v48, %v3230_v57  ;;  %v3101_v45 = vpop.f32.mrb[65].mxu0  ;;  %v2848_v54 = vadd.f32 %v7564_v7, %v2816_v33  ;;  %v2711_v59 = vpop.f32.mrb[41].mxu1  ;;  %v6079_v32 = vsel %vm8403_vm2, %v6077_v37, %v6078_v3  ;;  %v6069_v55 = vsel %vm8403_vm2, %v7141_v62, %v6068_v44  ;;  %v2821_v7 = vld [vmem:[#allocation3 + $0x78] sm:$0xff]  ;;  %v5935_v63 = vld [vmem:[#allocation2 + $0xc0] sm:$0xe] }
 0x261   : > { %v3260_v15 = vadd.f32 %v3228_v2, %v3101_v45  ;;  %v7591_v19 = vpop.f32.mrb[66].mxu0  ;;  %v2846_v0 = vadd.f32 %v2814_v21, %v2711_v59  ;;  %v7565_v14 = vpop.f32.mrb[42].mxu1  ;;  %v3234_v5 = vld [vmem:[#allocation3 + $0x30] sm:$0xff]  ;;  %v7158_v16 = vcombine.low %v6069_v55, %v6072_v49  ;;  %v6076_v57 = vsel %vm8403_vm2, %v7142_v28, %v6075_v41  ;;  %v2818_v2 = vld [vmem:[#allocation3 + $0x60] sm:$0xff]  ;;  %v5932_v25 = vld [vmem:[#allocation2 + $0xb4] sm:$0xe] }
 0x262   : > { %3294 = vst.msk [vmem:[#allocation3 + $0x10] sm:$0xff] %vm282_vm1, %v3262_v18  ;;  %v3263_v40 = vadd.f32 %v7591_v19, %v3231_v58  ;;  %v3104_v11 = vpop.f32.mrb[67].mxu0  ;;  %7775 = vmatmul.mubr.msk.bf16.gmra.mrb[144].mxu1 %vm282_vm1, %v7156_v8  ;;  %2880 = vst.msk [vmem:[#allocation3 + $0x50] sm:$0xff] %vm282_vm1, %v2848_v54  ;;  %v2849_v31 = vadd.f32 %v7565_v14, %v2817_v1  ;;  %v2714_v42 = vpop.f32.mrb[43].mxu1  ;;  %v3232_v20 = vld [vmem:[#allocation3 + $0x20] sm:$0xff]  ;;  %v7159_v44 = vcombine.low %v6076_v57, %v6079_v32  ;;  %v2819_v8 = vld [vmem:[#allocation3 + $0x68] sm:$0xff] }
 0x263   : > { %3292 = vst.msk [vmem:[#allocation3] sm:$0xff] %vm282_vm1, %v3260_v15  ;;  %v3261_v4 = vadd.f32 %v3229_v6, %v3104_v11  ;;  %7778 = vmatprep.mubr.msk.bf16.mxu1 %vm282_vm1, %v7157_v9  ;;  %2878 = vst.msk [vmem:[#allocation3 + $0x40] sm:$0xff] %vm282_vm1, %v2846_v0  ;;  %v2847_v43 = vadd.f32 %v2815_v12, %v2714_v42  ;;  %v3235_v39 = vld [vmem:[#allocation3 + $0x38] sm:$0xff]  ;;  %v6084_v33 = vrot.slane %v6082_v24, 4  ;;  %v5937_v18 = vld [vmem:[#allocation2 + $0xc8] sm:$0x1] }
 0x264   : > { %3295 = vst.msk [vmem:[#allocation3 + $0x18] sm:$0xff] %vm282_vm1, %v3263_v40  ;;  %2881 = vst.msk [vmem:[#allocation3 + $0x58] sm:$0xff] %vm282_vm1, %v2849_v31  ;;  %v3233_v36 = vld [vmem:[#allocation3 + $0x28] sm:$0xff]  ;;  %v6091_v54 = vrot.slane %v6089_v23, 4  ;;  %v6085_v35 = vrot.slane %v5934_v50, 5  ;;  %v6096_v15 = vrot.slane %v9256_v51, 5 }
 0x265   : > { %3293 = vst.msk [vmem:[#allocation3 + $0x8] sm:$0xff] %vm282_vm1, %v3261_v4  ;;  %2879 = vst.msk [vmem:[#allocation3 + $0x48] sm:$0xff] %vm282_vm1, %v2847_v43  ;;  %v6092_v19 = vrot.slane %v5937_v18, 5  ;;  %v5938_v9 = vld [vmem:[#allocation2 + $0xcc] sm:$0xe]  ;;  %v7143_v1 = vrot.slane %v5932_v25, 9 }
 0x266   : > { %v5940_v0 = vld [vmem:[#allocation2 + $0xd4] sm:$0x1]  ;;  %v6086_v27 = vsel %vm8403_vm2, %v6084_v33, %v6085_v35  ;;  %v7144_v40 = vrot.slane %v5935_v63, 9  ;;  %v2824_v31 = vld [vmem:[#allocation3 + $0x90] sm:$0xff]  ;;  %v7145_v43 = vrot.slane %v5938_v9, 9  ;;  %v6098_v22 = vrot.slane %v6096_v15, 4 }
 0x267   : > { %v7594_v30 = vpop.f32.mrb[68].mxu0  ;;  %v7568_v13 = vpop.f32.mrb[44].mxu1  ;;  %v6093_v11 = vsel %vm8403_vm2, %v6091_v54, %v6092_v19  ;;  %v6083_v37 = vsel %vm8403_vm2, %v7143_v1, %v6082_v24  ;;  %v6099_v60 = vrot.slane %v5940_v0, 5  ;;  %v2829_v25 = vld [vmem:[#allocation3 + $0xb8] sm:$0xff]  ;;  %v2827_v63 = vld [vmem:[#allocation3 + $0xa8] sm:$0xff] }
 0x268   : > { %v3266_v47 = vadd.f32 %v7594_v30, %v3234_v5  ;;  %v3117_v46 = vpop.f32.mrb[69].mxu0  ;;  %v2852_v26 = vadd.f32 %v7568_v13, %v2820_v56  ;;  %v2727_v34 = vpop.f32.mrb[45].mxu1  ;;  %v7160_v49 = vcombine.low %v6083_v37, %v6086_v27  ;;  %v2822_v30 = vld [vmem:[#allocation3 + $0x80] sm:$0xff]  ;;  %v2825_v56 = vld [vmem:[#allocation3 + $0x98] sm:$0xff]  ;;  %v6097_v57 = vsel %vm8403_vm2, %v7145_v43, %v6096_v15 }
 0x269   : > { %v3264_v38 = vadd.f32 %v3232_v20, %v3117_v46  ;;  %v7595_v48 = vpop.f32.mrb[70].mxu0  ;;  %v2850_v58 = vadd.f32 %v2818_v2, %v2727_v34  ;;  %v7569_v17 = vpop.f32.mrb[46].mxu1  ;;  %v3238_v14 = vld [vmem:[#allocation3 + $0x50] sm:$0xff]  ;;  %v6090_v20 = vsel %vm8403_vm2, %v7144_v40, %v6089_v23  ;;  %v2823_v23 = vld [vmem:[#allocation3 + $0x88] sm:$0xff]  ;;  %v2830_v37 = vld [vmem:[#allocation3 + $0xc0] sm:$0xff] }
 0x26a   : > { %3298 = vst.msk [vmem:[#allocation3 + $0x30] sm:$0xff] %vm282_vm1, %v3266_v47  ;;  %v3267_v52 = vadd.f32 %v7595_v48, %v3235_v39  ;;  %v3120_v45 = vpop.f32.mrb[71].mxu0  ;;  %7779 = vmatmul.mubr.msk.bf16.gmra.mrb[148].mxu1 %vm282_vm1, %v7158_v16  ;;  %2884 = vst.msk [vmem:[#allocation3 + $0x70] sm:$0xff] %vm282_vm1, %v2852_v26  ;;  %v2853_v41 = vadd.f32 %v7569_v17, %v2821_v7  ;;  %v2730_v6 = vpop.f32.mrb[47].mxu1  ;;  %v3236_v29 = vld [vmem:[#allocation3 + $0x40] sm:$0xff]  ;;  %v7161_v55 = vcombine.low %v6090_v20, %v6093_v11 }
 0x26b   : > { %3296 = vst.msk [vmem:[#allocation3 + $0x20] sm:$0xff] %vm282_vm1, %v3264_v38  ;;  %v3265_v59 = vadd.f32 %v3233_v36, %v3120_v45  ;;  %7782 = vmatprep.mubr.msk.bf16.mxu1 %vm282_vm1, %v7159_v44  ;;  %2882 = vst.msk [vmem:[#allocation3 + $0x60] sm:$0xff] %vm282_vm1, %v2850_v58  ;;  %v2851_v21 = vadd.f32 %v2819_v8, %v2730_v6  ;;  %v3239_v12 = vld [vmem:[#allocation3 + $0x58] sm:$0xff]  ;;  %v6100_v26 = vsel %vm8403_vm2, %v6098_v22, %v6099_v60  ;;  %v2828_v58 = vld [vmem:[#allocation3 + $0xb0] sm:$0xff] }
 0x26c   : > { %3299 = vst.msk [vmem:[#allocation3 + $0x38] sm:$0xff] %vm282_vm1, %v3267_v52  ;;  %2885 = vst.msk [vmem:[#allocation3 + $0x78] sm:$0xff] %vm282_vm1, %v2853_v41  ;;  %v3237_v62 = vld [vmem:[#allocation3 + $0x48] sm:$0xff]  ;;  %v7162_v51 = vcombine.low %v6097_v57, %v6100_v26  ;;  %v2826_v52 = vld [vmem:[#allocation3 + $0xa0] sm:$0xff] }
 0x26d   : > { %3297 = vst.msk [vmem:[#allocation3 + $0x28] sm:$0xff] %vm282_vm1, %v3265_v59  ;;  %2883 = vst.msk [vmem:[#allocation3 + $0x68] sm:$0xff] %vm282_vm1, %v2851_v21 }
 0x26f   : > { %v7598_v42 = vpop.f32.mrb[72].mxu0  ;;  %v7572_v4 = vpop.f32.mrb[48].mxu1 }
 0x270   : > { %v3270_v3 = vadd.f32 %v7598_v42, %v3238_v14  ;;  %v3133_v5 = vpop.f32.mrb[73].mxu0  ;;  %v2856_v28 = vadd.f32 %v7572_v4, %v2824_v31  ;;  %v2743_v32 = vpop.f32.mrb[49].mxu1 }
 0x271   : > { %v3268_v53 = vadd.f32 %v3236_v29, %v3133_v5  ;;  %v7599_v39 = vpop.f32.mrb[74].mxu0  ;;  %v2854_v24 = vadd.f32 %v2822_v30, %v2743_v32  ;;  %v7573_v13 = vpop.f32.mrb[50].mxu1  ;;  %v3242_v34 = vld [vmem:[#allocation3 + $0x70] sm:$0xff] }
 0x272   : > { %3302 = vst.msk [vmem:[#allocation3 + $0x50] sm:$0xff] %vm282_vm1, %v3270_v3  ;;  %v3271_v50 = vadd.f32 %v7599_v39, %v3239_v12  ;;  %v3136_v47 = vpop.f32.mrb[75].mxu0  ;;  %7783 = vmatmul.mubr.msk.bf16.gmra.mrb[152].mxu1 %vm282_vm1, %v7160_v49  ;;  %2888 = vst.msk [vmem:[#allocation3 + $0x90] sm:$0xff] %vm282_vm1, %v2856_v28  ;;  %v2857_v61 = vadd.f32 %v7573_v13, %v2825_v56  ;;  %v2746_v46 = vpop.f32.mrb[51].mxu1  ;;  %v3240_v2 = vld [vmem:[#allocation3 + $0x60] sm:$0xff]  ;;  %v2832_v29 = vld [vmem:[#allocation3 + $0xd0] sm:$0xff] }
 0x273   : > { %3300 = vst.msk [vmem:[#allocation3 + $0x40] sm:$0xff] %vm282_vm1, %v3268_v53  ;;  %v3269_v36 = vadd.f32 %v3237_v62, %v3136_v47  ;;  %7786 = vmatprep.mubr.msk.bf16.mxu1 %vm282_vm1, %v7161_v55  ;;  %2886 = vst.msk [vmem:[#allocation3 + $0x80] sm:$0xff] %vm282_vm1, %v2854_v24  ;;  %v2855_v16 = vadd.f32 %v2823_v23, %v2746_v46  ;;  %v3243_v48 = vld [vmem:[#allocation3 + $0x78] sm:$0xff]  ;;  %v2831_v28 = vld [vmem:[#allocation3 + $0xc8] sm:$0xff] }
 0x274   : > { %3303 = vst.msk [vmem:[#allocation3 + $0x58] sm:$0xff] %vm282_vm1, %v3271_v50  ;;  %2889 = vst.msk [vmem:[#allocation3 + $0x98] sm:$0xff] %vm282_vm1, %v2857_v61  ;;  %v3241_v33 = vld [vmem:[#allocation3 + $0x68] sm:$0xff]  ;;  %v2833_v3 = vld [vmem:[#allocation3 + $0xd8] sm:$0xff] }
 0x275   : > { %3301 = vst.msk [vmem:[#allocation3 + $0x48] sm:$0xff] %vm282_vm1, %v3269_v36  ;;  %2887 = vst.msk [vmem:[#allocation3 + $0x88] sm:$0xff] %vm282_vm1, %v2855_v16  ;;  %v2836_v56 = vld [vmem:[#allocation3 + $0xf0] sm:$0xff]  ;;  %v2834_v36 = vld [vmem:[#allocation3 + $0xe0] sm:$0xff] }
 0x277   : > { %v7602_v38 = vpop.f32.mrb[76].mxu0  ;;  %v7576_v44 = vpop.f32.mrb[52].mxu1 }
 0x278   : > { %v3274_v17 = vadd.f32 %v7602_v38, %v3242_v34  ;;  %v3149_v7 = vpop.f32.mrb[77].mxu0  ;;  %v2860_v10 = vadd.f32 %v7576_v44, %v2828_v58  ;;  %v2759_v18 = vpop.f32.mrb[53].mxu1  ;;  %v2835_v58 = vld [vmem:[#allocation3 + $0xe8] sm:$0xff] }
 0x279   : > { %v3272_v45 = vadd.f32 %v3240_v2, %v3149_v7  ;;  %v7603_v41 = vpop.f32.mrb[78].mxu0  ;;  %v2858_v6 = vadd.f32 %v2826_v52, %v2759_v18  ;;  %v7577_v8 = vpop.f32.mrb[54].mxu1  ;;  %v3246_v9 = vld [vmem:[#allocation3 + $0x90] sm:$0xff]  ;;  %v2837_v2 = vld [vmem:[#allocation3 + $0xf8] sm:$0xff] }
 0x27a   : > { %3306 = vst.msk [vmem:[#allocation3 + $0x70] sm:$0xff] %vm282_vm1, %v3274_v17  ;;  %v3275_v54 = vadd.f32 %v7603_v41, %v3243_v48  ;;  %v3152_v59 = vpop.f32.mrb[79].mxu0  ;;  %7787 = vmatmul.mubr.msk.bf16.gmra.mrb[156].mxu1 %vm282_vm1, %v7162_v51  ;;  %2892 = vst.msk [vmem:[#allocation3 + $0xb0] sm:$0xff] %vm282_vm1, %v2860_v10  ;;  %v2861_v21 = vadd.f32 %v7577_v8, %v2829_v25  ;;  %v2762_v35 = vpop.f32.mrb[55].mxu1  ;;  %v3244_v0 = vld [vmem:[#allocation3 + $0x80] sm:$0xff]  ;;  %v4020_v41 = vld [vmem:[#allocation3 + $0x10] sm:$0xff] }
 0x27b   : > { %3304 = vst.msk [vmem:[#allocation3 + $0x60] sm:$0xff] %vm282_vm1, %v3272_v45  ;;  %v3273_v15 = vadd.f32 %v3241_v33, %v3152_v59  ;;  %2890 = vst.msk [vmem:[#allocation3 + $0xa0] sm:$0xff] %vm282_vm1, %v2858_v6  ;;  %v2859_v19 = vadd.f32 %v2827_v63, %v2762_v35  ;;  %v3247_v1 = vld [vmem:[#allocation3 + $0x98] sm:$0xff] }
 0x27c   : > { %3307 = vst.msk [vmem:[#allocation3 + $0x78] sm:$0xff] %vm282_vm1, %v3275_v54  ;;  %2893 = vst.msk [vmem:[#allocation3 + $0xb8] sm:$0xff] %vm282_vm1, %v2861_v21  ;;  %v3245_v31 = vld [vmem:[#allocation3 + $0x88] sm:$0xff]  ;;  %v4018_v21 = vld [vmem:[#allocation3] sm:$0xff] }
 0x27d   : > { %3305 = vst.msk [vmem:[#allocation3 + $0x68] sm:$0xff] %vm282_vm1, %v3273_v15  ;;  %2891 = vst.msk [vmem:[#allocation3 + $0xa8] sm:$0xff] %vm282_vm1, %v2859_v19 }
 0x27f   : > { %v7606_v14 = vpop.f32.mrb[80].mxu0  ;;  %v7580_v27 = vpop.f32.mrb[56].mxu1 }
 0x280   : > { %v3278_v40 = vadd.f32 %v7606_v14, %v3246_v9  ;;  %v3165_v11 = vpop.f32.mrb[81].mxu0  ;;  %v2864_v42 = vadd.f32 %v7580_v27, %v2832_v29  ;;  %v2775_v12 = vpop.f32.mrb[57].mxu1  ;;  %v4021_v9 = vld [vmem:[#allocation3 + $0x18] sm:$0xff]  ;;  %v4019_v29 = vld [vmem:[#allocation3 + $0x8] sm:$0xff] }
 0x281   : > { %v3276_v4 = vadd.f32 %v3244_v0, %v3165_v11  ;;  %v7607_v43 = vpop.f32.mrb[82].mxu0  ;;  %v2862_v22 = vadd.f32 %v2830_v37, %v2775_v12  ;;  %v7581_v60 = vpop.f32.mrb[58].mxu1  ;;  %v3250_v53 = vld [vmem:[#allocation3 + $0xb0] sm:$0xff] }
 0x282   : > { %3310 = vst.msk [vmem:[#allocation3 + $0x90] sm:$0xff] %vm282_vm1, %v3278_v40  ;;  %v3279_v5 = vadd.f32 %v7607_v43, %v3247_v1  ;;  %v3168_v62 = vpop.f32.mrb[83].mxu0  ;;  %2896 = vst.msk [vmem:[#allocation3 + $0xd0] sm:$0xff] %vm282_vm1, %v2864_v42  ;;  %v2865_v49 = vadd.f32 %v7581_v60, %v2833_v3  ;;  %v2778_v20 = vpop.f32.mrb[59].mxu1  ;;  %v3248_v39 = vld [vmem:[#allocation3 + $0xa0] sm:$0xff]  ;;  %v4024_v43 = vld [vmem:[#allocation3 + $0x30] sm:$0xff] }
 0x283   : > { %3308 = vst.msk [vmem:[#allocation3 + $0x80] sm:$0xff] %vm282_vm1, %v3276_v4  ;;  %v3277_v32 = vadd.f32 %v3245_v31, %v3168_v62  ;;  %2894 = vst.msk [vmem:[#allocation3 + $0xc0] sm:$0xff] %vm282_vm1, %v2862_v22  ;;  %v2863_v30 = vadd.f32 %v2831_v28, %v2778_v20  ;;  %v3251_v24 = vld [vmem:[#allocation3 + $0xb8] sm:$0xff] }
 0x284   : > { %3311 = vst.msk [vmem:[#allocation3 + $0x98] sm:$0xff] %vm282_vm1, %v3279_v5  ;;  %2897 = vst.msk [vmem:[#allocation3 + $0xd8] sm:$0xff] %vm282_vm1, %v2865_v49  ;;  %v3249_v61 = vld [vmem:[#allocation3 + $0xa8] sm:$0xff]  ;;  %v4022_v49 = vld [vmem:[#allocation3 + $0x20] sm:$0xff] }
 0x285   : > { %3309 = vst.msk [vmem:[#allocation3 + $0x88] sm:$0xff] %vm282_vm1, %v3277_v32  ;;  %2895 = vst.msk [vmem:[#allocation3 + $0xc8] sm:$0xff] %vm282_vm1, %v2863_v30 }
 0x287   : > { %v7610_v55 = vpop.f32.mrb[84].mxu0  ;;  %v7584_v13 = vpop.f32.mrb[60].mxu1 }
 0x288   : > { %v3282_v50 = vadd.f32 %v7610_v55, %v3250_v53  ;;  %v3181_v47 = vpop.f32.mrb[85].mxu0  ;;  %v2868_v46 = vadd.f32 %v7584_v13, %v2836_v56  ;;  %v2791_v23 = vpop.f32.mrb[61].mxu1  ;;  %v4025_v53 = vld [vmem:[#allocation3 + $0x38] sm:$0xff]  ;;  %v4023_v56 = vld [vmem:[#allocation3 + $0x28] sm:$0xff] }
 0x289   : > { %v3280_v16 = vadd.f32 %v3248_v39, %v3181_v47  ;;  %v7611_v57 = vpop.f32.mrb[86].mxu0  ;;  %v2866_v26 = vadd.f32 %v2834_v36, %v2791_v23  ;;  %v7585_v34 = vpop.f32.mrb[62].mxu1  ;;  %v3254_v33 = vld [vmem:[#allocation3 + $0xd0] sm:$0xff] }
 0x28a   : > { %3314 = vst.msk [vmem:[#allocation3 + $0xb0] sm:$0xff] %vm282_vm1, %v3282_v50  ;;  %v3283_v51 = vadd.f32 %v7611_v57, %v3251_v24  ;;  %v3184_v38 = vpop.f32.mrb[87].mxu0  ;;  %2900 = vst.msk [vmem:[#allocation3 + $0xf0] sm:$0xff] %vm282_vm1, %v2868_v46  ;;  %v2869_v48 = vadd.f32 %v7585_v34, %v2837_v2  ;;  %v2794_v44 = vpop.f32.mrb[63].mxu1  ;;  %v3252_v10 = vld [vmem:[#allocation3 + $0xc0] sm:$0xff]  ;;  %v4028_v57 = vld [vmem:[#allocation3 + $0x50] sm:$0xff] }
 0x28b   : > { %3312 = vst.msk [vmem:[#allocation3 + $0xa0] sm:$0xff] %vm282_vm1, %v3280_v16  ;;  %v3281_v17 = vadd.f32 %v3249_v61, %v3184_v38  ;;  %2898 = vst.msk [vmem:[#allocation3 + $0xe0] sm:$0xff] %vm282_vm1, %v2866_v26  ;;  %v2867_v7 = vadd.f32 %v2835_v58, %v2794_v44  ;;  %v3255_v52 = vld [vmem:[#allocation3 + $0xd8] sm:$0xff] }
 0x28c   : > { %3315 = vst.msk [vmem:[#allocation3 + $0xb8] sm:$0xff] %vm282_vm1, %v3283_v51  ;;  %2901 = vst.msk [vmem:[#allocation3 + $0xf8] sm:$0xff] %vm282_vm1, %v2869_v48  ;;  %v3253_v25 = vld [vmem:[#allocation3 + $0xc8] sm:$0xff]  ;;  %v4026_v48 = vld [vmem:[#allocation3 + $0x40] sm:$0xff] }
 0x28d   : > { %3313 = vst.msk [vmem:[#allocation3 + $0xa8] sm:$0xff] %vm282_vm1, %v3281_v17  ;;  %2899 = vst.msk [vmem:[#allocation3 + $0xe8] sm:$0xff] %vm282_vm1, %v2867_v7 }
 0x28f   : > { %v7614_v18 = vpop.f32.mrb[88].mxu0  ;;  %v7624_v45 = vpop.f32.mrb[64].mxu1 }
 0x290   : > { %v3286_v6 = vadd.f32 %v7614_v18, %v3254_v33  ;;  %v3197_v8 = vpop.f32.mrb[89].mxu0  ;;  %v4052_v54 = vadd.f32 %v7624_v45, %v4020_v41  ;;  %v3891_v59 = vpop.f32.mrb[65].mxu1  ;;  %v4029_v33 = vld [vmem:[#allocation3 + $0x58] sm:$0xff]  ;;  %v4027_v41 = vld [vmem:[#allocation3 + $0x48] sm:$0xff] }
 0x291   : > { %v3284_v35 = vadd.f32 %v3252_v10, %v3197_v8  ;;  %v7615_v63 = vpop.f32.mrb[90].mxu0  ;;  %v4050_v15 = vadd.f32 %v4018_v21, %v3891_v59  ;;  %v7625_v19 = vpop.f32.mrb[66].mxu1  ;;  %v3258_v31 = vld [vmem:[#allocation3 + $0xf0] sm:$0xff] }
 0x292   : > { %3318 = vst.msk [vmem:[#allocation3 + $0xd0] sm:$0xff] %vm282_vm1, %v3286_v6  ;;  %v3287_v0 = vadd.f32 %v7615_v63, %v3255_v52  ;;  %v3200_v14 = vpop.f32.mrb[91].mxu0  ;;  %4084 = vst.msk [vmem:[#allocation3 + $0x10] sm:$0xff] %vm282_vm1, %v4052_v54  ;;  %v4053_v1 = vadd.f32 %v7625_v19, %v4021_v9  ;;  %v3894_v27 = vpop.f32.mrb[67].mxu1  ;;  %v3256_v42 = vld [vmem:[#allocation3 + $0xe0] sm:$0xff]  ;;  %v4032_v63 = vld [vmem:[#allocation3 + $0x70] sm:$0xff] }
 0x293   : > { %3316 = vst.msk [vmem:[#allocation3 + $0xc0] sm:$0xff] %vm282_vm1, %v3284_v35  ;;  %v3285_v40 = vadd.f32 %v3253_v25, %v3200_v14  ;;  %4082 = vst.msk [vmem:[#allocation3] sm:$0xff] %vm282_vm1, %v4050_v15  ;;  %v4051_v11 = vadd.f32 %v4019_v29, %v3894_v27  ;;  %v3259_v37 = vld [vmem:[#allocation3 + $0xf8] sm:$0xff] }
 0x294   : > { %3319 = vst.msk [vmem:[#allocation3 + $0xd8] sm:$0xff] %vm282_vm1, %v3287_v0  ;;  %4085 = vst.msk [vmem:[#allocation3 + $0x18] sm:$0xff] %vm282_vm1, %v4053_v1  ;;  %v3257_v3 = vld [vmem:[#allocation3 + $0xe8] sm:$0xff]  ;;  %v4030_v1 = vld [vmem:[#allocation3 + $0x60] sm:$0xff] }
 0x295   : > { %3317 = vst.msk [vmem:[#allocation3 + $0xc8] sm:$0xff] %vm282_vm1, %v3285_v40  ;;  %4083 = vst.msk [vmem:[#allocation3 + $0x8] sm:$0xff] %vm282_vm1, %v4051_v11 }
 0x297   : > { %v7618_v12 = vpop.f32.mrb[92].mxu0  ;;  %v7628_v4 = vpop.f32.mrb[68].mxu1 }
 0x298   : > { %v3290_v22 = vadd.f32 %v7618_v12, %v3258_v31  ;;  %v3213_v60 = vpop.f32.mrb[93].mxu0  ;;  %v4056_v5 = vadd.f32 %v7628_v4, %v4024_v43  ;;  %v3907_v62 = vpop.f32.mrb[69].mxu1  ;;  %v4033_v31 = vld [vmem:[#allocation3 + $0x78] sm:$0xff]  ;;  %v4031_v43 = vld [vmem:[#allocation3 + $0x68] sm:$0xff] }
 0x299   : > { %v3288_v20 = vadd.f32 %v3256_v42, %v3213_v60  ;;  %v7619_v28 = vpop.f32.mrb[94].mxu0  ;;  %v4054_v32 = vadd.f32 %v4022_v49, %v3907_v62  ;;  %v7629_v30 = vpop.f32.mrb[70].mxu1  ;;  %v4586_v61 = vld [vmem:[#allocation3 + $0x10] sm:$0xff] }
 0x29a   : > { %3322 = vst.msk [vmem:[#allocation3 + $0xf0] sm:$0xff] %vm282_vm1, %v3290_v22  ;;  %v3291_v39 = vadd.f32 %v7619_v28, %v3259_v37  ;;  %v3216_v55 = vpop.f32.mrb[95].mxu0  ;;  %4088 = vst.msk [vmem:[#allocation3 + $0x30] sm:$0xff] %vm282_vm1, %v4056_v5  ;;  %v4057_v24 = vadd.f32 %v7629_v30, %v4025_v53  ;;  %v3910_v13 = vpop.f32.mrb[71].mxu1  ;;  %v4584_v46 = vld [vmem:[#allocation3] sm:$0xff]  ;;  %v4036_v28 = vld [vmem:[#allocation3 + $0x90] sm:$0xff] }
 0x29b   : > { %3320 = vst.msk [vmem:[#allocation3 + $0xe0] sm:$0xff] %vm282_vm1, %v3288_v20  ;;  %v3289_v50 = vadd.f32 %v3257_v3, %v3216_v55  ;;  %4086 = vst.msk [vmem:[#allocation3 + $0x20] sm:$0xff] %vm282_vm1, %v4054_v32  ;;  %v4055_v47 = vadd.f32 %v4023_v56, %v3910_v13  ;;  %v4587_v36 = vld [vmem:[#allocation3 + $0x18] sm:$0xff] }
 0x29c   : > { %3323 = vst.msk [vmem:[#allocation3 + $0xf8] sm:$0xff] %vm282_vm1, %v3291_v39  ;;  %4089 = vst.msk [vmem:[#allocation3 + $0x38] sm:$0xff] %vm282_vm1, %v4057_v24  ;;  %v4585_v2 = vld [vmem:[#allocation3 + $0x8] sm:$0xff]  ;;  %v4034_v24 = vld [vmem:[#allocation3 + $0x80] sm:$0xff] }
 0x29d   : > { %3321 = vst.msk [vmem:[#allocation3 + $0xe8] sm:$0xff] %vm282_vm1, %v3289_v50  ;;  %4087 = vst.msk [vmem:[#allocation3 + $0x28] sm:$0xff] %vm282_vm1, %v4055_v47 }
 0x29f   : > { %v7658_v23 = vpop.f32.mrb[96].mxu0  ;;  %v7632_v16 = vpop.f32.mrb[72].mxu1 }
 0x2a0   : > { %v4618_v26 = vadd.f32 %v7658_v23, %v4586_v61  ;;  %v4457_v34 = vpop.f32.mrb[97].mxu0  ;;  %v4060_v51 = vadd.f32 %v7632_v16, %v4028_v57  ;;  %v3923_v38 = vpop.f32.mrb[73].mxu1  ;;  %v4037_v61 = vld [vmem:[#allocation3 + $0x98] sm:$0xff]  ;;  %v4035_v57 = vld [vmem:[#allocation3 + $0x88] sm:$0xff] }
 0x2a1   : > { %v4616_v44 = vadd.f32 %v4584_v46, %v4457_v34  ;;  %v7659_v58 = vpop.f32.mrb[98].mxu0  ;;  %v4058_v17 = vadd.f32 %v4026_v48, %v3923_v38  ;;  %v7633_v7 = vpop.f32.mrb[74].mxu1  ;;  %v4590_v25 = vld [vmem:[#allocation3 + $0x30] sm:$0xff] }
 0x2a2   : > { %4650 = vst.msk [vmem:[#allocation3 + $0x10] sm:$0xff] %vm282_vm1, %v4618_v26  ;;  %v4619_v10 = vadd.f32 %v7659_v58, %v4587_v36  ;;  %v4460_v18 = vpop.f32.mrb[99].mxu0  ;;  %4092 = vst.msk [vmem:[#allocation3 + $0x50] sm:$0xff] %vm282_vm1, %v4060_v51  ;;  %v4061_v52 = vadd.f32 %v7633_v7, %v4029_v33  ;;  %v3926_v45 = vpop.f32.mrb[75].mxu1  ;;  %v4588_v54 = vld [vmem:[#allocation3 + $0x20] sm:$0xff]  ;;  %v4040_v58 = vld [vmem:[#allocation3 + $0xb0] sm:$0xff] }
 0x2a3   : > { %4648 = vst.msk [vmem:[#allocation3] sm:$0xff] %vm282_vm1, %v4616_v44  ;;  %v4617_v6 = vadd.f32 %v4585_v2, %v4460_v18  ;;  %4090 = vst.msk [vmem:[#allocation3 + $0x40] sm:$0xff] %vm282_vm1, %v4058_v17  ;;  %v4059_v8 = vadd.f32 %v4027_v41, %v3926_v45  ;;  %v4591_v21 = vld [vmem:[#allocation3 + $0x38] sm:$0xff] }
 0x2a4   : > { %4651 = vst.msk [vmem:[#allocation3 + $0x18] sm:$0xff] %vm282_vm1, %v4619_v10  ;;  %4093 = vst.msk [vmem:[#allocation3 + $0x58] sm:$0xff] %vm282_vm1, %v4061_v52  ;;  %v4589_v9 = vld [vmem:[#allocation3 + $0x28] sm:$0xff]  ;;  %v4038_v52 = vld [vmem:[#allocation3 + $0xa0] sm:$0xff] }
 0x2a5   : > { %4649 = vst.msk [vmem:[#allocation3 + $0x8] sm:$0xff] %vm282_vm1, %v4617_v6  ;;  %4091 = vst.msk [vmem:[#allocation3 + $0x48] sm:$0xff] %vm282_vm1, %v4059_v8 }
 0x2a7   : > { %v7662_v59 = vpop.f32.mrb[100].mxu0  ;;  %v7636_v35 = vpop.f32.mrb[76].mxu1 }
 0x2a8   : > { %v4622_v15 = vadd.f32 %v7662_v59, %v4590_v25  ;;  %v4473_v19 = vpop.f32.mrb[101].mxu0  ;;  %v4064_v0 = vadd.f32 %v7636_v35, %v4032_v63  ;;  %v3939_v14 = vpop.f32.mrb[77].mxu1  ;;  %v4041_v25 = vld [vmem:[#allocation3 + $0xb8] sm:$0xff]  ;;  %v4039_v63 = vld [vmem:[#allocation3 + $0xa8] sm:$0xff] }
 0x2a9   : > { %v4620_v27 = vadd.f32 %v4588_v54, %v4473_v19  ;;  %v7663_v29 = vpop.f32.mrb[102].mxu0  ;;  %v4062_v40 = vadd.f32 %v4030_v1, %v3939_v14  ;;  %v7637_v11 = vpop.f32.mrb[78].mxu1  ;;  %v4594_v3 = vld [vmem:[#allocation3 + $0x50] sm:$0xff] }
 0x2aa   : > { %4654 = vst.msk [vmem:[#allocation3 + $0x30] sm:$0xff] %vm282_vm1, %v4622_v15  ;;  %v4623_v42 = vadd.f32 %v7663_v29, %v4591_v21  ;;  %v4476_v12 = vpop.f32.mrb[103].mxu0  ;;  %4096 = vst.msk [vmem:[#allocation3 + $0x70] sm:$0xff] %vm282_vm1, %v4064_v0  ;;  %v4065_v37 = vadd.f32 %v7637_v11, %v4033_v31  ;;  %v3942_v4 = vpop.f32.mrb[79].mxu1  ;;  %v4592_v5 = vld [vmem:[#allocation3 + $0x40] sm:$0xff]  ;;  %v4044_v29 = vld [vmem:[#allocation3 + $0xd0] sm:$0xff] }
 0x2ab   : > { %4652 = vst.msk [vmem:[#allocation3 + $0x20] sm:$0xff] %vm282_vm1, %v4620_v27  ;;  %v4621_v22 = vadd.f32 %v4589_v9, %v4476_v12  ;;  %4094 = vst.msk [vmem:[#allocation3 + $0x60] sm:$0xff] %vm282_vm1, %v4062_v40  ;;  %v4063_v60 = vadd.f32 %v4031_v43, %v3942_v4  ;;  %v4595_v49 = vld [vmem:[#allocation3 + $0x58] sm:$0xff] }
 0x2ac   : > { %4655 = vst.msk [vmem:[#allocation3 + $0x38] sm:$0xff] %vm282_vm1, %v4623_v42  ;;  %4097 = vst.msk [vmem:[#allocation3 + $0x78] sm:$0xff] %vm282_vm1, %v4065_v37  ;;  %v4593_v53 = vld [vmem:[#allocation3 + $0x48] sm:$0xff]  ;;  %v4042_v37 = vld [vmem:[#allocation3 + $0xc0] sm:$0xff] }
 0x2ad   : > { %4653 = vst.msk [vmem:[#allocation3 + $0x28] sm:$0xff] %vm282_vm1, %v4621_v22  ;;  %4095 = vst.msk [vmem:[#allocation3 + $0x68] sm:$0xff] %vm282_vm1, %v4063_v60 }
 0x2af   : > { %v7666_v62 = vpop.f32.mrb[104].mxu0  ;;  %v7640_v20 = vpop.f32.mrb[80].mxu1 }
 0x2b0   : > { %v4626_v32 = vadd.f32 %v7666_v62, %v4594_v3  ;;  %v4489_v30 = vpop.f32.mrb[105].mxu0  ;;  %v4068_v39 = vadd.f32 %v7640_v20, %v4036_v28  ;;  %v3955_v55 = vpop.f32.mrb[81].mxu1  ;;  %v4045_v3 = vld [vmem:[#allocation3 + $0xd8] sm:$0xff]  ;;  %v4043_v28 = vld [vmem:[#allocation3 + $0xc8] sm:$0xff] }
 0x2b1   : > { %v4624_v13 = vadd.f32 %v4592_v5, %v4489_v30  ;;  %v7667_v56 = vpop.f32.mrb[106].mxu0  ;;  %v4066_v50 = vadd.f32 %v4034_v24, %v3955_v55  ;;  %v7641_v47 = vpop.f32.mrb[82].mxu1  ;;  %v4598_v2 = vld [vmem:[#allocation3 + $0x70] sm:$0xff] }
 0x2b2   : > { %4658 = vst.msk [vmem:[#allocation3 + $0x50] sm:$0xff] %vm282_vm1, %v4626_v32  ;;  %v4627_v46 = vadd.f32 %v7667_v56, %v4595_v49  ;;  %v4492_v23 = vpop.f32.mrb[107].mxu0  ;;  %4100 = vst.msk [vmem:[#allocation3 + $0x90] sm:$0xff] %vm282_vm1, %v4068_v39  ;;  %v4069_v36 = vadd.f32 %v7641_v47, %v4037_v61  ;;  %v3958_v16 = vpop.f32.mrb[83].mxu1  ;;  %v4596_v51 = vld [vmem:[#allocation3 + $0x60] sm:$0xff] }
 0x2b3   : > { %4656 = vst.msk [vmem:[#allocation3 + $0x40] sm:$0xff] %vm282_vm1, %v4624_v13  ;;  %v4625_v26 = vadd.f32 %v4593_v53, %v4492_v23  ;;  %4098 = vst.msk [vmem:[#allocation3 + $0x80] sm:$0xff] %vm282_vm1, %v4066_v50  ;;  %v4067_v34 = vadd.f32 %v4035_v57, %v3958_v16  ;;  %v4599_v48 = vld [vmem:[#allocation3 + $0x78] sm:$0xff]  ;;  %v4048_v16 = vld [vmem:[#allocation3 + $0xf0] sm:$0xff] }
 0x2b4   : > { %4659 = vst.msk [vmem:[#allocation3 + $0x58] sm:$0xff] %vm282_vm1, %v4627_v46  ;;  %4101 = vst.msk [vmem:[#allocation3 + $0x98] sm:$0xff] %vm282_vm1, %v4069_v36  ;;  %v4597_v33 = vld [vmem:[#allocation3 + $0x68] sm:$0xff] }
 0x2b5   : > { %4657 = vst.msk [vmem:[#allocation3 + $0x48] sm:$0xff] %vm282_vm1, %v4625_v26  ;;  %4099 = vst.msk [vmem:[#allocation3 + $0x88] sm:$0xff] %vm282_vm1, %v4067_v34 }
 0x2b7   : > { %v7670_v38 = vpop.f32.mrb[108].mxu0  ;;  %v7644_v44 = vpop.f32.mrb[84].mxu1 }
 0x2b8   : > { %v4630_v17 = vadd.f32 %v7670_v38, %v4598_v2  ;;  %v4505_v7 = vpop.f32.mrb[109].mxu0  ;;  %v4072_v10 = vadd.f32 %v7644_v44, %v4040_v58  ;;  %v3971_v18 = vpop.f32.mrb[85].mxu1  ;;  %v4046_v2 = vld [vmem:[#allocation3 + $0xe0] sm:$0xff] }
 0x2b9   : > { %v4628_v45 = vadd.f32 %v4596_v51, %v4505_v7  ;;  %v7671_v41 = vpop.f32.mrb[110].mxu0  ;;  %v4070_v6 = vadd.f32 %v4038_v52, %v3971_v18  ;;  %v7645_v8 = vpop.f32.mrb[86].mxu1  ;;  %v4602_v9 = vld [vmem:[#allocation3 + $0x90] sm:$0xff]  ;;  %v4047_v7 = vld [vmem:[#allocation3 + $0xe8] sm:$0xff] }
 0x2ba   : > { %4662 = vst.msk [vmem:[#allocation3 + $0x70] sm:$0xff] %vm282_vm1, %v4630_v17  ;;  %v4631_v54 = vadd.f32 %v7671_v41, %v4599_v48  ;;  %v4508_v59 = vpop.f32.mrb[111].mxu0  ;;  %4104 = vst.msk [vmem:[#allocation3 + $0xb0] sm:$0xff] %vm282_vm1, %v4072_v10  ;;  %v4073_v21 = vadd.f32 %v7645_v8, %v4041_v25  ;;  %v3974_v35 = vpop.f32.mrb[87].mxu1  ;;  %v4600_v0 = vld [vmem:[#allocation3 + $0x80] sm:$0xff]  ;;  %v4049_v48 = vld [vmem:[#allocation3 + $0xf8] sm:$0xff] }
 0x2bb   : > { %4660 = vst.msk [vmem:[#allocation3 + $0x60] sm:$0xff] %vm282_vm1, %v4628_v45  ;;  %v4629_v15 = vadd.f32 %v4597_v33, %v4508_v59  ;;  %4102 = vst.msk [vmem:[#allocation3 + $0xa0] sm:$0xff] %vm282_vm1, %v4070_v6  ;;  %v4071_v19 = vadd.f32 %v4039_v63, %v3974_v35  ;;  %v4603_v1 = vld [vmem:[#allocation3 + $0x98] sm:$0xff]  ;;  %v5009_v35 = vld [vmem:[#allocation3 + $0x10] sm:$0xff] }
 0x2bc   : > { %4663 = vst.msk [vmem:[#allocation3 + $0x78] sm:$0xff] %vm282_vm1, %v4631_v54  ;;  %4105 = vst.msk [vmem:[#allocation3 + $0xb8] sm:$0xff] %vm282_vm1, %v4073_v21  ;;  %v4601_v31 = vld [vmem:[#allocation3 + $0x88] sm:$0xff] }
 0x2bd   : > { %4661 = vst.msk [vmem:[#allocation3 + $0x68] sm:$0xff] %vm282_vm1, %v4629_v15  ;;  %4103 = vst.msk [vmem:[#allocation3 + $0xa8] sm:$0xff] %vm282_vm1, %v4071_v19 }
 0x2bf   : > { %v7648_v27 = vpop.f32.mrb[88].mxu1 }
 0x2c0   : > { %v7674_v14 = vpop.f32.mrb[112].mxu0  ;;  %v4076_v42 = vadd.f32 %v7648_v27, %v4044_v29  ;;  %v3987_v12 = vpop.f32.mrb[89].mxu1 }
 0x2c1   : > { %v4634_v40 = vadd.f32 %v7674_v14, %v4602_v9  ;;  %v4521_v11 = vpop.f32.mrb[113].mxu0  ;;  %v4074_v22 = vadd.f32 %v4042_v37, %v3987_v12  ;;  %v7649_v60 = vpop.f32.mrb[90].mxu1  ;;  %v4606_v53 = vld [vmem:[#allocation3 + $0xb0] sm:$0xff]  ;;  %v5007_v9 = vld [vmem:[#allocation3] sm:$0xff] }
 0x2c2   : > { %v4632_v4 = vadd.f32 %v4600_v0, %v4521_v11  ;;  %v7675_v43 = vpop.f32.mrb[114].mxu0  ;;  %4108 = vst.msk [vmem:[#allocation3 + $0xd0] sm:$0xff] %vm282_vm1, %v4076_v42  ;;  %v4077_v49 = vadd.f32 %v7649_v60, %v4045_v3  ;;  %v3990_v20 = vpop.f32.mrb[91].mxu1  ;;  %v4604_v39 = vld [vmem:[#allocation3 + $0xa0] sm:$0xff]  ;;  %v5008_v11 = vld [vmem:[#allocation3 + $0x8] sm:$0xff] }
 0x2c3   : > { %4666 = vst.msk [vmem:[#allocation3 + $0x90] sm:$0xff] %vm282_vm1, %v4634_v40  ;;  %v4635_v5 = vadd.f32 %v7675_v43, %v4603_v1  ;;  %v4524_v62 = vpop.f32.mrb[115].mxu0  ;;  %4106 = vst.msk [vmem:[#allocation3 + $0xc0] sm:$0xff] %vm282_vm1, %v4074_v22  ;;  %v4075_v30 = vadd.f32 %v4043_v28, %v3990_v20  ;;  %v4607_v24 = vld [vmem:[#allocation3 + $0xb8] sm:$0xff]  ;;  %v5013_v20 = vld [vmem:[#allocation3 + $0x30] sm:$0xff] }
 0x2c4   : > { %4664 = vst.msk [vmem:[#allocation3 + $0x80] sm:$0xff] %vm282_vm1, %v4632_v4  ;;  %v4633_v32 = vadd.f32 %v4601_v31, %v4524_v62  ;;  %4109 = vst.msk [vmem:[#allocation3 + $0xd8] sm:$0xff] %vm282_vm1, %v4077_v49  ;;  %v4605_v50 = vld [vmem:[#allocation3 + $0xa8] sm:$0xff]  ;;  %v5010_v1 = vld [vmem:[#allocation3 + $0x18] sm:$0xff] }
 0x2c5   : > { %4667 = vst.msk [vmem:[#allocation3 + $0x98] sm:$0xff] %vm282_vm1, %v4635_v5  ;;  %4107 = vst.msk [vmem:[#allocation3 + $0xc8] sm:$0xff] %vm282_vm1, %v4075_v30 }
 0x2c6   : > { %4665 = vst.msk [vmem:[#allocation3 + $0x88] sm:$0xff] %vm282_vm1, %v4633_v32 }
 0x2c8   : > { %v7678_v55 = vpop.f32.mrb[116].mxu0 }
 0x2c9   : > { %v4638_v13 = vadd.f32 %v7678_v55, %v4606_v53  ;;  %v4537_v56 = vpop.f32.mrb[117].mxu0  ;;  %v4610_v44 = vld [vmem:[#allocation3 + $0xd0] sm:$0xff]  ;;  %v5011_v53 = vld [vmem:[#allocation3 + $0x20] sm:$0xff] }
 0x2ca   : > { %v4636_v47 = vadd.f32 %v4604_v39, %v4537_v56  ;;  %v7679_v61 = vpop.f32.mrb[118].mxu0  ;;  %v4608_v33 = vld [vmem:[#allocation3 + $0xc0] sm:$0xff] }
 0x2cb   : > { %4670 = vst.msk [vmem:[#allocation3 + $0xb0] sm:$0xff] %vm282_vm1, %v4638_v13  ;;  %v4639_v46 = vadd.f32 %v7679_v61, %v4607_v24  ;;  %v4540_v23 = vpop.f32.mrb[119].mxu0  ;;  %v7652_v36 = vpop.f32.mrb[92].mxu1  ;;  %v4611_v52 = vld [vmem:[#allocation3 + $0xd8] sm:$0xff] }
 0x2cc   : > { %4668 = vst.msk [vmem:[#allocation3 + $0xa0] sm:$0xff] %vm282_vm1, %v4636_v47  ;;  %v4637_v57 = vadd.f32 %v4605_v50, %v4540_v23  ;;  %v4080_v26 = vadd.f32 %v7652_v36, %v4048_v16  ;;  %v4003_v34 = vpop.f32.mrb[93].mxu1  ;;  %v4609_v6 = vld [vmem:[#allocation3 + $0xc8] sm:$0xff]  ;;  %v5014_v24 = vld [vmem:[#allocation3 + $0x38] sm:$0xff] }
 0x2cd   : > { %4671 = vst.msk [vmem:[#allocation3 + $0xb8] sm:$0xff] %vm282_vm1, %v4639_v46  ;;  %v4078_v51 = vadd.f32 %v4046_v2, %v4003_v34  ;;  %v7653_v38 = vpop.f32.mrb[94].mxu1  ;;  %v5012_v47 = vld [vmem:[#allocation3 + $0x28] sm:$0xff] }
 0x2ce   : > { %4669 = vst.msk [vmem:[#allocation3 + $0xa8] sm:$0xff] %vm282_vm1, %v4637_v57  ;;  %4112 = vst.msk [vmem:[#allocation3 + $0xf0] sm:$0xff] %vm282_vm1, %v4080_v26  ;;  %v4081_v58 = vadd.f32 %v7653_v38, %v4049_v48  ;;  %v4006_v17 = vpop.f32.mrb[95].mxu1 }
 0x2cf   : > { %4110 = vst.msk [vmem:[#allocation3 + $0xe0] sm:$0xff] %vm282_vm1, %v4078_v51  ;;  %v4079_v10 = vadd.f32 %v4047_v7, %v4006_v17 }
 0x2d0   : > { %v7682_v18 = vpop.f32.mrb[120].mxu0  ;;  %4113 = vst.msk [vmem:[#allocation3 + $0xf8] sm:$0xff] %vm282_vm1, %v4081_v58 }
 0x2d1   : > { %v4642_v45 = vadd.f32 %v7682_v18, %v4610_v44  ;;  %v4553_v41 = vpop.f32.mrb[121].mxu0  ;;  %4111 = vst.msk [vmem:[#allocation3 + $0xe8] sm:$0xff] %vm282_vm1, %v4079_v10  ;;  %v5017_v44 = vld [vmem:[#allocation3 + $0x50] sm:$0xff] }
 0x2d2   : > { %v4640_v8 = vadd.f32 %v4608_v33, %v4553_v41  ;;  %v7683_v25 = vpop.f32.mrb[122].mxu0  ;;  %v5015_v33 = vld [vmem:[#allocation3 + $0x40] sm:$0xff] }
 0x2d3   : > { %4674 = vst.msk [vmem:[#allocation3 + $0xd0] sm:$0xff] %vm282_vm1, %v4642_v45  ;;  %v4643_v54 = vadd.f32 %v7683_v25, %v4611_v52  ;;  %v4556_v59 = vpop.f32.mrb[123].mxu0  ;;  %v7692_v21 = vpop.f32.mrb[96].mxu1  ;;  %v5018_v52 = vld [vmem:[#allocation3 + $0x58] sm:$0xff] }
 0x2d4   : > { %4672 = vst.msk [vmem:[#allocation3 + $0xc0] sm:$0xff] %vm282_vm1, %v4640_v8  ;;  %v4641_v63 = vadd.f32 %v4609_v6, %v4556_v59  ;;  %v5041_v15 = vadd.f32 %v7692_v21, %v5009_v35  ;;  %v4880_v19 = vpop.f32.mrb[97].mxu1  ;;  %v5016_v8 = vld [vmem:[#allocation3 + $0x48] sm:$0xff] }
 0x2d5   : > { %4675 = vst.msk [vmem:[#allocation3 + $0xd8] sm:$0xff] %vm282_vm1, %v4643_v54  ;;  %v5039_v0 = vadd.f32 %v5007_v9, %v4880_v19  ;;  %v7693_v14 = vpop.f32.mrb[98].mxu1  ;;  %v4614_v27 = vld [vmem:[#allocation3 + $0xf0] sm:$0xff] }
 0x2d6   : > { %4673 = vst.msk [vmem:[#allocation3 + $0xc8] sm:$0xff] %vm282_vm1, %v4641_v63  ;;  %5073 = vst.msk [vmem:[#allocation3 + $0x10] sm:$0xff] %vm282_vm1, %v5041_v15  ;;  %v5042_v29 = vadd.f32 %v7693_v14, %v5010_v1  ;;  %v4883_v40 = vpop.f32.mrb[99].mxu1  ;;  %v4612_v31 = vld [vmem:[#allocation3 + $0xe0] sm:$0xff] }
 0x2d7   : > { %5071 = vst.msk [vmem:[#allocation3] sm:$0xff] %vm282_vm1, %v5039_v0  ;;  %v5040_v42 = vadd.f32 %v5008_v11, %v4883_v40  ;;  %v4615_v37 = vld [vmem:[#allocation3 + $0xf8] sm:$0xff] }
 0x2d8   : > { %v7686_v12 = vpop.f32.mrb[124].mxu0  ;;  %5074 = vst.msk [vmem:[#allocation3 + $0x18] sm:$0xff] %vm282_vm1, %v5042_v29  ;;  %v4613_v22 = vld [vmem:[#allocation3 + $0xe8] sm:$0xff] }
 0x2d9   : > { %v4646_v4 = vadd.f32 %v7686_v12, %v4614_v27  ;;  %v4569_v43 = vpop.f32.mrb[125].mxu0  ;;  %5072 = vst.msk [vmem:[#allocation3 + $0x8] sm:$0xff] %vm282_vm1, %v5040_v42  ;;  %v5021_v27 = vld [vmem:[#allocation3 + $0x70] sm:$0xff] }
 0x2da   : > { %v4644_v60 = vadd.f32 %v4612_v31, %v4569_v43  ;;  %v7687_v3 = vpop.f32.mrb[126].mxu0  ;;  %v5019_v31 = vld [vmem:[#allocation3 + $0x60] sm:$0xff] }
 0x2db   : > { %4678 = vst.msk [vmem:[#allocation3 + $0xf0] sm:$0xff] %vm282_vm1, %v4646_v4  ;;  %v4647_v5 = vadd.f32 %v7687_v3, %v4615_v37  ;;  %v4572_v62 = vpop.f32.mrb[127].mxu0  ;;  %v7696_v49 = vpop.f32.mrb[100].mxu1  ;;  %v5022_v37 = vld [vmem:[#allocation3 + $0x78] sm:$0xff] }
 0x2dc   : > { %4676 = vst.msk [vmem:[#allocation3 + $0xe0] sm:$0xff] %vm282_vm1, %v4644_v60  ;;  %v4645_v28 = vadd.f32 %v4613_v22, %v4572_v62  ;;  %v5045_v32 = vadd.f32 %v7696_v49, %v5013_v20  ;;  %v4896_v30 = vpop.f32.mrb[101].mxu1  ;;  %v5020_v60 = vld [vmem:[#allocation3 + $0x68] sm:$0xff] }
 0x2dd   : > { %4679 = vst.msk [vmem:[#allocation3 + $0xf8] sm:$0xff] %vm282_vm1, %v4647_v5  ;;  %v5043_v39 = vadd.f32 %v5011_v53, %v4896_v30  ;;  %v7697_v55 = vpop.f32.mrb[102].mxu1  ;;  %v5799_v13 = vld [vmem:[#allocation3 + $0x10] sm:$0xff] }
 0x2de   : > { %4677 = vst.msk [vmem:[#allocation3 + $0xe8] sm:$0xff] %vm282_vm1, %v4645_v28  ;;  %5077 = vst.msk [vmem:[#allocation3 + $0x30] sm:$0xff] %vm282_vm1, %v5045_v32  ;;  %v5046_v56 = vadd.f32 %v7697_v55, %v5014_v24  ;;  %v4899_v50 = vpop.f32.mrb[103].mxu1  ;;  %v5797_v61 = vld [vmem:[#allocation3] sm:$0xff] }
 0x2df   : > { %5075 = vst.msk [vmem:[#allocation3 + $0x20] sm:$0xff] %vm282_vm1, %v5043_v39  ;;  %v5044_v46 = vadd.f32 %v5012_v47, %v4899_v50  ;;  %v5800_v36 = vld [vmem:[#allocation3 + $0x18] sm:$0xff] }
 0x2e0   : > { %v7726_v23 = vpop.f32.mrb[128].mxu0  ;;  %5078 = vst.msk [vmem:[#allocation3 + $0x38] sm:$0xff] %vm282_vm1, %v5046_v56  ;;  %v5798_v26 = vld [vmem:[#allocation3 + $0x8] sm:$0xff] }
 0x2e1   : > { %v5831_v16 = vadd.f32 %v7726_v23, %v5799_v13  ;;  %v5670_v57 = vpop.f32.mrb[129].mxu0  ;;  %5076 = vst.msk [vmem:[#allocation3 + $0x28] sm:$0xff] %vm282_vm1, %v5044_v46  ;;  %v5025_v13 = vld [vmem:[#allocation3 + $0x90] sm:$0xff] }
 0x2e2   : > { %v5829_v34 = vadd.f32 %v5797_v61, %v5670_v57  ;;  %v7727_v2 = vpop.f32.mrb[130].mxu0  ;;  %v5023_v61 = vld [vmem:[#allocation3 + $0x80] sm:$0xff] }
 0x2e3   : > { %5863 = vst.msk [vmem:[#allocation3 + $0x10] sm:$0xff] %vm282_vm1, %v5831_v16  ;;  %v5832_v51 = vadd.f32 %v7727_v2, %v5800_v36  ;;  %v5673_v38 = vpop.f32.mrb[131].mxu0  ;;  %v7700_v48 = vpop.f32.mrb[104].mxu1  ;;  %v5026_v36 = vld [vmem:[#allocation3 + $0x98] sm:$0xff] }
 0x2e4   : > { %5861 = vst.msk [vmem:[#allocation3] sm:$0xff] %vm282_vm1, %v5829_v34  ;;  %v5830_v58 = vadd.f32 %v5798_v26, %v5673_v38  ;;  %v5049_v17 = vadd.f32 %v7700_v48, %v5017_v44  ;;  %v4912_v7 = vpop.f32.mrb[105].mxu1  ;;  %v5024_v34 = vld [vmem:[#allocation3 + $0x88] sm:$0xff] }
 0x2e5   : > { %5864 = vst.msk [vmem:[#allocation3 + $0x18] sm:$0xff] %vm282_vm1, %v5832_v51  ;;  %v5047_v10 = vadd.f32 %v5015_v33, %v4912_v7  ;;  %v7701_v18 = vpop.f32.mrb[106].mxu1  ;;  %v5803_v45 = vld [vmem:[#allocation3 + $0x30] sm:$0xff] }
 0x2e6   : > { %5862 = vst.msk [vmem:[#allocation3 + $0x8] sm:$0xff] %vm282_vm1, %v5830_v58  ;;  %5081 = vst.msk [vmem:[#allocation3 + $0x50] sm:$0xff] %vm282_vm1, %v5049_v17  ;;  %v5050_v41 = vadd.f32 %v7701_v18, %v5018_v52  ;;  %v4915_v6 = vpop.f32.mrb[107].mxu1  ;;  %v5801_v25 = vld [vmem:[#allocation3 + $0x20] sm:$0xff] }
 0x2e7   : > { %5079 = vst.msk [vmem:[#allocation3 + $0x40] sm:$0xff] %vm282_vm1, %v5047_v10  ;;  %v5048_v54 = vadd.f32 %v5016_v8, %v4915_v6  ;;  %v5804_v21 = vld [vmem:[#allocation3 + $0x38] sm:$0xff] }
 0x2e8   : > { %v7730_v59 = vpop.f32.mrb[132].mxu0  ;;  %5082 = vst.msk [vmem:[#allocation3 + $0x58] sm:$0xff] %vm282_vm1, %v5050_v41  ;;  %v5802_v15 = vld [vmem:[#allocation3 + $0x28] sm:$0xff] }
 0x2e9   : > { %v5835_v35 = vadd.f32 %v7730_v59, %v5803_v45  ;;  %v5686_v63 = vpop.f32.mrb[133].mxu0  ;;  %5080 = vst.msk [vmem:[#allocation3 + $0x48] sm:$0xff] %vm282_vm1, %v5048_v54  ;;  %v5029_v45 = vld [vmem:[#allocation3 + $0xb0] sm:$0xff] }
 0x2ea   : > { %v5833_v19 = vadd.f32 %v5801_v25, %v5686_v63  ;;  %v7731_v9 = vpop.f32.mrb[134].mxu0  ;;  %v5027_v25 = vld [vmem:[#allocation3 + $0xa0] sm:$0xff] }
 0x2eb   : > { %5867 = vst.msk [vmem:[#allocation3 + $0x30] sm:$0xff] %vm282_vm1, %v5835_v35  ;;  %v5836_v0 = vadd.f32 %v7731_v9, %v5804_v21  ;;  %v5689_v14 = vpop.f32.mrb[135].mxu0  ;;  %v7704_v1 = vpop.f32.mrb[108].mxu1  ;;  %v5030_v21 = vld [vmem:[#allocation3 + $0xb8] sm:$0xff] }
 0x2ec   : > { %5865 = vst.msk [vmem:[#allocation3 + $0x20] sm:$0xff] %vm282_vm1, %v5833_v19  ;;  %v5834_v29 = vadd.f32 %v5802_v15, %v5689_v14  ;;  %v5053_v40 = vadd.f32 %v7704_v1, %v5021_v27  ;;  %v4928_v11 = vpop.f32.mrb[109].mxu1  ;;  %v5028_v19 = vld [vmem:[#allocation3 + $0xa8] sm:$0xff] }
 0x2ed   : > { %5868 = vst.msk [vmem:[#allocation3 + $0x38] sm:$0xff] %vm282_vm1, %v5836_v0  ;;  %v5051_v42 = vadd.f32 %v5019_v31, %v4928_v11  ;;  %v7705_v12 = vpop.f32.mrb[110].mxu1  ;;  %v5807_v4 = vld [vmem:[#allocation3 + $0x50] sm:$0xff] }
 0x2ee   : > { %5866 = vst.msk [vmem:[#allocation3 + $0x28] sm:$0xff] %vm282_vm1, %v5834_v29  ;;  %5085 = vst.msk [vmem:[#allocation3 + $0x70] sm:$0xff] %vm282_vm1, %v5053_v40  ;;  %v5054_v43 = vadd.f32 %v7705_v12, %v5022_v37  ;;  %v4931_v22 = vpop.f32.mrb[111].mxu1  ;;  %v5805_v3 = vld [vmem:[#allocation3 + $0x40] sm:$0xff] }
 0x2ef   : > { %5083 = vst.msk [vmem:[#allocation3 + $0x60] sm:$0xff] %vm282_vm1, %v5051_v42  ;;  %v5052_v5 = vadd.f32 %v5020_v60, %v4931_v22  ;;  %v5808_v49 = vld [vmem:[#allocation3 + $0x58] sm:$0xff] }
 0x2f0   : > { %v7734_v62 = vpop.f32.mrb[136].mxu0  ;;  %5086 = vst.msk [vmem:[#allocation3 + $0x78] sm:$0xff] %vm282_vm1, %v5054_v43  ;;  %v5806_v32 = vld [vmem:[#allocation3 + $0x48] sm:$0xff] }
 0x2f1   : > { %v5839_v20 = vadd.f32 %v7734_v62, %v5807_v4  ;;  %v5702_v28 = vpop.f32.mrb[137].mxu0  ;;  %5084 = vst.msk [vmem:[#allocation3 + $0x68] sm:$0xff] %vm282_vm1, %v5052_v5  ;;  %v5033_v4 = vld [vmem:[#allocation3 + $0xd0] sm:$0xff] }
 0x2f2   : > { %v5837_v30 = vadd.f32 %v5805_v3, %v5702_v28  ;;  %v7735_v53 = vpop.f32.mrb[138].mxu0  ;;  %v5031_v3 = vld [vmem:[#allocation3 + $0xc0] sm:$0xff] }
 0x2f3   : > { %5871 = vst.msk [vmem:[#allocation3 + $0x50] sm:$0xff] %vm282_vm1, %v5839_v20  ;;  %v5840_v39 = vadd.f32 %v7735_v53, %v5808_v49  ;;  %v5705_v55 = vpop.f32.mrb[139].mxu0  ;;  %v7708_v24 = vpop.f32.mrb[112].mxu1  ;;  %v5034_v49 = vld [vmem:[#allocation3 + $0xd8] sm:$0xff] }
 0x2f4   : > { %5869 = vst.msk [vmem:[#allocation3 + $0x40] sm:$0xff] %vm282_vm1, %v5837_v30  ;;  %v5838_v56 = vadd.f32 %v5806_v32, %v5705_v55  ;;  %v5057_v50 = vadd.f32 %v7708_v24, %v5025_v13  ;;  %v4944_v47 = vpop.f32.mrb[113].mxu1  ;;  %v5032_v30 = vld [vmem:[#allocation3 + $0xc8] sm:$0xff] }
 0x2f5   : > { %5872 = vst.msk [vmem:[#allocation3 + $0x58] sm:$0xff] %vm282_vm1, %v5840_v39  ;;  %v5055_v46 = vadd.f32 %v5023_v61, %v4944_v47  ;;  %v7709_v23 = vpop.f32.mrb[114].mxu1  ;;  %v5811_v16 = vld [vmem:[#allocation3 + $0x70] sm:$0xff] }
 0x2f6   : > { %5870 = vst.msk [vmem:[#allocation3 + $0x48] sm:$0xff] %vm282_vm1, %v5838_v56  ;;  %5089 = vst.msk [vmem:[#allocation3 + $0x90] sm:$0xff] %vm282_vm1, %v5057_v50  ;;  %v5058_v57 = vadd.f32 %v7709_v23, %v5026_v36  ;;  %v4947_v26 = vpop.f32.mrb[115].mxu1  ;;  %v5809_v2 = vld [vmem:[#allocation3 + $0x60] sm:$0xff] }
 0x2f7   : > { %5087 = vst.msk [vmem:[#allocation3 + $0x80] sm:$0xff] %vm282_vm1, %v5055_v46  ;;  %v5056_v51 = vadd.f32 %v5024_v34, %v4947_v26  ;;  %v5812_v48 = vld [vmem:[#allocation3 + $0x78] sm:$0xff] }
 0x2f8   : > { %v7738_v38 = vpop.f32.mrb[140].mxu0  ;;  %5090 = vst.msk [vmem:[#allocation3 + $0x98] sm:$0xff] %vm282_vm1, %v5058_v57  ;;  %v5810_v17 = vld [vmem:[#allocation3 + $0x68] sm:$0xff] }
 0x2f9   : > { %v5843_v44 = vadd.f32 %v7738_v38, %v5811_v16  ;;  %v5718_v58 = vpop.f32.mrb[141].mxu0  ;;  %5088 = vst.msk [vmem:[#allocation3 + $0x88] sm:$0xff] %vm282_vm1, %v5056_v51  ;;  %v5037_v16 = vld [vmem:[#allocation3 + $0xf0] sm:$0xff] }
 0x2fa   : > { %v5841_v7 = vadd.f32 %v5809_v2, %v5718_v58  ;;  %v7739_v33 = vpop.f32.mrb[142].mxu0  ;;  %v5035_v2 = vld [vmem:[#allocation3 + $0xe0] sm:$0xff] }
 0x2fb   : > { %5875 = vst.msk [vmem:[#allocation3 + $0x70] sm:$0xff] %vm282_vm1, %v5843_v44  ;;  %v5844_v10 = vadd.f32 %v7739_v33, %v5812_v48  ;;  %v5721_v18 = vpop.f32.mrb[143].mxu0  ;;  %v7712_v52 = vpop.f32.mrb[116].mxu1  ;;  %v5038_v48 = vld [vmem:[#allocation3 + $0xf8] sm:$0xff] }
 0x2fc   : > { %5873 = vst.msk [vmem:[#allocation3 + $0x60] sm:$0xff] %vm282_vm1, %v5841_v7  ;;  %v5842_v41 = vadd.f32 %v5810_v17, %v5721_v18  ;;  %v5061_v6 = vadd.f32 %v7712_v52, %v5029_v45  ;;  %v4960_v8 = vpop.f32.mrb[117].mxu1  ;;  %v5036_v17 = vld [vmem:[#allocation3 + $0xe8] sm:$0xff] }
 0x2fd   : > { %5876 = vst.msk [vmem:[#allocation3 + $0x78] sm:$0xff] %vm282_vm1, %v5844_v10  ;;  %v5059_v54 = vadd.f32 %v5027_v25, %v4960_v8  ;;  %v7713_v59 = vpop.f32.mrb[118].mxu1  ;;  %v5815_v35 = vld [vmem:[#allocation3 + $0x90] sm:$0xff] }
 0x2fe   : > { %5874 = vst.msk [vmem:[#allocation3 + $0x68] sm:$0xff] %vm282_vm1, %v5842_v41  ;;  %5093 = vst.msk [vmem:[#allocation3 + $0xb0] sm:$0xff] %vm282_vm1, %v5061_v6  ;;  %v5062_v63 = vadd.f32 %v7713_v59, %v5030_v21  ;;  %v4963_v15 = vpop.f32.mrb[119].mxu1  ;;  %v5813_v9 = vld [vmem:[#allocation3 + $0x80] sm:$0xff] }
 0x2ff   : > { %5091 = vst.msk [vmem:[#allocation3 + $0xa0] sm:$0xff] %vm282_vm1, %v5059_v54  ;;  %v5060_v0 = vadd.f32 %v5028_v19, %v4963_v15  ;;  %v5816_v1 = vld [vmem:[#allocation3 + $0x98] sm:$0xff] }
 0x300   : > { %v7742_v14 = vpop.f32.mrb[144].mxu0  ;;  %5094 = vst.msk [vmem:[#allocation3 + $0xb8] sm:$0xff] %vm282_vm1, %v5062_v63  ;;  %v5814_v40 = vld [vmem:[#allocation3 + $0x88] sm:$0xff]  ;;  %v6365_v63 = vld [vmem:[#allocation3 + $0x10] sm:$0xff] }
 0x301   : > { %v5847_v27 = vadd.f32 %v7742_v14, %v5815_v35  ;;  %v5734_v29 = vpop.f32.mrb[145].mxu0  ;;  %5092 = vst.msk [vmem:[#allocation3 + $0xa8] sm:$0xff] %vm282_vm1, %v5060_v0 }
 0x302   : > { %v5845_v11 = vadd.f32 %v5813_v9, %v5734_v29  ;;  %v7743_v31 = vpop.f32.mrb[146].mxu0  ;;  %v6363_v9 = vld [vmem:[#allocation3] sm:$0xff] }
 0x303   : > { %5879 = vst.msk [vmem:[#allocation3 + $0x90] sm:$0xff] %vm282_vm1, %v5847_v27  ;;  %v5848_v42 = vadd.f32 %v7743_v31, %v5816_v1  ;;  %v5737_v12 = vpop.f32.mrb[147].mxu0  ;;  %v7716_v37 = vpop.f32.mrb[120].mxu1  ;;  %v6366_v1 = vld [vmem:[#allocation3 + $0x18] sm:$0xff]  ;;  %v9463_v31 = vld [vmem:[%s9606_s4] ss:$0 sm:$0xff] }
 0x304   : > { %5877 = vst.msk [vmem:[#allocation3 + $0x80] sm:$0xff] %vm282_vm1, %v5845_v11  ;;  %v5846_v43 = vadd.f32 %v5814_v40, %v5737_v12  ;;  %v5065_v22 = vadd.f32 %v7716_v37, %v5033_v4  ;;  %v4976_v60 = vpop.f32.mrb[121].mxu1  ;;  %v6364_v40 = vld [vmem:[#allocation3 + $0x8] sm:$0xff]  ;;  %v6369_v12 = vld [vmem:[#allocation3 + $0x30] sm:$0xff] }
 0x305   : > { %5880 = vst.msk [vmem:[#allocation3 + $0x98] sm:$0xff] %vm282_vm1, %v5848_v42  ;;  %v5063_v5 = vadd.f32 %v5031_v3, %v4976_v60  ;;  %v7717_v62 = vpop.f32.mrb[122].mxu1  ;;  %v5819_v20 = vld [vmem:[#allocation3 + $0xb0] sm:$0xff] }
 0x306   : > { %5878 = vst.msk [vmem:[#allocation3 + $0x88] sm:$0xff] %vm282_vm1, %v5846_v43  ;;  %5097 = vst.msk [vmem:[#allocation3 + $0xd0] sm:$0xff] %vm282_vm1, %v5065_v22  ;;  %v5066_v28 = vadd.f32 %v7717_v62, %v5034_v49  ;;  %v4979_v32 = vpop.f32.mrb[123].mxu1  ;;  %v5817_v53 = vld [vmem:[#allocation3 + $0xa0] sm:$0xff]  ;;  %v6370_v62 = vld [vmem:[#allocation3 + $0x38] sm:$0xff] }
 0x307   : > { %5095 = vst.msk [vmem:[#allocation3 + $0xc0] sm:$0xff] %vm282_vm1, %v5063_v5  ;;  %v5064_v39 = vadd.f32 %v5032_v30, %v4979_v32  ;;  %v5820_v24 = vld [vmem:[#allocation3 + $0xb8] sm:$0xff]  ;;  %v6367_v43 = vld [vmem:[#allocation3 + $0x20] sm:$0xff] }
 0x308   : > { %v7746_v55 = vpop.f32.mrb[148].mxu0  ;;  %5098 = vst.msk [vmem:[#allocation3 + $0xd8] sm:$0xff] %vm282_vm1, %v5066_v28  ;;  %v5818_v50 = vld [vmem:[#allocation3 + $0xa8] sm:$0xff] }
 0x309   : > { %v5851_v13 = vadd.f32 %v7746_v55, %v5819_v20  ;;  %v5750_v56 = vpop.f32.mrb[149].mxu0  ;;  %5096 = vst.msk [vmem:[#allocation3 + $0xc8] sm:$0xff] %vm282_vm1, %v5064_v39 }
 0x30a   : > { %v5849_v47 = vadd.f32 %v5817_v53, %v5750_v56  ;;  %v7747_v61 = vpop.f32.mrb[150].mxu0  ;;  %v6368_v53 = vld [vmem:[#allocation3 + $0x28] sm:$0xff] }
 0x30b   : > { %5883 = vst.msk [vmem:[#allocation3 + $0xb0] sm:$0xff] %vm282_vm1, %v5851_v13  ;;  %v5852_v46 = vadd.f32 %v7747_v61, %v5820_v24  ;;  %v5753_v23 = vpop.f32.mrb[151].mxu0  ;;  %v7720_v36 = vpop.f32.mrb[124].mxu1 }
 0x30c   : > { %5881 = vst.msk [vmem:[#allocation3 + $0xa0] sm:$0xff] %vm282_vm1, %v5849_v47  ;;  %v5850_v57 = vadd.f32 %v5818_v50, %v5753_v23  ;;  %v5069_v26 = vadd.f32 %v7720_v36, %v5037_v16  ;;  %v4992_v34 = vpop.f32.mrb[125].mxu1 }
 0x30d   : > { %5884 = vst.msk [vmem:[#allocation3 + $0xb8] sm:$0xff] %vm282_vm1, %v5852_v46  ;;  %v5067_v51 = vadd.f32 %v5035_v2, %v4992_v34  ;;  %v7721_v38 = vpop.f32.mrb[126].mxu1  ;;  %v5823_v7 = vld [vmem:[#allocation3 + $0xd0] sm:$0xff] }
 0x30e   : > { %5882 = vst.msk [vmem:[#allocation3 + $0xa8] sm:$0xff] %vm282_vm1, %v5850_v57  ;;  %5101 = vst.msk [vmem:[#allocation3 + $0xf0] sm:$0xff] %vm282_vm1, %v5069_v26  ;;  %v5070_v44 = vadd.f32 %v7721_v38, %v5038_v48  ;;  %v4995_v58 = vpop.f32.mrb[127].mxu1  ;;  %v5821_v10 = vld [vmem:[#allocation3 + $0xc0] sm:$0xff] }
 0x30f   : > { %5099 = vst.msk [vmem:[#allocation3 + $0xe0] sm:$0xff] %vm282_vm1, %v5067_v51  ;;  %v5068_v33 = vadd.f32 %v5036_v17, %v4995_v58  ;;  %v5824_v52 = vld [vmem:[#allocation3 + $0xd8] sm:$0xff] }
 0x310   : > { %5102 = vst.msk [vmem:[#allocation3 + $0xf8] sm:$0xff] %vm282_vm1, %v5070_v44  ;;  %v5822_v6 = vld [vmem:[#allocation3 + $0xc8] sm:$0xff] }
 0x311   : > { %v7750_v18 = vpop.f32.mrb[152].mxu0  ;;  %5100 = vst.msk [vmem:[#allocation3 + $0xe8] sm:$0xff] %vm282_vm1, %v5068_v33  ;;  %v6373_v33 = vld [vmem:[#allocation3 + $0x50] sm:$0xff] }
 0x312   : > { %v5855_v45 = vadd.f32 %v7750_v18, %v5823_v7  ;;  %v5766_v41 = vpop.f32.mrb[153].mxu0 }
 0x313   : > { %v5853_v8 = vadd.f32 %v5821_v10, %v5766_v41  ;;  %v7751_v25 = vpop.f32.mrb[154].mxu0 }
 0x314   : > { %5887 = vst.msk [vmem:[#allocation3 + $0xd0] sm:$0xff] %vm282_vm1, %v5855_v45  ;;  %v5856_v54 = vadd.f32 %v7751_v25, %v5824_v52  ;;  %v5769_v59 = vpop.f32.mrb[155].mxu0  ;;  %v6371_v45 = vld [vmem:[#allocation3 + $0x40] sm:$0xff] }
 0x315   : > { %5885 = vst.msk [vmem:[#allocation3 + $0xc0] sm:$0xff] %vm282_vm1, %v5853_v8  ;;  %v5854_v21 = vadd.f32 %v5822_v6, %v5769_v59  ;;  %v7760_v35 = vpop.f32.mrb[128].mxu1  ;;  %v5827_v60 = vld [vmem:[#allocation3 + $0xf0] sm:$0xff] }
 0x316   : > { %5888 = vst.msk [vmem:[#allocation3 + $0xd8] sm:$0xff] %vm282_vm1, %v5856_v54  ;;  %v6397_v15 = vadd.f32 %v7760_v35, %v6365_v63  ;;  %v6236_v19 = vpop.f32.mrb[129].mxu1  ;;  %v5825_v28 = vld [vmem:[#allocation3 + $0xe0] sm:$0xff]  ;;  %v6374_v54 = vld [vmem:[#allocation3 + $0x58] sm:$0xff] }
 0x317   : > { %5886 = vst.msk [vmem:[#allocation3 + $0xc8] sm:$0xff] %vm282_vm1, %v5854_v21  ;;  %v6395_v0 = vadd.f32 %v6363_v9, %v6236_v19  ;;  %v7761_v14 = vpop.f32.mrb[130].mxu1  ;;  %v5828_v13 = vld [vmem:[#allocation3 + $0xf8] sm:$0xff] }
 0x318   : > { %6429 = vst.msk [vmem:[#allocation3 + $0x10] sm:$0xff] %vm282_vm1, %v6397_v15  ;;  %v6398_v27 = vadd.f32 %v7761_v14, %v6366_v1  ;;  %v6239_v29 = vpop.f32.mrb[131].mxu1  ;;  %v5826_v36 = vld [vmem:[#allocation3 + $0xe8] sm:$0xff] }
 0x319   : > { %6427 = vst.msk [vmem:[#allocation3] sm:$0xff] %vm282_vm1, %v6395_v0  ;;  %v6396_v11 = vadd.f32 %v6364_v40, %v6239_v29  ;;  %v6372_v15 = vld [vmem:[#allocation3 + $0x48] sm:$0xff] }
 0x31a   : > { %6430 = vst.msk [vmem:[#allocation3 + $0x18] sm:$0xff] %vm282_vm1, %v6398_v27 }
 0x31b   : > { %6428 = vst.msk [vmem:[#allocation3 + $0x8] sm:$0xff] %vm282_vm1, %v6396_v11 }
 0x31d   : > { %v7764_v42 = vpop.f32.mrb[132].mxu1 }
 0x31e   : > { %v6401_v37 = vadd.f32 %v7764_v42, %v6369_v12  ;;  %v6252_v4 = vpop.f32.mrb[133].mxu1 }
 0x31f   : > { %v6461_v22 = vld [vmem:[#allocation3 + $0x10] sm:$0xff]  ;;  %v6399_v3 = vadd.f32 %v6367_v43, %v6252_v4  ;;  %v7765_v5 = vpop.f32.mrb[134].mxu1 }
 0x320   : > { %v6500_v49 = vadd.f32 %v9463_v31, %v6461_v22  ;;  %v6459_v20 = vld [vmem:[#allocation3] sm:$0xff]  ;;  %6433 = vst.msk [vmem:[#allocation3 + $0x30] sm:$0xff] %vm282_vm1, %v6401_v37  ;;  %v6402_v32 = vadd.f32 %v7765_v5, %v6370_v62  ;;  %v6255_v30 = vpop.f32.mrb[135].mxu1  ;;  %v6377_v43 = vld [vmem:[#allocation3 + $0x70] sm:$0xff] }
 0x321   : > { %v6498_v39 = vadd.f32 %v9463_v31, %v6459_v20  ;;  %v6462_v24 = vld [vmem:[#allocation3 + $0x18] sm:$0xff]  ;;  %6431 = vst.msk [vmem:[#allocation3 + $0x20] sm:$0xff] %vm282_vm1, %v6399_v3  ;;  %v6400_v56 = vadd.f32 %v6368_v53, %v6255_v30  ;;  %v6375_v5 = vld [vmem:[#allocation3 + $0x60] sm:$0xff] }
 0x322   : > { %v7754_v55 = vpop.f32.mrb[156].mxu0  ;;  %v6532_v50 = vmax.f32 %v6500_v49, 0.0  ;;  %v6501_v61 = vadd.f32 %v9463_v31, %v6462_v24  ;;  %v6460_v23 = vld [vmem:[#allocation3 + $0x8] sm:$0xff]  ;;  %6434 = vst.msk [vmem:[#allocation3 + $0x38] sm:$0xff] %vm282_vm1, %v6402_v32  ;;  %v6378_v32 = vld [vmem:[#allocation3 + $0x78] sm:$0xff] }
 0x323   : > { %v5859_v47 = vadd.f32 %v7754_v55, %v5827_v60  ;;  %v5782_v46 = vpop.f32.mrb[157].mxu0  ;;  %v6530_v16 = vmax.f32 %v6498_v39, 0.0  ;;  %v6499_v26 = vadd.f32 %v9463_v31, %v6460_v23  ;;  %6432 = vst.msk [vmem:[#allocation3 + $0x28] sm:$0xff] %vm282_vm1, %v6400_v56  ;;  %v6376_v24 = vld [vmem:[#allocation3 + $0x68] sm:$0xff] }
 0x324   : > { %v5857_v57 = vadd.f32 %v5825_v28, %v5782_v46  ;;  %v7755_v34 = vpop.f32.mrb[158].mxu0  ;;  %v7250_v2 = vpack.c.bf16 %v6532_v50, %v6532_v50  ;;  %v6533_v51 = vmax.f32 %v6501_v61, 0.0 }
 0x325   : > { %5891 = vst.msk [vmem:[#allocation3 + $0xf0] sm:$0xff] %vm282_vm1, %v5859_v47  ;;  %v5860_v38 = vadd.f32 %v7755_v34, %v5828_v13  ;;  %v5785_v48 = vpop.f32.mrb[159].mxu0  ;;  %v7248_v44 = vpack.c.bf16 %v6530_v16, %v6530_v16  ;;  %v6531_v58 = vmax.f32 %v6499_v26, 0.0  ;;  %v7768_v7 = vpop.f32.mrb[136].mxu1 }
 0x326   : > { %5889 = vst.msk [vmem:[#allocation3 + $0xe0] sm:$0xff] %vm282_vm1, %v5857_v57  ;;  %v5858_v17 = vadd.f32 %v5826_v36, %v5785_v48  ;;  %v7251_v10 = vpack.c.bf16 %v6533_v51, %v6533_v51  ;;  %v6405_v18 = vadd.f32 %v7768_v7, %v6373_v33  ;;  %v6268_v52 = vpop.f32.mrb[137].mxu1  ;;  %v6381_v51 = vld [vmem:[#allocation3 + $0x90] sm:$0xff] }
 0x327   : > { %6692 = vst.msk [vmem:[%s9475_s6 + $0x8] sm:$0xf] %vm544_vm7, %v7250_v2  ;;  %6690 = vst.msk [vmem:[%s9475_s6] sm:$0xf] %vm544_vm7, %v7248_v44  ;;  %v7249_v41 = vpack.c.bf16 %v6531_v58, %v6531_v58  ;;  %v6465_v6 = vld [vmem:[#allocation3 + $0x30] sm:$0xff]  ;;  %v6403_v8 = vadd.f32 %v6371_v45, %v6268_v52  ;;  %v7769_v25 = vpop.f32.mrb[138].mxu1 }
 0x328   : > { %5892 = vst.msk [vmem:[#allocation3 + $0xf8] sm:$0xff] %vm282_vm1, %v5860_v38  ;;  %5890 = vst.msk [vmem:[#allocation3 + $0xe8] sm:$0xff] %vm282_vm1, %v5858_v17  ;;  %v6504_v59 = vadd.f32 %v9463_v31, %v6465_v6  ;;  %v6463_v21 = vld [vmem:[#allocation3 + $0x20] sm:$0xff]  ;;  %v6406_v35 = vadd.f32 %v7769_v25, %v6374_v54  ;;  %v6271_v63 = vpop.f32.mrb[139].mxu1 }
 0x329   : > { %6693 = vst.msk [vmem:[%s9475_s6 + $0xc] sm:$0xf] %vm544_vm7, %v7251_v10  ;;  %6691 = vst.msk [vmem:[%s9475_s6 + $0x4] sm:$0xf] %vm544_vm7, %v7249_v41  ;;  %v6502_v19 = vadd.f32 %v9463_v31, %v6463_v21  ;;  %v6466_v9 = vld [vmem:[#allocation3 + $0x38] sm:$0xff]  ;;  %v6404_v0 = vadd.f32 %v6372_v15, %v6271_v63  ;;  %v6379_v58 = vld [vmem:[#allocation3 + $0x80] sm:$0xff] }
 0x32a   : > { %6437 = vst.msk [vmem:[#allocation3 + $0x50] sm:$0xff] %vm282_vm1, %v6405_v18  ;;  %6435 = vst.msk [vmem:[#allocation3 + $0x40] sm:$0xff] %vm282_vm1, %v6403_v8  ;;  %v6536_v14 = vmax.f32 %v6504_v59, 0.0  ;;  %v6505_v1 = vadd.f32 %v9463_v31, %v6466_v9  ;;  %v6464_v27 = vld [vmem:[#allocation3 + $0x28] sm:$0xff]  ;;  %v6382_v18 = vld [vmem:[#allocation3 + $0x98] sm:$0xff] }
 0x32b   : > { %6438 = vst.msk [vmem:[#allocation3 + $0x58] sm:$0xff] %vm282_vm1, %v6406_v35  ;;  %v6534_v29 = vmax.f32 %v6502_v19, 0.0  ;;  %v6503_v40 = vadd.f32 %v9463_v31, %v6464_v27  ;;  %6436 = vst.msk [vmem:[#allocation3 + $0x48] sm:$0xff] %vm282_vm1, %v6404_v0  ;;  %v6380_v8 = vld [vmem:[#allocation3 + $0x88] sm:$0xff] }
 0x32c   : > { %v7254_v11 = vpack.c.bf16 %v6536_v14, %v6536_v14  ;;  %v6537_v42 = vmax.f32 %v6505_v1, 0.0 }
 0x32d   : > { %v7252_v12 = vpack.c.bf16 %v6534_v29, %v6534_v29  ;;  %v6535_v37 = vmax.f32 %v6503_v40, 0.0  ;;  %v7772_v4 = vpop.f32.mrb[140].mxu1  ;;  %v6385_v29 = vld [vmem:[#allocation3 + $0xb0] sm:$0xff] }
 0x32e   : > { %6696 = vst.msk [vmem:[%s9475_s6 + $0x18] sm:$0xf] %vm544_vm7, %v7254_v11  ;;  %v7255_v22 = vpack.c.bf16 %v6537_v42, %v6537_v42  ;;  %v6409_v60 = vadd.f32 %v7772_v4, %v6377_v43  ;;  %v6284_v3 = vpop.f32.mrb[141].mxu1 }
 0x32f   : > { %6694 = vst.msk [vmem:[%s9475_s6 + $0x10] sm:$0xf] %vm544_vm7, %v7252_v12  ;;  %v7253_v62 = vpack.c.bf16 %v6535_v37, %v6535_v37  ;;  %v6407_v20 = vadd.f32 %v6375_v5, %v6284_v3  ;;  %v7773_v28 = vpop.f32.mrb[142].mxu1  ;;  %v6383_v12 = vld [vmem:[#allocation3 + $0xa0] sm:$0xff] }
 0x330   : > { %6697 = vst.msk [vmem:[%s9475_s6 + $0x1c] sm:$0xf] %vm544_vm7, %v7255_v22  ;;  %v6410_v39 = vadd.f32 %v7773_v28, %v6378_v32  ;;  %v6287_v55 = vpop.f32.mrb[143].mxu1 }
 0x331   : > { %v6469_v49 = vld [vmem:[#allocation3 + $0x50] sm:$0xff]  ;;  %v6467_v53 = vld [vmem:[#allocation3 + $0x40] sm:$0xff]  ;;  %6441 = vst.msk [vmem:[#allocation3 + $0x70] sm:$0xff] %vm282_vm1, %v6409_v60  ;;  %6439 = vst.msk [vmem:[#allocation3 + $0x60] sm:$0xff] %vm282_vm1, %v6407_v20  ;;  %v6408_v50 = vadd.f32 %v6376_v24, %v6287_v55 }
 0x332   : > { %v6508_v30 = vadd.f32 %v9463_v31, %v6469_v49  ;;  %6695 = vst.msk [vmem:[%s9475_s6 + $0x14] sm:$0xf] %vm544_vm7, %v7253_v62  ;;  %v6506_v13 = vadd.f32 %v9463_v31, %v6467_v53  ;;  %v6470_v56 = vld [vmem:[#allocation3 + $0x58] sm:$0xff]  ;;  %v6468_v46 = vld [vmem:[#allocation3 + $0x48] sm:$0xff] }
 0x333   : > { %v6509_v61 = vadd.f32 %v9463_v31, %v6470_v56  ;;  %6442 = vst.msk [vmem:[#allocation3 + $0x78] sm:$0xff] %vm282_vm1, %v6410_v39  ;;  %v6507_v36 = vadd.f32 %v9463_v31, %v6468_v46  ;;  %6440 = vst.msk [vmem:[#allocation3 + $0x68] sm:$0xff] %vm282_vm1, %v6408_v50  ;;  %v6386_v60 = vld [vmem:[#allocation3 + $0xb8] sm:$0xff]  ;;  %v6384_v20 = vld [vmem:[#allocation3 + $0xa8] sm:$0xff] }
 0x334   : > { %v6540_v47 = vmax.f32 %v6508_v30, 0.0  ;;  %v6538_v23 = vmax.f32 %v6506_v13, 0.0 }
 0x335   : > { %v6541_v57 = vmax.f32 %v6509_v61, 0.0  ;;  %v6539_v34 = vmax.f32 %v6507_v36, 0.0  ;;  %v7776_v2 = vpop.f32.mrb[144].mxu1 }
 0x336   : > { %v7258_v16 = vpack.c.bf16 %v6540_v47, %v6540_v47  ;;  %v7256_v26 = vpack.c.bf16 %v6538_v23, %v6538_v23  ;;  %v6413_v48 = vadd.f32 %v7776_v2, %v6381_v51  ;;  %v6300_v44 = vpop.f32.mrb[145].mxu1  ;;  %v6389_v23 = vld [vmem:[#allocation3 + $0xd0] sm:$0xff] }
 0x337   : > { %v7259_v38 = vpack.c.bf16 %v6541_v57, %v6541_v57  ;;  %v7257_v17 = vpack.c.bf16 %v6539_v34, %v6539_v34  ;;  %v6411_v33 = vadd.f32 %v6379_v58, %v6300_v44  ;;  %v7777_v10 = vpop.f32.mrb[146].mxu1 }
 0x338   : > { %6700 = vst.msk [vmem:[%s9475_s6 + $0x28] sm:$0xf] %vm544_vm7, %v7258_v16  ;;  %6698 = vst.msk [vmem:[%s9475_s6 + $0x20] sm:$0xf] %vm544_vm7, %v7256_v26  ;;  %v6473_v7 = vld [vmem:[#allocation3 + $0x70] sm:$0xff]  ;;  %v6471_v45 = vld [vmem:[#allocation3 + $0x60] sm:$0xff]  ;;  %v6414_v41 = vadd.f32 %v7777_v10, %v6382_v18 }
 0x339   : > { %6701 = vst.msk [vmem:[%s9475_s6 + $0x2c] sm:$0xf] %vm544_vm7, %v7259_v38  ;;  %v6512_v52 = vadd.f32 %v9463_v31, %v6473_v7  ;;  %v6303_v6 = vpop.f32.mrb[147].mxu1  ;;  %6699 = vst.msk [vmem:[%s9475_s6 + $0x24] sm:$0xf] %vm544_vm7, %v7257_v17  ;;  %v6510_v25 = vadd.f32 %v9463_v31, %v6471_v45  ;;  %v6387_v26 = vld [vmem:[#allocation3 + $0xc0] sm:$0xff] }
 0x33a   : > { %6445 = vst.msk [vmem:[#allocation3 + $0x90] sm:$0xff] %vm282_vm1, %v6413_v48  ;;  %v6474_v54 = vld [vmem:[#allocation3 + $0x78] sm:$0xff]  ;;  %6443 = vst.msk [vmem:[#allocation3 + $0x80] sm:$0xff] %vm282_vm1, %v6411_v33  ;;  %v6412_v59 = vadd.f32 %v6380_v8, %v6303_v6  ;;  %v6472_v63 = vld [vmem:[#allocation3 + $0x68] sm:$0xff] }
 0x33b   : > { %v6544_v21 = vmax.f32 %v6512_v52, 0.0  ;;  %v6513_v35 = vadd.f32 %v9463_v31, %v6474_v54  ;;  %6446 = vst.msk [vmem:[#allocation3 + $0x98] sm:$0xff] %vm282_vm1, %v6414_v41  ;;  %v6542_v15 = vmax.f32 %v6510_v25, 0.0  ;;  %v6511_v19 = vadd.f32 %v9463_v31, %v6472_v63  ;;  %v6390_v48 = vld [vmem:[#allocation3 + $0xd8] sm:$0xff]  ;;  %v6388_v33 = vld [vmem:[#allocation3 + $0xc8] sm:$0xff] }
 0x33c   : > { %6444 = vst.msk [vmem:[#allocation3 + $0x88] sm:$0xff] %vm282_vm1, %v6412_v59 }
 0x33d   : > { %v7262_v9 = vpack.c.bf16 %v6544_v21, %v6544_v21  ;;  %v6545_v0 = vmax.f32 %v6513_v35, 0.0  ;;  %v7260_v14 = vpack.c.bf16 %v6542_v15, %v6542_v15  ;;  %v6543_v1 = vmax.f32 %v6511_v19, 0.0  ;;  %v7780_v27 = vpop.f32.mrb[148].mxu1  ;;  %v6393_v15 = vld [vmem:[#allocation3 + $0xf0] sm:$0xff] }
 0x33e   : > { %v6417_v11 = vadd.f32 %v7780_v27, %v6385_v29  ;;  %v6316_v42 = vpop.f32.mrb[149].mxu1 }
 0x33f   : > { %6704 = vst.msk [vmem:[%s9475_s6 + $0x38] sm:$0xf] %vm544_vm7, %v7262_v9  ;;  %v7263_v40 = vpack.c.bf16 %v6545_v0, %v6545_v0  ;;  %6702 = vst.msk [vmem:[%s9475_s6 + $0x30] sm:$0xf] %vm544_vm7, %v7260_v14  ;;  %v7261_v37 = vpack.c.bf16 %v6543_v1, %v6543_v1  ;;  %v6415_v43 = vadd.f32 %v6383_v12, %v6316_v42  ;;  %v7781_v22 = vpop.f32.mrb[150].mxu1  ;;  %v6391_v14 = vld [vmem:[#allocation3 + $0xe0] sm:$0xff] }
 0x340   : > { %6449 = vst.msk [vmem:[#allocation3 + $0xb0] sm:$0xff] %vm282_vm1, %v6417_v11  ;;  %v6418_v62 = vadd.f32 %v7781_v22, %v6386_v60  ;;  %v6319_v49 = vpop.f32.mrb[151].mxu1  ;;  %v6394_v11 = vld [vmem:[#allocation3 + $0xf8] sm:$0xff] }
 0x341   : > { %v6477_v4 = vld [vmem:[#allocation3 + $0x90] sm:$0xff]  ;;  %6705 = vst.msk [vmem:[%s9475_s6 + $0x3c] sm:$0xf] %vm544_vm7, %v7263_v40  ;;  %v6475_v5 = vld [vmem:[#allocation3 + $0x80] sm:$0xff]  ;;  %6703 = vst.msk [vmem:[%s9475_s6 + $0x34] sm:$0xf] %vm544_vm7, %v7261_v37  ;;  %v6416_v30 = vadd.f32 %v6384_v20, %v6319_v49 }
 0x342   : > { %v6516_v3 = vadd.f32 %v9463_v31, %v6477_v4  ;;  %v6514_v28 = vadd.f32 %v9463_v31, %v6475_v5  ;;  %v6478_v32 = vld [vmem:[#allocation3 + $0x98] sm:$0xff]  ;;  %6447 = vst.msk [vmem:[#allocation3 + $0xa0] sm:$0xff] %vm282_vm1, %v6415_v43  ;;  %6450 = vst.msk [vmem:[#allocation3 + $0xb8] sm:$0xff] %vm282_vm1, %v6418_v62  ;;  %v6392_v43 = vld [vmem:[#allocation3 + $0xe8] sm:$0xff] }
 0x343   : > { %v6517_v39 = vadd.f32 %v9463_v31, %v6478_v32  ;;  %v6476_v55 = vld [vmem:[#allocation3 + $0x88] sm:$0xff]  ;;  %6448 = vst.msk [vmem:[#allocation3 + $0xa8] sm:$0xff] %vm282_vm1, %v6416_v30 }
 0x344   : > { %v6548_v53 = vmax.f32 %v6516_v3, 0.0  ;;  %v6546_v24 = vmax.f32 %v6514_v28, 0.0  ;;  %v6515_v13 = vadd.f32 %v9463_v31, %v6476_v55 }
 0x345   : > { %v6549_v50 = vmax.f32 %v6517_v39, 0.0  ;;  %v7784_v46 = vpop.f32.mrb[152].mxu1 }
 0x346   : > { %v7266_v56 = vpack.c.bf16 %v6548_v53, %v6548_v53  ;;  %v7264_v47 = vpack.c.bf16 %v6546_v24, %v6546_v24  ;;  %v6547_v61 = vmax.f32 %v6515_v13, 0.0  ;;  %v6421_v16 = vadd.f32 %v7784_v46, %v6389_v23  ;;  %v6332_v57 = vpop.f32.mrb[153].mxu1 }
 0x347   : > { %v7267_v36 = vpack.c.bf16 %v6549_v50, %v6549_v50  ;;  %v6481_v2 = vld [vmem:[#allocation3 + $0xb0] sm:$0xff]  ;;  %v6419_v51 = vadd.f32 %v6387_v26, %v6332_v57  ;;  %v7785_v38 = vpop.f32.mrb[154].mxu1 }
 0x348   : > { %6708 = vst.msk [vmem:[%s9475_s6 + $0x48] sm:$0xf] %vm544_vm7, %v7266_v56  ;;  %6706 = vst.msk [vmem:[%s9475_s6 + $0x40] sm:$0xf] %vm544_vm7, %v7264_v47  ;;  %v7265_v34 = vpack.c.bf16 %v6547_v61, %v6547_v61  ;;  %v6520_v44 = vadd.f32 %v9463_v31, %v6481_v2  ;;  %v6422_v17 = vadd.f32 %v7785_v38, %v6390_v48  ;;  %v6335_v7 = vpop.f32.mrb[155].mxu1 }
 0x349   : > { %6709 = vst.msk [vmem:[%s9475_s6 + $0x4c] sm:$0xf] %vm544_vm7, %v7267_v36  ;;  %v6479_v58 = vld [vmem:[#allocation3 + $0xa0] sm:$0xff]  ;;  %v6482_v18 = vld [vmem:[#allocation3 + $0xb8] sm:$0xff]  ;;  %v6420_v52 = vadd.f32 %v6388_v33, %v6335_v7 }
 0x34a   : > { %6453 = vst.msk [vmem:[#allocation3 + $0xd0] sm:$0xff] %vm282_vm1, %v6421_v16  ;;  %v6518_v10 = vadd.f32 %v9463_v31, %v6479_v58  ;;  %6451 = vst.msk [vmem:[#allocation3 + $0xc0] sm:$0xff] %vm282_vm1, %v6419_v51  ;;  %v6552_v45 = vmax.f32 %v6520_v44, 0.0  ;;  %v6521_v41 = vadd.f32 %v9463_v31, %v6482_v18  ;;  %v6480_v6 = vld [vmem:[#allocation3 + $0xa8] sm:$0xff] }
 0x34b   : > { %6707 = vst.msk [vmem:[%s9475_s6 + $0x44] sm:$0xf] %vm544_vm7, %v7265_v34  ;;  %v6519_v25 = vadd.f32 %v9463_v31, %v6480_v6 }
 0x34c   : > { %6454 = vst.msk [vmem:[#allocation3 + $0xd8] sm:$0xff] %vm282_vm1, %v6422_v17  ;;  %v6550_v8 = vmax.f32 %v6518_v10, 0.0  ;;  %6452 = vst.msk [vmem:[#allocation3 + $0xc8] sm:$0xff] %vm282_vm1, %v6420_v52  ;;  %v7270_v54 = vpack.c.bf16 %v6552_v45, %v6552_v45  ;;  %v6553_v59 = vmax.f32 %v6521_v41, 0.0 }
 0x34d   : > { %v6551_v35 = vmax.f32 %v6519_v25, 0.0  ;;  %v7788_v63 = vpop.f32.mrb[156].mxu1 }
 0x34e   : > { %v7268_v21 = vpack.c.bf16 %v6550_v8, %v6550_v8  ;;  %6712 = vst.msk [vmem:[%s9475_s6 + $0x58] sm:$0xf] %vm544_vm7, %v7270_v54  ;;  %v7271_v19 = vpack.c.bf16 %v6553_v59, %v6553_v59  ;;  %v6425_v9 = vadd.f32 %v7788_v63, %v6393_v15  ;;  %v6348_v0 = vpop.f32.mrb[157].mxu1 }
 0x34f   : > { %v7269_v1 = vpack.c.bf16 %v6551_v35, %v6551_v35  ;;  %v6423_v29 = vadd.f32 %v6391_v14, %v6348_v0  ;;  %v7789_v40 = vpop.f32.mrb[158].mxu1 }
 0x350   : > { %6710 = vst.msk [vmem:[%s9475_s6 + $0x50] sm:$0xf] %vm544_vm7, %v7268_v21  ;;  %6713 = vst.msk [vmem:[%s9475_s6 + $0x5c] sm:$0xf] %vm544_vm7, %v7271_v19  ;;  %v6426_v37 = vadd.f32 %v7789_v40, %v6394_v11  ;;  %v6351_v4 = vpop.f32.mrb[159].mxu1 }
 0x351   : > { %v6485_v27 = vld [vmem:[#allocation3 + $0xd0] sm:$0xff]  ;;  %v6483_v12 = vld [vmem:[#allocation3 + $0xc0] sm:$0xff]  ;;  %6457 = vst.msk [vmem:[#allocation3 + $0xf0] sm:$0xff] %vm282_vm1, %v6425_v9  ;;  %6455 = vst.msk [vmem:[#allocation3 + $0xe0] sm:$0xff] %vm282_vm1, %v6423_v29  ;;  %v6424_v3 = vadd.f32 %v6392_v43, %v6351_v4 }
 0x352   : > { %v6524_v42 = vadd.f32 %v9463_v31, %v6485_v27  ;;  %6711 = vst.msk [vmem:[%s9475_s6 + $0x54] sm:$0xf] %vm544_vm7, %v7269_v1  ;;  %v6522_v22 = vadd.f32 %v9463_v31, %v6483_v12 }
 0x353   : > { %v6486_v60 = vld [vmem:[#allocation3 + $0xd8] sm:$0xff]  ;;  %v6484_v49 = vld [vmem:[#allocation3 + $0xc8] sm:$0xff]  ;;  %6458 = vst.msk [vmem:[#allocation3 + $0xf8] sm:$0xff] %vm282_vm1, %v6426_v37  ;;  %6456 = vst.msk [vmem:[#allocation3 + $0xe8] sm:$0xff] %vm282_vm1, %v6424_v3 }
 0x354   : > { %v6556_v5 = vmax.f32 %v6524_v42, 0.0  ;;  %v6525_v62 = vadd.f32 %v9463_v31, %v6486_v60  ;;  %v6554_v20 = vmax.f32 %v6522_v22, 0.0  ;;  %v6523_v28 = vadd.f32 %v9463_v31, %v6484_v49 }
 0x356   : > { %v7274_v32 = vpack.c.bf16 %v6556_v5, %v6556_v5  ;;  %v6557_v30 = vmax.f32 %v6525_v62, 0.0  ;;  %v7272_v53 = vpack.c.bf16 %v6554_v20, %v6554_v20  ;;  %v6555_v39 = vmax.f32 %v6523_v28, 0.0 }
 0x358   : > { %6716 = vst.msk [vmem:[%s9475_s6 + $0x68] sm:$0xf] %vm544_vm7, %v7274_v32  ;;  %v7275_v55 = vpack.c.bf16 %v6557_v30, %v6557_v30  ;;  %6714 = vst.msk [vmem:[%s9475_s6 + $0x60] sm:$0xf] %vm544_vm7, %v7272_v53  ;;  %v7273_v24 = vpack.c.bf16 %v6555_v39, %v6555_v39  ;;  %v6489_v13 = vld [vmem:[#allocation3 + $0xf0] sm:$0xff]  ;;  %v6487_v50 = vld [vmem:[#allocation3 + $0xe0] sm:$0xff] }
 0x359   : > { %v6528_v56 = vadd.f32 %v9463_v31, %v6489_v13  ;;  %v6526_v47 = vadd.f32 %v9463_v31, %v6487_v50 }
 0x35a   : > { %6717 = vst.msk [vmem:[%s9475_s6 + $0x6c] sm:$0xf] %vm544_vm7, %v7275_v55  ;;  %6715 = vst.msk [vmem:[%s9475_s6 + $0x64] sm:$0xf] %vm544_vm7, %v7273_v24  ;;  %v6490_v61 = vld [vmem:[#allocation3 + $0xf8] sm:$0xff]  ;;  %v6488_v36 = vld [vmem:[#allocation3 + $0xe8] sm:$0xff] }
 0x35b   : > { %v6560_v46 = vmax.f32 %v6528_v56, 0.0  ;;  %v6529_v23 = vadd.f32 %v9463_v31, %v6490_v61  ;;  %v6558_v16 = vmax.f32 %v6526_v47, 0.0  ;;  %v6527_v57 = vadd.f32 %v9463_v31, %v6488_v36 }
 0x35d   : > { %v7278_v26 = vpack.c.bf16 %v6560_v46, %v6560_v46  ;;  %v6561_v34 = vmax.f32 %v6529_v23, 0.0  ;;  %v7276_v2 = vpack.c.bf16 %v6558_v16, %v6558_v16  ;;  %v6559_v51 = vmax.f32 %v6527_v57, 0.0 }
 0x35f   : > { %6720 = vst.msk [vmem:[%s9475_s6 + $0x78] sm:$0xf] %vm544_vm7, %v7278_v26  ;;  %v7279_v38 = vpack.c.bf16 %v6561_v34, %v6561_v34  ;;  %6718 = vst.msk [vmem:[%s9475_s6 + $0x70] sm:$0xf] %vm544_vm7, %v7276_v2  ;;  %v7277_v48 = vpack.c.bf16 %v6559_v51, %v6559_v51 }
 0x361   : > { %6721 = vst.msk [vmem:[%s9475_s6 + $0x7c] sm:$0xf] %vm544_vm7, %v7279_v38  ;;  %6719 = vst.msk [vmem:[%s9475_s6 + $0x74] sm:$0xf] %vm544_vm7, %v7277_v48 }
 0x362 PF: > { %s15_s18 = sadd.s32 1, %s7865_s18  }
 0x363   : > { %p12_p4 = scmp.ge.s32.totalorder %s15_s18, 4  }
 0x365   :  { %14 = sbr.rel (!%p12_p4) target bundleno = 1 (0x1), region = 81 }

</bundles_post_ra>
